<compile_context>
chip_gen: v7x
topology: tpu7x:2x2x1
jax: 0.10.0
libtpu: 0.0.40
codegen_flags: <defaults>
</compile_context>

<pallas_src>
import functools

import jax
import jax.numpy as jnp
from jax.experimental import pallas as pl
from jax.experimental.pallas import tpu as pltpu


def _pick_tile(dim: int, align: int, bytes_per_unit: int, budget_bytes: int) -> int:
    """Largest divisor `t` of `dim` with (t % align == 0 or t == dim) whose
    footprint t * bytes_per_unit fits `budget_bytes`; falls back to the
    smallest aligned divisor if nothing fits."""
    valid = [d for d in range(1, dim + 1)
             if dim % d == 0 and (d % align == 0 or d == dim)]
    fitting = [d for d in valid if d * bytes_per_unit <= budget_bytes]
    return max(fitting) if fitting else min(valid)


def _make_expand_kernel(s: int, co: int, th: int, tw: int):
    def expand_kernel(x_ref, o_ref):
        # x_ref: (1, C, TH, TW)         with C = co * s * s
        # o_ref: (1, co, TH, s, TW*s)   5-D view of the output; last dim lane-dense
        for a in range(s):                                   # static, s is tiny
            # Contiguous channel slab holding all column offsets b for this a.
            xa = x_ref[0, pl.ds(a * s * co, s * co), :, :]   # (s*co, TH, TW)
            xa = xa.reshape(s, co, th, tw)                   # [b, c, t, w]
            # Lane interleave over b: [c, t, w, b] -> [c, t, 1, w*s + b].
            row = jnp.transpose(xa, (1, 2, 3, 0)).reshape(co, th, 1, tw * s)
            # The row offset `a` is placed by the output view's 4th axis.
            o_ref[0, :, :, pl.ds(a, 1), :] = row
    return expand_kernel


@functools.partial(jax.jit, static_argnames=("gain",))
def expand(x: jax.Array, gain: int = 2) -> jax.Array:
    """Pallas implementation of Expand.forward (depth-to-space)."""
    N, C, H, W = x.shape
    s = int(gain)
    assert C % (s * s) == 0, "C must be divisible by gain**2"
    co = C // (s * s)
    itemsize = jnp.dtype(x.dtype).itemsize

    # Keep one input block <= ~128 KiB so the (lane-padded) relayout
    # temporaries and the double-buffered in/out blocks stay far below the
    # scoped-VMEM limit on every TPU generation (64 MiB physical on v7x).
    budget = 128 * 1024
    tw = _pick_tile(W, 128, C * 8 * itemsize, budget)   # lane tile (mult of 128 or full W)
    th = _pick_tile(H, 8, C * tw * itemsize, budget)    # sublane tile (mult of 8 or full H)

    grid = (N, H // th, W // tw)
    out5 = pl.pallas_call(
        _make_expand_kernel(s, co, th, tw),
        # Memory-order-preserving 5-D view of the (N, co, H*s, W*s) output.
        out_shape=jax.ShapeDtypeStruct((N, co, H, s, W * s), x.dtype),
        grid=grid,
        in_specs=[pl.BlockSpec((1, C, th, tw), lambda n, h, w: (n, 0, h, w))],
        out_specs=pl.BlockSpec((1, co, th, s, tw * s),
                               lambda n, h, w: (n, 0, h, 0, w)),
        compiler_params=pltpu.CompilerParams(
            dimension_semantics=("parallel", "parallel", "parallel"),
            vmem_limit_bytes=32 * 1024 * 1024,
        ),
    )(x)
    # Free reshape: out5 is contiguous-identical to the final output layout.
    return out5.reshape(N, co, H * s, W * s)


def expand_ref(x: jnp.ndarray, gain: int = 2) -> jnp.ndarray:
    """Pure-JAX reference mirroring the PyTorch module."""
    N, C, H, W = x.shape
    s = gain
    xr = x.reshape(N, s, s, C // (s * s), H, W)
    xp = jnp.transpose(xr, (0, 3, 4, 1, 5, 2))
    return xp.reshape(N, C // (s * s), H * s, W * s)


if __name__ == "__main__":
    key = jax.random.PRNGKey(0)
    N, C, H, W = 2, 4, 16, 16
    x = jax.random.normal(key, (N, C, H, W), dtype=jnp.float32)

    out = expand(x, gain=2)
    out = jax.block_until_ready(out)

    ref = expand_ref(x, gain=2)
    assert out.shape == (N, C // 4, H * 2, W * 2), out.shape
    assert jnp.allclose(out, ref), "mismatch vs reference"

    print("KERNEL_OK")
</pallas_src>

<mosaic_0001>
module attributes {stable_mosaic.version = 11 : i64} {
  func.func @expand_kernel(%arg0: i32, %arg1: i32, %arg2: i32, %arg3: memref<1x4x16x16xf32, #tpu.memory_space<vmem>>, %arg4: memref<1x1x16x2x32xf32, #tpu.memory_space<vmem>>) attributes {dimension_semantics = [#tpu.dimension_semantics<parallel>, #tpu.dimension_semantics<parallel>, #tpu.dimension_semantics<parallel>], iteration_bounds = array<i64: 2, 1, 1>, scalar_prefetch = 0 : i64, scratch_operands = 0 : i64, tpu.core_type = #tpu.core_type<tc>, window_params = [{transform_indices = @transform_0, window_bounds = array<i64: 1, 4, 16, 16>}, {transform_indices = @transform_1, window_bounds = array<i64: 1, 1, 16, 2, 32>}]} {
    %c0 = arith.constant 0 : index
    %c0_0 = arith.constant 0 : index
    %c0_1 = arith.constant 0 : index
    %c0_2 = arith.constant 0 : index
    %0 = vector.load %arg3[%c0, %c0_0, %c0_1, %c0_2] : memref<1x4x16x16xf32, #tpu.memory_space<vmem>>, vector<1x2x16x16xf32>
    %1 = vector.shape_cast %0 : vector<1x2x16x16xf32> to vector<2x16x16xf32>
    %2 = vector.shape_cast %1 : vector<2x16x16xf32> to vector<2x1x16x16xf32>
    %3 = tpu.transpose %2, [1, 2, 3, 0] : vector<2x1x16x16xf32> -> vector<1x16x16x2xf32>
    %4 = vector.shape_cast %3 : vector<1x16x16x2xf32> to vector<1x16x1x32xf32>
    %c0_3 = arith.constant 0 : index
    %c0_4 = arith.constant 0 : index
    %c0_5 = arith.constant 0 : index
    %c0_6 = arith.constant 0 : index
    %c0_7 = arith.constant 0 : index
    %5 = vector.load %arg4[%c0_3, %c0_4, %c0_5, %c0_6, %c0_7] : memref<1x1x16x2x32xf32, #tpu.memory_space<vmem>>, vector<1x1x16x1x32xf32>
    %6 = vector.shape_cast %5 : vector<1x1x16x1x32xf32> to vector<1x16x1x32xf32>
    %7 = vector.shape_cast %4 : vector<1x16x1x32xf32> to vector<1x1x16x1x32xf32>
    tpu.vector_store %arg4[%c0_3, %c0_4, %c0_5, %c0_6, %c0_7], %7 {strides = array<i32>} : memref<1x1x16x2x32xf32, #tpu.memory_space<vmem>>, vector<1x1x16x1x32xf32>,
    %c0_8 = arith.constant 0 : index
    %c2 = arith.constant 2 : index
    %c0_9 = arith.constant 0 : index
    %c0_10 = arith.constant 0 : index
    %8 = vector.load %arg3[%c0_8, %c2, %c0_9, %c0_10] : memref<1x4x16x16xf32, #tpu.memory_space<vmem>>, vector<1x2x16x16xf32>
    %9 = vector.shape_cast %8 : vector<1x2x16x16xf32> to vector<2x16x16xf32>
    %10 = vector.shape_cast %9 : vector<2x16x16xf32> to vector<2x1x16x16xf32>
    %11 = tpu.transpose %10, [1, 2, 3, 0] : vector<2x1x16x16xf32> -> vector<1x16x16x2xf32>
    %12 = vector.shape_cast %11 : vector<1x16x16x2xf32> to vector<1x16x1x32xf32>
    %c0_11 = arith.constant 0 : index
    %c0_12 = arith.constant 0 : index
    %c0_13 = arith.constant 0 : index
    %c1 = arith.constant 1 : index
    %c0_14 = arith.constant 0 : index
    %13 = vector.load %arg4[%c0_11, %c0_12, %c0_13, %c1, %c0_14] : memref<1x1x16x2x32xf32, #tpu.memory_space<vmem>>, vector<1x1x16x1x32xf32>
    %14 = vector.shape_cast %13 : vector<1x1x16x1x32xf32> to vector<1x16x1x32xf32>
    %15 = vector.shape_cast %12 : vector<1x16x1x32xf32> to vector<1x1x16x1x32xf32>
    tpu.vector_store %arg4[%c0_11, %c0_12, %c0_13, %c1, %c0_14], %15 {strides = array<i32>} : memref<1x1x16x2x32xf32, #tpu.memory_space<vmem>>, vector<1x1x16x1x32xf32>,
    return
  }
  func.func @transform_0(%arg0: i32, %arg1: i32, %arg2: i32) -> (i32, i32, i32, i32) {
    %c0_i32 = arith.constant 0 : i32
    %c0_i32_0 = arith.constant 0 : i32
    return %arg0, %c0_i32, %arg1, %arg2 : i32, i32, i32, i32
  }
  func.func @transform_1(%arg0: i32, %arg1: i32, %arg2: i32) -> (i32, i32, i32, i32, i32) {
    %c0_i32 = arith.constant 0 : i32
    %c0_i32_0 = arith.constant 0 : i32
    %c0_i32_1 = arith.constant 0 : i32
    return %arg0, %c0_i32, %arg1, %c0_i32_0, %arg2 : i32, i32, i32, i32, i32
  }
}

</mosaic_0001>

<bundles_post_ra>
// kernel: expand.1
= control target key start
LH: loop header
LB: loop body
LE: loop exit
PB: predicated region body
PF: predicated region fallthrough
CT: control target
= control target key end

     0   :  { %6 = vsyncpa [#allocation3], 0  ;;  %s13941_s0 = inlined_call_operand.hbm [shape: f32[2,4,16,16], index: 0, kind: input, shape index: {}]   ;;  %s13942_s1 = inlined_call_operand.hbm [shape: f32[2,1,16,2,32], index: 1, kind: output, shape index: {}]  }
   0x1   :  { %8 = vsyncpa [#allocation3 + $0x1], 0 }
   0x2   :  { %9 = vsyncpa [#allocation4], 0 }
   0x3   :  { %11 = vsyncpa [#allocation4 + $0x1], 0  ;;  %s8656_s6 = smov 0   ;;  %s8658_s7 = smov 0  }
   0x4   :  { %s8660_s8 = smov 0   ;;  %s8662_s9 = smov 0  }
   0x5   :  { %s8664_s10 = smov 0   ;;  %s8666_s11 = smov 0  }
   0x6 LB: > { %s8373_s12 = sadd.s32 4294967295, %s8621_s11   ;;  %s8374_s13 = sadd.s32 4294967294, %s8621_s11   ;;  %s8621_s11 = sphi %s8666_s11, %s17_s11   ;;  %s8617_s10 = sphi %s8664_s10, %s14828_s10   ;;  %s8613_s9 = sphi %s8662_s9, %s14827_s9   ;;  %s8609_s8 = sphi %s8660_s8, %s14826_s8   ;;  %s8605_s7 = sphi %s8658_s7, %s14825_s7   ;;  %s8601_s6 = sphi %s8656_s6, %s14824_s6  }
   0x7   : > { %s36_s14 = sadd.s32 1, %s8617_s10  ;;  %s47_s15 = sadd.s32 1, %s8609_s8 }
   0x8   : > { %p38_p0 = scmp.ge.s32.totalorder %s36_s14, 2  ;;  %p54_p1 = scmp.ne.s32.totalorder %s8609_s8, %s8605_s7 }
   0x9   : > { %p55_p2 = scmp.eq.s32.totalorder %s8621_s11, 0  ;;  %p60_p3 = scmp.ne.s32.totalorder %s8605_s7, %s8601_s6 }
   0xa   : > { %s14830_s14 = smov (%p38_p0, %s36_s14), 0  ;;  %p61_p5 = scmp.eq.s32.totalorder %s8373_s12, 0 }
   0xb   : > { %p8697_p4 = por %p55_p2, %p54_p1  ;;  %s40_s17 = ssub.s32 %s8617_s10, %s14830_s14 }
   0xc   : > { %p88_p6 = scmp.eq.s32.totalorder %s8373_s12, 1  ;;  %p45_p7 = scmp.eq.s32.totalorder %s40_s17, 0 }
   0xd   : > { %p8703_p8 = por %p61_p5, %p60_p3  ;;  %p94_p10 = scmp.eq.s32.totalorder %s8374_s13, 1 }
   0xe   : > { %p8707_p9 = por %p88_p6, %p54_p1  ;;  %p8438_p13 = scmp.lt.s32.totalorder %s8621_s11, 2 }
   0xf   : > { %s8712_s20 = scalar_select %p45_p7, %s8609_s8, %s47_s15  }
  0x10   : > { %s14027_s19 = scalar_select %p8707_p9, 1, 0 }
  0x11   : > { %p8714_p11 = por %p94_p10, %p60_p3  ;;  %s114_s22 = sand.u32 1, %s8609_s8  }
  0x12   : > { %s8377_s23 = sshll.u32 %s114_s22, 6  ;;  %s8424_s24 = sshll.u32 %s8617_s10, 10 }
  0x13   : > { %s14028_s21 = scalar_select %p8714_p11, 1, 0 }
  0x14   : > { %s8725_s27 = scalar_lea.hbm %s13941_s0, %s8424_s24  ;;  %s118_s28 = scalar_lea.vmem [#allocation2], %s8377_s23 }
  0x15   : > { %s128_s29 = sshll.u32 %s118_s28, 4  ;;  %p8731_p0 = pnand %p8438_p13, %p8697_p4  ;;  %s8727_s29 = int_to_ptr.vmem [resolvable:$true] %s128_s29 }
  0x16   : > { %s8736_s2 = scalar_lea.sflag [#allocation3], %s114_s22  ;;  %s8509_s3 = scalar_lea.hbm %s8725_s27, 1024 }
  0x17   : > { %p8510_p2 = scmp.ne.s32.totalorder %s8725_s27, %s8509_s3  ;;  %p8511_p3 = pneg %p8731_p0 }
  0x18   : > { %s8514_s12 = scalar_lea.hbm %s13941_s0, 2048  ;;  %p8515_p4 = scmp.lt.u32.totalorder %s8725_s27, %s13941_s0 }
  0x19   : > { %p8512_p5 = pnand %p8511_p3, %p8510_p2  ;;  %p8516_p7 = scmp.lt.u32.totalorder %s8514_s12, %s8509_s3 }
  0x1a   : > { %p8518_p13 = scmp.lt.u32.totalorder %s8509_s3, %s8725_s27 }
  0x1b   : > { %p8513_p6 = pneg %p8512_p5  ;;  %p8517_p10 = por %p8516_p7, %p8515_p4 }
  0x1d   : > { %p8519_p12 = por %p8518_p13, %p8517_p10 }
  0x1f   : > { %p8520_p1 = pnand %p8519_p12, %p8513_p6 }
  0x21   : > { %8523 = shalt.err (!%p8520_p1)
}
  0x22   : > { %s8524_s16 = scalar_lea.vmem %s8727_s29, 1024  ;;  %s8623_s17 = smov [#allocation2]  }
  0x23   : > { %p8525_p2 = scmp.ne.s32.totalorder %s8727_s29, %s8524_s16  ;;  %s8529_s22 = sshll.u32 %s8623_s17, 4  ;;  %s8530_s22 = int_to_ptr.vmem [resolvable:$false] %s8529_s22 }
  0x24   : > { %s8531_s23 = scalar_lea.vmem %s8530_s22, 2048  ;;  %p8532_p9 = scmp.lt.s32.totalorder %s8727_s29, %s8530_s22 }
  0x25   : > { %p8527_p5 = pnand %p8525_p2, %p8511_p3  ;;  %p8533_p4 = scmp.lt.s32.totalorder %s8531_s23, %s8524_s16 }
  0x27   : > { %p8528_p11 = pneg %p8527_p5  ;;  %p8534_p7 = por %p8533_p4, %p8532_p9 }
  0x29   : > { %p8535_p10 = pnand %p8534_p7, %p8528_p11 }
  0x2b   : > { %8538 = shalt.err (!%p8535_p10)
}
  0x2c   : > { %s8624_s24 = smov 128   ;;  %s8625_s25 = smov 8  }
  0x2d   : > { %8433 = dma.hbm_to_vmem [thread:$0]  (!%p8731_p0), %s8725_s27, 1024, %s8727_s29, %s8736_s2, %s8624_s24, %s8624_s24, %s8625_s25  }
  0x2e   : > { %p136_p12 = scmp.lt.s32.totalorder %s8621_s11, 3  ;;  %p14030_p1 = scmp.ge.s32.totalorder %s8621_s11, 1 }
  0x30   : > { %p137_p3 = pnand %p14030_p1, %p136_p12 }
  0x32   : > { %140 = sbr.rel (%p137_p3) target bundleno = 1488 (0x5d0), region = 24 }
  0x39   : > { %s8768_s26 = sand.u32 1, %s8605_s7  }
  0x3a   : > { %s8381_s28 = sshll.u32 %s8768_s26, 6  ;;  %s143_s3 = scalar_lea.sflag [#allocation3], %s8768_s26 }
  0x3b   : > { %s146_s4 = scalar_lea.vmem [#allocation2], %s8381_s28 }
  0x3c   : > { %8592 = dma.done.wait (%p8703_p8), %s143_s3, 1024  }
  0x3d   : > { %8594 = vsyncadd (%p8703_p8), %s143_s3, 4294966272  ;;  %v169_v0 = vld [vmem:[%s146_s4 + $0x10] sm:$0xff]  ;;  %v167_v1 = vld [vmem:[%s146_s4] sm:$0xff]  ;;  %v8626_v8 = vmov 1983009808   ;;  %v239_v10 = vlaneseq  ;;  %v13944_v29 = vmov 0.0  }
  0x3e   : > { %203 = vxpose.xlu1.b32.start [1/2] (short) (narrow) %v169_v0, 16  ;;  %171 = vxpose.xlu0.b32.start [1/2] (short) (narrow) %v167_v1, 16  ;;  %v170_v2 = vld [vmem:[%s146_s4 + $0x18] sm:$0xff]  ;;  %v168_v3 = vld [vmem:[%s146_s4 + $0x8] sm:$0xff]  ;;  %v8399_v4 = vld [vmem:[%s146_s4 + $0x20] sm:$0xff]  ;;  %v237_v9 = vunpack.c.l.s4 %v8626_v8  ;;  %s8629_s18 = smov 2  }
  0x3f   : > { %v8401_v5 = vld [vmem:[%s146_s4 + $0x30] sm:$0xff]  ;;  %v8400_v6 = vld [vmem:[%s146_s4 + $0x28] sm:$0xff]  ;;  %v8402_v7 = vld [vmem:[%s146_s4 + $0x38] sm:$0xff]  ;;  %v240_v12 = vshrl.u32 %v239_v10, 7  ;;  %v8627_v13 = vmov 1934713408  }
  0x40   : > { %v238_v11 = vunpack.c.0.s8 %v237_v9  ;;  %v268_v14 = vunpack.c.l.s4 %v8627_v13  ;;  %s8630_s27 = smov 4   ;;  %s8631_s29 = smov 6   ;;  %vm3951_vm0 = vcmask 15360   ;;  %vm3968_vm1 = vcmask 31744  }
  0x41   : > { %s8632_s30 = smov 8   ;;  %s8633_s2 = smov 10   ;;  %vm3985_vm2 = vcmask 48128   ;;  %vm4002_vm3 = vcmask 64512   ;;  %vm4019_vm4 = vcmask 80896   ;;  %vm4036_vm5 = vcmask 97280  }
  0x42   : > { %204 = vxpose.xlu1.b32.end [2/2] (short) (narrow) %v170_v2, 16  ;;  %172 = vxpose.xlu0.b32.end [2/2] (short) (narrow) %v168_v3, 16  ;;  %v8776_v15 = vsub.s32 %v238_v11, %v240_v12  ;;  %v269_v16 = vunpack.c.0.s8 %v268_v14  ;;  %s8634_s5 = smov 12   ;;  %s8635_s12 = smov 14   ;;  %vm4053_vm6 = vcmask 113664   ;;  %vm4070_vm7 = vcmask 130048  }
  0x43   : > { %s8636_s13 = smov 16   ;;  %s8637_s15 = smov 18   ;;  %vm4087_vm8 = vcmask 146432   ;;  %vm4104_vm9 = vcmask 162816   ;;  %vm4121_vm10 = vcmask 179200   ;;  %vm4138_vm11 = vcmask 195584  }
  0x44   : > { %14031 = vst [vmem:[#allocation8_spill] sm:$0xff] %v8776_v15  ;;  %v8780_v21 = vsub.s32 %v269_v16, %v240_v12  ;;  %s8638_s16 = smov 20   ;;  %s8639_s17 = smov 22   ;;  %vm4155_vm12 = vcmask 211968   ;;  %vm4172_vm13 = vcmask 228352   ;;  %vm4189_vm14 = vcmask 244736  }
  0x45   : > { %s8640_s22 = smov 24   ;;  %s8641_s23 = smov 26   ;;  %vm4206_vm15 = vcmask 253952  }
  0x46   : > { %4228 = vxpose.xlu1.b32.start [1/2] (short) (narrow) %v8399_v4, 16  ;;  %4260 = vxpose.xlu0.b32.start [1/2] (short) (narrow) %v8401_v5, 16  ;;  %14032 = vst [vmem:[#allocation9_spill] sm:$0xff] %v8780_v21  ;;  %s8642_s24 = smov 28   ;;  %s8643_s25 = smov 30  }
  0x47   : > { %s8382_s28 = sshll.u32 %s8768_s26, 5  ;;  %s8425_s4 = sshll.u32 %s8613_s9, 9 }
  0x48   : > { %s11709_s3 = scalar_lea.vmem [#allocation5], %s8382_s28  ;;  %s8265_s9 = scalar_lea.sflag [#allocation4], %s8768_s26 }
  0x49   : > { %p14821_p9 = scmp.ne.s32.totalorder %s14027_s19, 0 }
  0x4a   : > { %4229 = vxpose.xlu1.b32.end [2/2] (short) (narrow) %v8400_v6, 16  ;;  %4261 = vxpose.xlu0.b32.end [2/2] (short) (narrow) %v8402_v7, 16 }
  0xbe   : > { %v219_v17 = vpop.trf.xlu1  ;;  %v187_v18 = vpop.trf.xlu0 }
  0xbf   : > { %v257_v19 = vrot.slane %v219_v17, %v8776_v15  ;;  %v242_v20 = vrot.slane %v187_v18, %v8776_v15  ;;  %v250_v30 = vcombine.high %v219_v17, %v13944_v29  ;;  %v235_v31 = vcombine.high %v187_v18, %v13944_v29 }
  0xc1   : > { %v265_v22 = vcombine.low %v242_v20, %v257_v19  ;;  %v266_v26 = vcombine.high %v242_v20, %v257_v19  ;;  %v249_v38 = vrot.slane %v235_v31, %v8776_v15  ;;  %v264_v39 = vrot.slane %v250_v30, %v8776_v15 }
  0xc2   : > { %v220_v23 = vpop.trf.xlu1  ;;  %v188_v24 = vpop.trf.xlu0 }
  0xc3   : > { %v273_v25 = vrot.slane %v265_v22, %v8780_v21  ;;  %v280_v34 = vrot.slane %v266_v26, %v8780_v21  ;;  %v281_v41 = vcombine.low %v249_v38, %v264_v39  ;;  %v282_v44 = vcombine.high %v249_v38, %v264_v39 }
  0xc4   : > { %v323_v46 = vrot.slane %v220_v23, %v8776_v15  ;;  %v308_v47 = vrot.slane %v188_v24, %v8776_v15  ;;  %v316_v52 = vcombine.high %v220_v23, %v13944_v29  ;;  %v301_v53 = vcombine.high %v188_v24, %v13944_v29 }
  0xc5   : > { %367 = vxpose.xlu0.b32.start.end [1/1] (short) (narrow) %v273_v25, 16  ;;  %v297_v42 = vcombine.high %v273_v25, %v13944_v29  ;;  %v289_v43 = vrot.slane %v281_v41, %v8780_v21  ;;  %v298_v45 = vcombine.high %v280_v34, %v13944_v29  ;;  %v296_v48 = vrot.slane %v282_v44, %v8780_v21 }
  0xc6   : > { %v4244_v27 = vpop.trf.xlu1  ;;  %v4276_v28 = vpop.trf.xlu0  ;;  %v331_v50 = vcombine.low %v308_v47, %v323_v46  ;;  %v332_v56 = vcombine.high %v308_v47, %v323_v46  ;;  %v330_v57 = vrot.slane %v316_v52, %v8776_v15  ;;  %v315_v58 = vrot.slane %v301_v53, %v8776_v15 }
  0xc7   : > { %v4299_v32 = vrot.slane %v4244_v27, %v8776_v15  ;;  %v4314_v33 = vrot.slane %v4276_v28, %v8776_v15  ;;  %v299_v49 = vcombine.high %v289_v43, %v13944_v29  ;;  %v300_v54 = vcombine.high %v296_v48, %v13944_v29 }
  0xc8   : > { %v339_v55 = vrot.slane %v331_v50, %v8780_v21  ;;  %v346_v61 = vrot.slane %v332_v56, %v8780_v21  ;;  %v347_v62 = vcombine.low %v315_v58, %v330_v57  ;;  %v4292_v1 = vcombine.high %v4244_v27, %v13944_v29 }
  0xc9   : > { %v4323_v35 = vcombine.high %v4299_v32, %v4314_v33  ;;  %v4322_v36 = vcombine.low %v4299_v32, %v4314_v33  ;;  %v4307_v2 = vcombine.high %v4276_v28, %v13944_v29  ;;  %v348_v3 = vcombine.high %v315_v58, %v330_v57 }
  0xca   : > { %431 = vxpose.xlu0.b32.start.end [1/1] (short) (narrow) %v280_v34, 16  ;;  %v363_v60 = vcombine.high %v339_v55, %v13944_v29  ;;  %v364_v63 = vcombine.high %v346_v61, %v13944_v29  ;;  %v355_v0 = vrot.slane %v347_v62, %v8780_v21  ;;  %v4306_v6 = vrot.slane %v4292_v1, %v8776_v15  ;;  %v4245_v10 = vpop.trf.xlu1  ;;  %v4277_v11 = vpop.trf.xlu0 }
  0xcb   : > { %v4337_v37 = vrot.slane %v4323_v35, %v8780_v21  ;;  %v4330_v40 = vrot.slane %v4322_v36, %v8780_v21  ;;  %v362_v5 = vrot.slane %v348_v3, %v8780_v21  ;;  %v4321_v7 = vrot.slane %v4307_v2, %v8776_v15 }
  0xcc   : > { %v365_v4 = vcombine.high %v355_v0, %v13944_v29  ;;  %v4365_v13 = vrot.slane %v4245_v10, %v8776_v15  ;;  %v4380_v14 = vrot.slane %v4277_v11, %v8776_v15  ;;  %v4358_v20 = vcombine.high %v4245_v10, %v13944_v29 }
  0xcd   : > { %4488 = vxpose.xlu1.b32.start.end [1/1] (short) (narrow) %v4337_v37, 16  ;;  %v4354_v51 = vcombine.high %v4330_v40, %v13944_v29  ;;  %v4355_v59 = vcombine.high %v4337_v37, %v13944_v29  ;;  %v366_v8 = vcombine.high %v362_v5, %v13944_v29  ;;  %v4338_v9 = vcombine.low %v4306_v6, %v4321_v7 }
  0xce   : > { %v4339_v16 = vcombine.high %v4306_v6, %v4321_v7  ;;  %v4388_v18 = vcombine.low %v4365_v13, %v4380_v14  ;;  %v4373_v22 = vcombine.high %v4277_v11, %v13944_v29  ;;  %v4389_v25 = vcombine.high %v4365_v13, %v4380_v14 }
  0xcf   : > { %4424 = vxpose.xlu0.b32.start.end [1/1] (short) (narrow) %v4330_v40, 16  ;;  %v4346_v12 = vrot.slane %v4338_v9, %v8780_v21  ;;  %v4372_v26 = vrot.slane %v4358_v20, %v8776_v15 }
  0xd0   : > { %v4353_v19 = vrot.slane %v4339_v16, %v8780_v21  ;;  %v4396_v23 = vrot.slane %v4388_v18, %v8780_v21  ;;  %v4387_v27 = vrot.slane %v4373_v22, %v8776_v15  ;;  %v4403_v30 = vrot.slane %v4389_v25, %v8780_v21 }
  0xd1   : > { %v4356_v17 = vcombine.high %v4346_v12, %v13944_v29 }
  0xd2   : > { %399 = vxpose.xlu1.b32.start.end [1/1] (short) (narrow) %v297_v42, 16  ;;  %v4357_v24 = vcombine.high %v4353_v19, %v13944_v29  ;;  %v4420_v28 = vcombine.high %v4396_v23, %v13944_v29  ;;  %v4404_v31 = vcombine.low %v4372_v26, %v4387_v27  ;;  %v4421_v32 = vcombine.high %v4403_v30, %v13944_v29 }
  0xd3   : > { %v4405_v34 = vcombine.high %v4372_v26, %v4387_v27 }
  0xd4   : > { %495 = vxpose.xlu0.b32.start.end [1/1] (short) (narrow) %v289_v43, 16  ;;  %v4412_v33 = vrot.slane %v4404_v31, %v8780_v21 }
  0xd5   : > { %v4419_v36 = vrot.slane %v4405_v34, %v8780_v21 }
  0xd6   : > { %v4422_v35 = vcombine.high %v4412_v33, %v13944_v29 }
  0xd7   : > { %463 = vxpose.xlu1.b32.start.end [1/1] (short) (narrow) %v298_v45, 16  ;;  %v4423_v37 = vcombine.high %v4419_v36, %v13944_v29 }
  0xd9   : > { %559 = vxpose.xlu0.b32.start.end [1/1] (short) (narrow) %v296_v48, 16 }
  0xdc   : > { %527 = vxpose.xlu1.b32.start.end [1/1] (short) (narrow) %v299_v49, 16 }
  0xde   : > { %4456 = vxpose.xlu0.b32.start.end [1/1] (short) (narrow) %v4354_v51, 16 }
  0xe1   : > { %591 = vxpose.xlu1.b32.start.end [1/1] (short) (narrow) %v300_v54, 16 }
  0xe3   : > { %4520 = vxpose.xlu0.b32.start.end [1/1] (short) (narrow) %v4355_v59, 16 }
  0xe6   : > { %655 = vxpose.xlu1.b32.start.end [1/1] (short) (narrow) %v363_v60, 16 }
  0xe8   : > { %623 = vxpose.xlu0.b32.start.end [1/1] (short) (narrow) %v339_v55, 16 }
  0xeb   : > { %719 = vxpose.xlu1.b32.start.end [1/1] (short) (narrow) %v364_v63, 16 }
  0xed   : > { %687 = vxpose.xlu0.b32.start.end [1/1] (short) (narrow) %v346_v61, 16 }
  0xf0   : > { %783 = vxpose.xlu1.b32.start.end [1/1] (short) (narrow) %v365_v4, 16 }
  0xf2   : > { %751 = vxpose.xlu0.b32.start.end [1/1] (short) (narrow) %v355_v0, 16 }
  0xf5   : > { %847 = vxpose.xlu1.b32.start.end [1/1] (short) (narrow) %v366_v8, 16 }
  0xf7   : > { %815 = vxpose.xlu0.b32.start.end [1/1] (short) (narrow) %v362_v5, 16 }
  0xfa   : > { %4552 = vxpose.xlu1.b32.start.end [1/1] (short) (narrow) %v4346_v12, 16 }
  0xfc   : > { %4584 = vxpose.xlu0.b32.start.end [1/1] (short) (narrow) %v4356_v17, 16 }
  0xff   : > { %4616 = vxpose.xlu1.b32.start.end [1/1] (short) (narrow) %v4353_v19, 16 }
 0x101   : > { %4648 = vxpose.xlu0.b32.start.end [1/1] (short) (narrow) %v4357_v24, 16 }
 0x104   : > { %4680 = vxpose.xlu1.b32.start.end [1/1] (short) (narrow) %v4396_v23, 16 }
 0x106   : > { %4712 = vxpose.xlu0.b32.start.end [1/1] (short) (narrow) %v4420_v28, 16 }
 0x109   : > { %4744 = vxpose.xlu1.b32.start.end [1/1] (short) (narrow) %v4403_v30, 16 }
 0x10b   : > { %4776 = vxpose.xlu0.b32.start.end [1/1] (short) (narrow) %v4421_v32, 16 }
 0x10e   : > { %4808 = vxpose.xlu1.b32.start.end [1/1] (short) (narrow) %v4412_v33, 16 }
 0x110   : > { %4840 = vxpose.xlu0.b32.start.end [1/1] (short) (narrow) %v4422_v35, 16 }
 0x113   : > { %4872 = vxpose.xlu1.b32.start.end [1/1] (short) (narrow) %v4419_v36, 16 }
 0x115   : > { %4904 = vxpose.xlu0.b32.start.end [1/1] (short) (narrow) %v4423_v37, 16 }
 0x145   : > { %v383_v38 = vpop.trf.xlu0 }
 0x149   : > { %v8836_v39 = vpop.trf.xlu0 }
 0x14d   : > { %v8838_v40 = vpop.trf.xlu1  ;;  %v447_v41 = vpop.trf.xlu0 }
 0x14e   : > { %14033 = vst [vmem:[#allocation10_spill] sm:$0xff] %v8838_v40  ;;  %v879_v55 = vcombine.low %v383_v38, %v447_v41  ;;  %v880_v59 = vcombine.high %v383_v38, %v447_v41 }
 0x150   : > { %v887_v63 = vrot.slane %v879_v55, %v8776_v15  ;;  %v894_v5 = vrot.slane %v880_v59, %v8776_v15 }
 0x151   : > { %v8840_v42 = vpop.trf.xlu1  ;;  %v8842_v43 = vpop.trf.xlu0 }
 0x152   : > { %14034 = vst [vmem:[#allocation11_spill] sm:$0xff] %v8840_v42  ;;  %v1151_v33 = vcombine.low %v8836_v39, %v8842_v43 }
 0x155   : > { %v415_v44 = vpop.trf.xlu1  ;;  %v8844_v45 = vpop.trf.xlu0 }
 0x156   : > { %14035 = vst [vmem:[#allocation12_spill] sm:$0xff] %v8844_v45 }
 0x159   : > { %v8846_v46 = vpop.trf.xlu1  ;;  %v8848_v47 = vpop.trf.xlu0 }
 0x15a   : > { %14036 = vst [vmem:[#allocation13_spill] sm:$0xff] %v8848_v47 }
 0x15d   : > { %v479_v48 = vpop.trf.xlu1  ;;  %v511_v49 = vpop.trf.xlu0 }
 0x15e   : > { %v895_v54 = vcombine.low %v415_v44, %v479_v48  ;;  %v896_v57 = vcombine.high %v415_v44, %v479_v48 }
 0x160   : > { %v903_v60 = vrot.slane %v895_v54, %v8776_v15  ;;  %v8861_v1 = vrot.slane %v896_v57, %v8776_v15 }
 0x161   : > { %v8850_v50 = vpop.trf.xlu1  ;;  %v8852_v51 = vpop.trf.xlu0 }
 0x162   : > { %v943_v6 = vcombine.low %v887_v63, %v903_v60  ;;  %v944_v11 = vcombine.high %v887_v63, %v903_v60  ;;  %v959_v13 = vcombine.low %v894_v5, %v8861_v1  ;;  %v1167_v26 = vcombine.low %v8846_v46, %v8850_v50 }
 0x163   : > { %v960_v54 = vcombine.high %v894_v5, %v8861_v1 }
 0x164   : > { %v951_v20 = vrot.slane %v943_v6, %v8780_v21  ;;  %v958_v25 = vrot.slane %v944_v11, %v8780_v21  ;;  %v967_v27 = vrot.slane %v959_v13, %v8780_v21  ;;  %v1175_v41 = vrot.slane %v1167_v26, %v8776_v15 }
 0x165   : > { %v543_v52 = vpop.trf.xlu1  ;;  %v575_v53 = vpop.trf.xlu0  ;;  %v1152_v6 = vcombine.high %v8836_v39, %v8842_v43  ;;  %v974_v43 = vrot.slane %v960_v54, %v8780_v21 }
 0x166   : > { %v911_v61 = vcombine.low %v511_v49, %v575_v53  ;;  %v912_v62 = vcombine.high %v511_v49, %v575_v53  ;;  %v1159_v53 = vrot.slane %v1151_v33, %v8776_v15 }
 0x168   : > { %v919_v7 = vrot.slane %v911_v61, %v8776_v15  ;;  %v926_v8 = vrot.slane %v912_v62, %v8776_v15  ;;  %v1168_v62 = vcombine.high %v8846_v46, %v8850_v50  ;;  %v1215_v63 = vcombine.low %v1159_v53, %v1175_v41 }
 0x169   : > { %v8854_v56 = vpop.trf.xlu1  ;;  %v8856_v58 = vpop.trf.xlu0 }
 0x16a   : > { %v1183_v28 = vcombine.low %v8852_v51, %v8856_v58 }
 0x16c   : > { %v1191_v44 = vrot.slane %v1183_v28, %v8776_v15 }
 0x16d   : > { %v607_v0 = vpop.trf.xlu1  ;;  %v8863_v4 = vpop.trf.xlu0 }
 0x16e   : > { %v927_v2 = vcombine.low %v543_v52, %v607_v0  ;;  %v928_v3 = vcombine.high %v543_v52, %v607_v0  ;;  %14037 = vst [vmem:[#allocation14_spill] sm:$0xff] %v8863_v4 }
 0x170   : > { %v935_v9 = vrot.slane %v927_v2, %v8776_v15  ;;  %v942_v10 = vrot.slane %v928_v3, %v8776_v15  ;;  %v1184_v2 = vcombine.high %v8852_v51, %v8856_v58  ;;  %v1182_v58 = vrot.slane %v1168_v62, %v8776_v15 }
 0x171   : > { %v608_v12 = vpop.trf.xlu1  ;;  %v8871_v18 = vpop.trf.xlu0 }
 0x172   : > { %v975_v14 = vcombine.low %v919_v7, %v935_v9  ;;  %v976_v16 = vcombine.high %v919_v7, %v935_v9  ;;  %v991_v17 = vcombine.low %v926_v8, %v942_v10  ;;  %14038 = vst [vmem:[#allocation15_spill] sm:$0xff] %v8871_v18  ;;  %v1199_v19 = vcombine.low %v8854_v56, %v608_v12 }
 0x173   : > { %v992_v55 = vcombine.high %v926_v8, %v942_v10  ;;  %v1200_v57 = vcombine.high %v8854_v56, %v608_v12  ;;  %v1216_v7 = vcombine.high %v1159_v53, %v1175_v41  ;;  %v1223_v9 = vrot.slane %v1215_v63, %v8780_v21 }
 0x174   : > { %v8876_v22 = vrot.slane %v975_v14, %v8780_v21  ;;  %v8879_v23 = vrot.slane %v976_v16, %v8780_v21  ;;  %v8882_v24 = vrot.slane %v991_v17, %v8780_v21  ;;  %v1207_v34 = vrot.slane %v1199_v19, %v8776_v15 }
 0x175   : > { %v8890_v30 = vpop.trf.xlu0  ;;  %v8934_v0 = vpop.trf.xlu1  ;;  %v8947_v46 = vrot.slane %v992_v55, %v8780_v21  ;;  %v1214_v50 = vrot.slane %v1200_v57, %v8776_v15  ;;  %v1198_v10 = vrot.slane %v1184_v2, %v8776_v15  ;;  %v1166_v14 = vrot.slane %v1152_v6, %v8776_v15 }
 0x176   : > { %v1008_v31 = vcombine.high %v951_v20, %v8876_v22  ;;  %v8894_v32 = vcombine.low %v951_v20, %v8876_v22  ;;  %v8907_v37 = vcombine.low %v958_v25, %v8879_v23  ;;  %v1012_v38 = vcombine.high %v967_v27, %v8882_v24 }
 0x177   : > { %v1247_v59 = vcombine.low %v1191_v44, %v1207_v34  ;;  %v1248_v3 = vcombine.high %v1191_v44, %v1207_v34  ;;  %v1230_v16 = vrot.slane %v1216_v7, %v8780_v21  ;;  %v1010_v19 = vcombine.high %v958_v25, %v8879_v23 }
 0x178   : > { %v8900_v35 = vrot.slane %v1008_v31, %v8776_v15  ;;  %v8904_v36 = vrot.slane %v8894_v32, %v8776_v15  ;;  %v8927_v60 = vrot.slane %v8907_v37, %v8776_v15  ;;  %v8930_v61 = vrot.slane %v1012_v38, %v8776_v15 }
 0x179   : > { %v8912_v48 = vpop.trf.xlu0  ;;  %v8952_v8 = vrot.slane %v1247_v59, %v8780_v21  ;;  %v8968_v11 = vrot.slane %v1248_v3, %v8780_v21  ;;  %v8976_v17 = vpop.trf.xlu1  ;;  %v1014_v20 = vcombine.high %v974_v43, %v8947_v46  ;;  %v1263_v26 = vcombine.low %v1198_v10, %v1214_v50 }
 0x17a   : > { %14039 = vst [vmem:[#allocation16_spill] sm:$0xff] %v8912_v48  ;;  %v8916_v49 = vrot.slane %v8900_v35, %v8780_v21  ;;  %v8920_v52 = vrot.slane %v8904_v36, %v8780_v21  ;;  %v8957_v51 = vrot.slane %v8927_v60, %v8780_v21  ;;  %v8961_v39 = vrot.slane %v8930_v61, %v8780_v21 }
 0x17b   : > { %v8985_v31 = vcombine.low %v967_v27, %v8882_v24  ;;  %v1280_v33 = vcombine.high %v1223_v9, %v8952_v8  ;;  %v8989_v34 = vrot.slane %v1010_v19, %v8776_v15  ;;  %v8992_v38 = vrot.slane %v1014_v20, %v8776_v15 }
 0x17c   : > { %14040 = vst [vmem:[#allocation17_spill] sm:$0xff] %v8916_v49  ;;  %14041 = vst [vmem:[#allocation18_spill] sm:$0xff] %v8920_v52  ;;  %v1566_v1 = vcombine.high %v8916_v49, %v13944_v29  ;;  %v1468_v56 = vcombine.high %v8920_v52, %v13944_v29  ;;  %v1664_v12 = vcombine.high %v8957_v51, %v13944_v29 }
 0x17d   : > { %v8942_v5 = vpop.trf.xlu0  ;;  %14042 = vst [vmem:[#allocation19_spill] sm:$0xff] %v8957_v51  ;;  %14043 = vst [vmem:[#allocation20_spill] sm:$0xff] %v8961_v39  ;;  %v1958_v13 = vcombine.high %v8961_v39, %v13944_v29  ;;  %v8995_v25 = vcombine.low %v974_v43, %v8947_v46  ;;  %v1231_v41 = vcombine.low %v1166_v14, %v1182_v58  ;;  %v9016_v63 = vpop.trf.xlu1 }
 0x17e   : > { %3009 = vrot.lane.b32.xlu1 %v1566_v1, %s8629_s18  ;;  %3007 = vrot.lane.b32.xlu0 %v1468_v56, %s8629_s18  ;;  %v8999_v44 = vrot.slane %v8985_v31, %v8776_v15  ;;  %v9002_v53 = vrot.slane %v1280_v33, %v8776_v15  ;;  %v1282_v27 = vcombine.high %v1230_v16, %v8968_v11 }
 0x17f   : > { %v1264_v54 = vcombine.high %v1198_v10, %v1214_v50  ;;  %v9007_v55 = vrot.slane %v8989_v34, %v8780_v21  ;;  %v9011_v57 = vrot.slane %v8992_v38, %v8780_v21  ;;  %v9014_v59 = vrot.slane %v1263_v26, %v8780_v21 }
 0x180   : > { %v1232_v62 = vcombine.high %v1166_v14, %v1182_v58  ;;  %v9022_v56 = vrot.slane %v8999_v44, %v8780_v21  ;;  %v9026_v2 = vrot.slane %v8995_v25, %v8776_v15  ;;  %v1239_v3 = vrot.slane %v1231_v41, %v8780_v21 }
 0x181   : > { %v8980_v28 = vpop.trf.xlu0  ;;  %14044 = vst [vmem:[#allocation21_spill] sm:$0xff] %v9007_v55  ;;  %14045 = vst [vmem:[#allocation22_spill] sm:$0xff] %v9011_v57  ;;  %v1762_v1 = vcombine.high %v9007_v55, %v13944_v29  ;;  %v2154_v7 = vcombine.high %v9011_v57, %v13944_v29  ;;  %v9035_v50 = vrot.slane %v9002_v53, %v8780_v21  ;;  %v9065_v41 = vpop.trf.xlu1 }
 0x182   : > { %3011 = vrot.lane.b32.xlu1 %v1664_v12, %s8629_s18  ;;  %3017 = vrot.lane.b32.xlu0 %v1958_v13, %s8629_s18  ;;  %14046 = vst [vmem:[#allocation23_spill] sm:$0xff] %v9022_v56  ;;  %v9038_v43 = vrot.slane %v1282_v27, %v8776_v15  ;;  %v9041_v58 = vrot.slane %v1264_v54, %v8780_v21 }
 0x183   : > { %14047 = vst [vmem:[#allocation24_spill] sm:$0xff] %v9035_v50  ;;  %v1284_v10 = vcombine.high %v1239_v3, %v9014_v59  ;;  %v1246_v12 = vrot.slane %v1232_v62, %v8780_v21  ;;  %v1860_v13 = vcombine.high %v9022_v56, %v13944_v29  ;;  %v9051_v14 = vrot.slane %v9026_v2, %v8780_v21 }
 0x184   : > { %v2350_v19 = vcombine.high %v9035_v50, %v13944_v29  ;;  %v9057_v20 = vrot.slane %v9038_v43, %v8780_v21  ;;  %v9063_v33 = vcombine.low %v1223_v9, %v8952_v8  ;;  %v9070_v54 = vcombine.low %v1230_v16, %v8968_v11 }
 0x185   : > { %v9029_v6 = vpop.trf.xlu0  ;;  %14048 = vst [vmem:[#allocation25_spill] sm:$0xff] %v9051_v14  ;;  %v9060_v26 = vrot.slane %v1284_v10, %v8776_v15  ;;  %v1286_v27 = vcombine.high %v1246_v12, %v9041_v58 }
 0x186   : > { %3013 = vrot.lane.b32.xlu1 %v1762_v1, %s8629_s18  ;;  %3021 = vrot.lane.b32.xlu0 %v2154_v7, %s8629_s18  ;;  %14049 = vst [vmem:[#allocation26_spill] sm:$0xff] %v9057_v20  ;;  %v2056_v1 = vcombine.high %v9051_v14, %v13944_v29  ;;  %v9079_v9 = vrot.slane %v9063_v33, %v8776_v15  ;;  %v14052_v14 = vmov 0.0  }
 0x187   : > { %v2546_v7 = vcombine.high %v9057_v20, %v13944_v29  ;;  %v9085_v10 = vrot.slane %v9060_v26, %v8780_v21  ;;  %v9101_v29 = vcombine.low %v1239_v3, %v9014_v59  ;;  %v9103_v20 = vpop.trf.xlu1  ;;  %v1536_v39 = vcombine.high %v8900_v35, %v14052_v14 }
 0x188   : > { %v9090_v16 = vrot.slane %v9079_v9, %v8780_v21  ;;  %v1732_v51 = vcombine.high %v8989_v34, %v14052_v14  ;;  %v1928_v34 = vcombine.high %v8930_v61, %v14052_v14  ;;  %v1634_v49 = vcombine.high %v8927_v60, %v14052_v14 }
 0x189   : > { %v9072_v62 = vpop.trf.xlu0  ;;  %14050 = vst [vmem:[#allocation27_spill] sm:$0xff] %v9085_v10  ;;  %v2742_v56 = vcombine.high %v9085_v10, %v14052_v14  ;;  %v9121_v3 = vrot.slane %v9101_v29, %v8776_v15  ;;  %v1550_v35 = vrot.slane %v1536_v39, %v8780_v21  ;;  %v2026_v42 = vcombine.high %v9026_v2, %v14052_v14 }
 0x18a   : > { %3015 = vrot.lane.b32.xlu1 %v1860_v13, %s8629_s18  ;;  %3025 = vrot.lane.b32.xlu0 %v2350_v19, %s8629_s18  ;;  %14051 = vst [vmem:[#allocation28_spill] sm:$0xff] %v9090_v16  ;;  %v9093_v13 = vrot.slane %v1286_v27, %v8776_v15  ;;  %v9097_v19 = vrot.slane %v9070_v54, %v8776_v15 }
 0x18b   : > { %v9132_v10 = vrot.slane %v9121_v3, %v8780_v21  ;;  %v1746_v39 = vrot.slane %v1732_v51, %v8780_v21  ;;  %v1648_v61 = vrot.slane %v1634_v49, %v8780_v21  ;;  %v2222_v18 = vcombine.high %v9079_v9, %v14052_v14 }
 0x18c   : > { %v9109_v50 = vrot.slane %v9097_v19, %v8780_v21  ;;  %v2712_v2 = vcombine.high %v9060_v26, %v14052_v14  ;;  %v1567_v45 = vcombine.high %v1550_v35, %v14052_v14 }
 0x18d   : > { %v9111_v27 = vpop.trf.xlu0  ;;  %14055 = vst [vmem:[#allocation31_spill] sm:$0xff] %v9132_v10 }
 0x18e   : > { %3019 = vrot.lane.b32.xlu1 %v2056_v1, %s8629_s18  ;;  %3029 = vrot.lane.b32.xlu0 %v2546_v7, %s8629_s18  ;;  %v2252_v1 = vcombine.high %v9090_v16, %v14052_v14  ;;  %14053 = vst [vmem:[#allocation29_spill] sm:$0xff] %v9109_v50  ;;  %v9117_v7 = vrot.slane %v9093_v13, %v8780_v21 }
 0x18f   : > { %v9126_v16 = vcombine.low %v1246_v12, %v9041_v58  ;;  %v2448_v57 = vcombine.high %v9109_v50, %v14052_v14  ;;  %v2644_v50 = vcombine.high %v9132_v10, %v14052_v14  ;;  %v1438_v10 = vcombine.high %v8904_v36, %v14052_v14 }
 0x190   : > { %14054 = vst [vmem:[#allocation30_spill] sm:$0xff] %v9117_v7  ;;  %v2938_v55 = vcombine.high %v9117_v7, %v14052_v14  ;;  %v2124_v36 = vcombine.high %v8992_v38, %v14052_v14  ;;  %v2726_v9 = vrot.slane %v2712_v2, %v8780_v21 }
 0x191   : > { %v9145_v12 = vpop.trf.xlu0 }
 0x192   : > { %3023 = vrot.lane.b32.xlu1 %v2252_v1, %s8629_s18  ;;  %3033 = vrot.lane.b32.xlu0 %v2742_v56, %s8629_s18  ;;  %v9140_v1 = vrot.slane %v9126_v16, %v8776_v15  ;;  %v9142_v56 = vpop.trf.xlu1  ;;  %v2138_v60 = vrot.slane %v2124_v36, %v8780_v21  ;;  %v2516_v36 = vcombine.high %v9038_v43, %v14052_v14 }
 0x193   : > { %v2236_v43 = vrot.slane %v2222_v18, %v8780_v21 }
 0x194   : > { %v9152_v7 = vrot.slane %v9140_v1, %v8780_v21  ;;  %v2810_v2 = vcombine.high %v9140_v1, %v14052_v14 }
 0x195   : > { %v9165_v52 = vpop.trf.xlu0 }
 0x196   : > { %3027 = vrot.lane.b32.xlu1 %v2448_v57, %s8629_s18  ;;  %3037 = vrot.lane.b32.xlu0 %v2938_v55, %s8629_s18  ;;  %14056 = vst [vmem:[#allocation32_spill] sm:$0xff] %v9152_v7  ;;  %v9159_v57 = vpop.trf.xlu1  ;;  %v2840_v55 = vcombine.high %v9152_v7, %v14052_v14  ;;  %v1942_v7 = vrot.slane %v1928_v34, %v8780_v21 }
 0x199   : > { %v9181_v51 = vpop.trf.xlu0 }
 0x19a   : > { %3031 = vrot.lane.b32.xlu1 %v2644_v50, %s8629_s18  ;;  %3073 = vrot.lane.b32.xlu0 %v1550_v35, %s8630_s27  ;;  %v1452_v50 = vrot.slane %v1438_v10, %v8780_v21  ;;  %v9178_v47 = vpop.trf.xlu1  ;;  %v1830_v10 = vcombine.high %v8999_v44, %v14052_v14  ;;  %v1959_v35 = vcombine.high %v1942_v7, %v14052_v14 }
 0x19c   : > { %v1844_v34 = vrot.slane %v1830_v10, %v8780_v21  ;;  %v2530_v10 = vrot.slane %v2516_v36, %v8780_v21  ;;  %v2908_v36 = vcombine.high %v9093_v13, %v14052_v14  ;;  %v1469_v1 = vcombine.high %v1452_v50, %v14052_v14 }
 0x19d   : > { %v9197_v49 = vpop.trf.xlu0 }
 0x19e   : > { %3035 = vrot.lane.b32.xlu1 %v2840_v55, %s8629_s18  ;;  %3077 = vrot.lane.b32.xlu0 %v1746_v39, %s8630_s27  ;;  %v2320_v55 = vcombine.high %v9002_v53, %v14052_v14  ;;  %v9192_v38 = vpop.trf.xlu1  ;;  %v2040_v53 = vrot.slane %v2026_v42, %v8780_v21  ;;  %v2418_v42 = vcombine.high %v9097_v19, %v14052_v14 }
 0x19f   : > { %v2922_v19 = vrot.slane %v2908_v36, %v8780_v21  ;;  %v1763_v36 = vcombine.high %v1746_v39, %v14052_v14  ;;  %v2155_v39 = vcombine.high %v2138_v60, %v14052_v14 }
 0x1a0   : > { %v2334_v44 = vrot.slane %v2320_v55, %v8780_v21 }
 0x1a1   : > { %v9213_v55 = vpop.trf.xlu0 }
 0x1a2   : > { %3071 = vrot.lane.b32.xlu1 %v1452_v50, %s8630_s27  ;;  %3081 = vrot.lane.b32.xlu0 %v1942_v7, %s8630_s27  ;;  %v9210_v48 = vpop.trf.xlu1  ;;  %14058 = vst [vmem:[#allocation34_spill] sm:$0xff] %v9213_v55  ;;  %v2432_v55 = vrot.slane %v2418_v42, %v8780_v21  ;;  %v2824_v42 = vrot.slane %v2810_v2, %v8780_v21 }
 0x1a3   : > { %14057 = vst [vmem:[#allocation33_spill] sm:$0xff] %v9210_v48  ;;  %v2614_v48 = vcombine.high %v9121_v3, %v14052_v14  ;;  %v1861_v50 = vcombine.high %v1844_v34, %v14052_v14  ;;  %v2351_v7 = vcombine.high %v2334_v44, %v14052_v14 }
 0x1a5   : > { %v9229_v18 = vpop.trf.xlu0  ;;  %v2628_v13 = vrot.slane %v2614_v48, %v8780_v21 }
 0x1a6   : > { %3075 = vrot.lane.b32.xlu1 %v1648_v61, %s8630_s27  ;;  %3085 = vrot.lane.b32.xlu0 %v2138_v60, %s8630_s27  ;;  %v9224_v26 = vpop.trf.xlu1  ;;  %v2547_v60 = vcombine.high %v2530_v10, %v14052_v14 }
 0x1a9   : > { %v9241_v3 = vpop.trf.xlu0 }
 0x1aa   : > { %3079 = vrot.lane.b32.xlu1 %v1844_v34, %s8630_s27  ;;  %3089 = vrot.lane.b32.xlu0 %v2334_v44, %s8630_s27  ;;  %v9238_v40 = vpop.trf.xlu1  ;;  %v2253_v34 = vcombine.high %v2236_v43, %v14052_v14 }
 0x1ad   : > { %v9249_v48 = vpop.trf.xlu0 }
 0x1ae   : > { %3083 = vrot.lane.b32.xlu1 %v2040_v53, %s8630_s27  ;;  %3093 = vrot.lane.b32.xlu0 %v2530_v10, %s8630_s27  ;;  %v9246_v4 = vpop.trf.xlu1  ;;  %14060 = vst [vmem:[#allocation36_spill] sm:$0xff] %v9249_v48  ;;  %v2939_v10 = vcombine.high %v2922_v19, %v14052_v14 }
 0x1af   : > { %14059 = vst [vmem:[#allocation35_spill] sm:$0xff] %v9246_v4 }
 0x1b1   : > { %v9260_v4 = vpop.trf.xlu0 }
 0x1b2   : > { %3087 = vrot.lane.b32.xlu1 %v2236_v43, %s8630_s27  ;;  %3097 = vrot.lane.b32.xlu0 %v2726_v9, %s8630_s27  ;;  %v9257_v2 = vpop.trf.xlu1  ;;  %14062 = vst [vmem:[#allocation38_spill] sm:$0xff] %v9260_v4  ;;  %v8385_v43 = vcombine.high %v8879_v23, %v14052_v14  ;;  %v8387_v23 = vcombine.high %v8882_v24, %v14052_v14 }
 0x1b3   : > { %14061 = vst [vmem:[#allocation37_spill] sm:$0xff] %v9257_v2 }
 0x1b6   : > { %3091 = vrot.lane.b32.xlu1 %v2432_v55, %s8630_s27  ;;  %3101 = vrot.lane.b32.xlu0 %v2922_v19, %s8630_s27 }
 0x1ba   : > { %3095 = vrot.lane.b32.xlu1 %v2628_v13, %s8630_s27  ;;  %3137 = vrot.lane.b32.xlu0 %v1567_v45, %s8631_s29  ;;  %v1665_v45 = vcombine.high %v1648_v61, %v14052_v14  ;;  %v2057_v61 = vcombine.high %v2040_v53, %v14052_v14  ;;  %v2449_v53 = vcombine.high %v2432_v55, %v14052_v14 }
 0x1bb   : > { %v1423_v55 = vcombine.high %v8894_v32, %v14052_v14  ;;  %v2841_v32 = vcombine.high %v2824_v42, %v14052_v14 }
 0x1be   : > { %3099 = vrot.lane.b32.xlu1 %v2824_v42, %s8630_s27  ;;  %3141 = vrot.lane.b32.xlu0 %v1763_v36, %s8631_s29  ;;  %v9266_v36 = vpop.trf.xlu1 }
 0x1bf   : > { %14063 = vst [vmem:[#allocation39_spill] sm:$0xff] %v9266_v36 }
 0x1c2   : > { %3135 = vrot.lane.b32.xlu1 %v1469_v1, %s8631_s29  ;;  %3145 = vrot.lane.b32.xlu0 %v1959_v35, %s8631_s29  ;;  %v9269_v1 = vpop.trf.xlu0  ;;  %v9277_v35 = vpop.trf.xlu1 }
 0x1c3   : > { %14064 = vst [vmem:[#allocation40_spill] sm:$0xff] %v9269_v1  ;;  %14065 = vst [vmem:[#allocation41_spill] sm:$0xff] %v9277_v35 }
 0x1c6   : > { %3139 = vrot.lane.b32.xlu1 %v1665_v45, %s8631_s29  ;;  %3149 = vrot.lane.b32.xlu0 %v2155_v39, %s8631_s29  ;;  %v9279_v44 = vpop.trf.xlu0  ;;  %v2743_v45 = vcombine.high %v2726_v9, %v14052_v14  ;;  %v8383_v39 = vcombine.high %v8876_v22, %v14052_v14  ;;  %v2645_v22 = vcombine.high %v2628_v13, %v14052_v14 }
 0x1c7   : > { %14066 = vst [vmem:[#allocation42_spill] sm:$0xff] %v9279_v44 }
 0x1ca   : > { %3143 = vrot.lane.b32.xlu1 %v1861_v50, %s8631_s29  ;;  %3153 = vrot.lane.b32.xlu0 %v2351_v7, %s8631_s29  ;;  %v9289_v50 = vrot.slane %v8383_v39, %v8776_v15  ;;  %v9293_v7 = vpop.trf.xlu1  ;;  %v9296_v9 = vpop.trf.xlu0  ;;  %v9329_v39 = vrot.slane %v8387_v23, %v8776_v15 }
 0x1cb   : > { %14067 = vst [vmem:[#allocation43_spill] sm:$0xff] %v9293_v7  ;;  %14068 = vst [vmem:[#allocation44_spill] sm:$0xff] %v9296_v9  ;;  %v8397_v9 = vcombine.high %v9041_v58, %v14052_v14 }
 0x1cc   : > { %v9304_v19 = vrot.slane %v9289_v50, %v8780_v21 }
 0x1cd   : > { %v9434_v7 = vrot.slane %v8397_v9, %v8776_v15 }
 0x1ce   : > { %3147 = vrot.lane.b32.xlu1 %v2057_v61, %s8631_s29  ;;  %3157 = vrot.lane.b32.xlu0 %v2547_v60, %s8631_s29  ;;  %v9307_v61 = vrot.slane %v8385_v43, %v8776_v15  ;;  %v9314_v13 = vpop.trf.xlu1  ;;  %v9318_v60 = vrot.slane %v1423_v55, %v8776_v15  ;;  %v9347_v43 = vrot.slane %v9329_v39, %v8780_v21 }
 0x1cf   : > { %14069 = vst [vmem:[#allocation45_spill] sm:$0xff] %v9314_v13  ;;  %v2930_v9 = vrot.slane %v9434_v7, %v8780_v21 }
 0x1d0   : > { %v9326_v24 = vrot.slane %v9307_v61, %v8780_v21 }
 0x1d2   : > { %3151 = vrot.lane.b32.xlu1 %v2253_v34, %s8631_s29  ;;  %3161 = vrot.lane.b32.xlu0 %v2743_v45, %s8631_s29  ;;  %v1619_v34 = vcombine.high %v8907_v37, %v14052_v14  ;;  %v9322_v45 = vpop.trf.xlu0  ;;  %v9338_v37 = vrot.slane %v9318_v60, %v8780_v21  ;;  %v9354_v55 = vpop.trf.xlu1 }
 0x1d3   : > { %14070 = vst [vmem:[#allocation46_spill] sm:$0xff] %v9322_v45  ;;  %14071 = vst [vmem:[#allocation47_spill] sm:$0xff] %v9354_v55  ;;  %v8393_v45 = vcombine.high %v8968_v11, %v14052_v14 }
 0x1d4   : > { %v9341_v42 = vrot.slane %v1619_v34, %v8776_v15 }
 0x1d5   : > { %v9398_v44 = vrot.slane %v8393_v45, %v8776_v15 }
 0x1d6   : > { %3155 = vrot.lane.b32.xlu1 %v2449_v53, %s8631_s29  ;;  %3165 = vrot.lane.b32.xlu0 %v2939_v10, %s8631_s29  ;;  %v8389_v53 = vcombine.high %v8947_v46, %v14052_v14  ;;  %v1815_v10 = vcombine.high %v8985_v31, %v14052_v14  ;;  %v9358_v23 = vpop.trf.xlu0  ;;  %v9364_v31 = vrot.slane %v9341_v42, %v8780_v21 }
 0x1d7   : > { %14072 = vst [vmem:[#allocation48_spill] sm:$0xff] %v9358_v23  ;;  %v2538_v45 = vrot.slane %v9398_v44, %v8780_v21  ;;  %v2599_v23 = vcombine.high %v9101_v29, %v14052_v14  ;;  %v2795_v29 = vcombine.high %v9126_v16, %v14052_v14  ;;  %v1568_v16 = vcombine.high %v9304_v19, %v14052_v14 }
 0x1d8   : > { %v9350_v46 = vrot.slane %v8389_v53, %v8776_v15 }
 0x1d9   : > { %v9445_v48 = vrot.slane %v2599_v23, %v8776_v15 }
 0x1da   : > { %3159 = vrot.lane.b32.xlu1 %v2645_v22, %s8631_s29  ;;  %3201 = vrot.lane.b32.xlu0 %v9304_v19, %s8632_s30  ;;  %v8391_v22 = vcombine.high %v8952_v8, %v14052_v14  ;;  %v2011_v8 = vcombine.high %v8995_v25, %v14052_v14  ;;  %v9373_v34 = vrot.slane %v9350_v46, %v8780_v21  ;;  %v9393_v4 = vpop.trf.xlu0 }
 0x1db   : > { %14074 = vst [vmem:[#allocation50_spill] sm:$0xff] %v9393_v4  ;;  %v2403_v4 = vcombine.high %v9070_v54, %v14052_v14  ;;  %v2636_v36 = vrot.slane %v9445_v48, %v8780_v21 }
 0x1dc   : > { %v9376_v53 = vrot.slane %v8391_v22, %v8776_v15  ;;  %v9389_v13 = vrot.slane %v2011_v8, %v8776_v15  ;;  %v2207_v22 = vcombine.high %v9063_v33, %v14052_v14 }
 0x1dd   : > { %v9427_v54 = vrot.slane %v2403_v4, %v8776_v15 }
 0x1de   : > { %3163 = vrot.lane.b32.xlu1 %v2841_v32, %s8631_s29  ;;  %3205 = vrot.lane.b32.xlu0 %v9326_v24, %s8632_s30  ;;  %v9367_v32 = vrot.slane %v1815_v10, %v8776_v15  ;;  %v9384_v10 = vpop.trf.xlu1  ;;  %v2342_v11 = vrot.slane %v9376_v53, %v8780_v21  ;;  %v2048_v8 = vrot.slane %v9389_v13, %v8780_v21 }
 0x1df   : > { %14073 = vst [vmem:[#allocation49_spill] sm:$0xff] %v9384_v10  ;;  %v8395_v10 = vcombine.high %v9014_v59, %v14052_v14  ;;  %v9409_v33 = vrot.slane %v2207_v22, %v8776_v15  ;;  %v2440_v4 = vrot.slane %v9427_v54, %v8780_v21 }
 0x1e0   : > { %v1852_v25 = vrot.slane %v9367_v32, %v8780_v21 }
 0x1e1   : > { %v9418_v59 = vrot.slane %v8395_v10, %v8776_v15  ;;  %v2244_v22 = vrot.slane %v9409_v33, %v8780_v21 }
 0x1e2   : > { %3199 = vrot.lane.b32.xlu1 %v9338_v37, %s8632_s30  ;;  %3209 = vrot.lane.b32.xlu0 %v9347_v43, %s8632_s30 }
 0x1e3   : > { %v2734_v10 = vrot.slane %v9418_v59, %v8780_v21 }
 0x1e6   : > { %3203 = vrot.lane.b32.xlu1 %v9364_v31, %s8632_s30  ;;  %3213 = vrot.lane.b32.xlu0 %v9373_v34, %s8632_s30 }
 0x1ea   : > { %3207 = vrot.lane.b32.xlu1 %v1852_v25, %s8632_s30  ;;  %3217 = vrot.lane.b32.xlu0 %v2342_v11, %s8632_s30 }
 0x1ee   : > { %3211 = vrot.lane.b32.xlu1 %v2048_v8, %s8632_s30  ;;  %3221 = vrot.lane.b32.xlu0 %v2538_v45, %s8632_s30 }
 0x1f0   : > { %v9406_v2 = vpop.permute.xlu1 %3009  ;;  %v9415_v35 = vpop.permute.xlu0 %3007 }
 0x1f1   : > { %14075 = vst [vmem:[#allocation51_spill] sm:$0xff] %v9415_v35 }
 0x1f2   : > { %3215 = vrot.lane.b32.xlu1 %v2244_v22, %s8632_s30  ;;  %3225 = vrot.lane.b32.xlu0 %v2734_v10, %s8632_s30 }
 0x1f4   : > { %v9437_v58 = vpop.permute.xlu1 %3011  ;;  %v9440_v55 = vpop.permute.xlu0 %3017 }
 0x1f5   : > { %14076 = vst [vmem:[#allocation52_spill] sm:$0xff] %v9437_v58  ;;  %14077 = vst [vmem:[#allocation53_spill] sm:$0xff] %v9440_v55  ;;  %v9458_v55 = vrot.slane %v2795_v29, %v8776_v15  ;;  %v1764_v29 = vcombine.high %v9326_v24, %v14052_v14  ;;  %v1666_v24 = vcombine.high %v9364_v31, %v14052_v14 }
 0x1f6   : > { %3219 = vrot.lane.b32.xlu1 %v2440_v4, %s8632_s30  ;;  %3229 = vrot.lane.b32.xlu0 %v2930_v9, %s8632_s30 }
 0x1f8   : > { %v9453_v1 = vpop.permute.xlu1 %3013  ;;  %v9460_v23 = vpop.permute.xlu0 %3021 }
 0x1f9   : > { %14078 = vst [vmem:[#allocation54_spill] sm:$0xff] %v9453_v1  ;;  %14079 = vst [vmem:[#allocation55_spill] sm:$0xff] %v9460_v23  ;;  %v2832_v1 = vrot.slane %v9458_v55, %v8780_v21  ;;  %v1470_v23 = vcombine.high %v9338_v37, %v14052_v14 }
 0x1fa   : > { %3223 = vrot.lane.b32.xlu1 %v2636_v36, %s8632_s30  ;;  %3265 = vrot.lane.b32.xlu0 %v1568_v16, %s8633_s2 }
 0x1fc   : > { %v9466_v58 = vpop.permute.xlu1 %3015  ;;  %v9470_v35 = vpop.permute.xlu0 %3025 }
 0x1fd   : > { %14080 = vst [vmem:[#allocation56_spill] sm:$0xff] %v9466_v58  ;;  %14081 = vst [vmem:[#allocation57_spill] sm:$0xff] %v9470_v35  ;;  %v1960_v58 = vcombine.high %v9347_v43, %v14052_v14  ;;  %v1862_v43 = vcombine.high %v1852_v25, %v14052_v14 }
 0x1fe   : > { %3227 = vrot.lane.b32.xlu1 %v2832_v1, %s8632_s30  ;;  %3269 = vrot.lane.b32.xlu0 %v1764_v29, %s8633_s2 }
 0x200   : > { %v9476_v19 = vpop.permute.xlu1 %3019  ;;  %v9480_v16 = vpop.permute.xlu0 %3029 }
 0x201   : > { %14082 = vst [vmem:[#allocation58_spill] sm:$0xff] %v9476_v19  ;;  %14083 = vst [vmem:[#allocation59_spill] sm:$0xff] %v9480_v16  ;;  %v2156_v19 = vcombine.high %v9373_v34, %v14052_v14  ;;  %v2058_v34 = vcombine.high %v2048_v8, %v14052_v14 }
 0x202   : > { %3263 = vrot.lane.b32.xlu1 %v1470_v23, %s8633_s2  ;;  %3273 = vrot.lane.b32.xlu0 %v1960_v58, %s8633_s2  ;;  %v2352_v58 = vcombine.high %v2342_v11, %v14052_v14  ;;  %v2254_v11 = vcombine.high %v2244_v22, %v14052_v14 }
 0x204   : > { %v9486_v35 = vpop.permute.xlu1 %3023  ;;  %v9490_v29 = vpop.permute.xlu0 %3033 }
 0x205   : > { %14084 = vst [vmem:[#allocation60_spill] sm:$0xff] %v9486_v35  ;;  %14085 = vst [vmem:[#allocation61_spill] sm:$0xff] %v9490_v29 }
 0x206   : > { %3267 = vrot.lane.b32.xlu1 %v1666_v24, %s8633_s2  ;;  %3277 = vrot.lane.b32.xlu0 %v2156_v19, %s8633_s2  ;;  %v2548_v19 = vcombine.high %v2538_v45, %v14052_v14  ;;  %v2450_v45 = vcombine.high %v2440_v4, %v14052_v14  ;;  %v1747_v4 = vcombine.high %v9307_v61, %v14052_v14 }
 0x207   : > { %v1943_v61 = vcombine.high %v9329_v39, %v14052_v14 }
 0x208   : > { %v9496_v37 = vpop.permute.xlu1 %3027  ;;  %v9499_v23 = vpop.permute.xlu0 %3037 }
 0x209   : > { %14086 = vst [vmem:[#allocation62_spill] sm:$0xff] %v9496_v37  ;;  %14087 = vst [vmem:[#allocation63_spill] sm:$0xff] %v9499_v23 }
 0x20a   : > { %3271 = vrot.lane.b32.xlu1 %v1862_v43, %s8633_s2  ;;  %3281 = vrot.lane.b32.xlu0 %v2352_v58, %s8633_s2  ;;  %v2744_v43 = vcombine.high %v2734_v10, %v14052_v14  ;;  %v2646_v10 = vcombine.high %v2636_v36, %v14052_v14  ;;  %v1453_v36 = vcombine.high %v9318_v60, %v14052_v14 }
 0x20b   : > { %v9563_v60 = vrot.slane %v1943_v61, %v8780_v21 }
 0x20c   : > { %v9504_v31 = vpop.permute.xlu1 %3031  ;;  %v9507_v29 = vpop.permute.xlu0 %3073 }
 0x20d   : > { %14088 = vst [vmem:[#allocation64_spill] sm:$0xff] %v9504_v31  ;;  %14089 = vst [vmem:[#allocation65_spill] sm:$0xff] %v9507_v29 }
 0x20e   : > { %3275 = vrot.lane.b32.xlu1 %v2058_v34, %s8633_s2  ;;  %3285 = vrot.lane.b32.xlu0 %v2548_v19, %s8633_s2  ;;  %v2940_v34 = vcombine.high %v2930_v9, %v14052_v14  ;;  %v1551_v19 = vcombine.high %v9289_v50, %v14052_v14  ;;  %v2842_v9 = vcombine.high %v2832_v1, %v14052_v14 }
 0x20f   : > { %v1649_v1 = vcombine.high %v9341_v42, %v14052_v14  ;;  %v1845_v42 = vcombine.high %v9367_v32, %v14052_v14  ;;  %v2041_v32 = vcombine.high %v9389_v13, %v14052_v14  ;;  %v2237_v13 = vcombine.high %v9409_v33, %v14052_v14 }
 0x210   : > { %v9512_v25 = vpop.permute.xlu1 %3035  ;;  %v9515_v24 = vpop.permute.xlu0 %3077  ;;  %v2433_v33 = vcombine.high %v9427_v54, %v14052_v14  ;;  %v2629_v54 = vcombine.high %v9445_v48, %v14052_v14 }
 0x211   : > { %14090 = vst [vmem:[#allocation66_spill] sm:$0xff] %v9512_v25  ;;  %14091 = vst [vmem:[#allocation67_spill] sm:$0xff] %v9515_v24 }
 0x212   : > { %3279 = vrot.lane.b32.xlu1 %v2254_v11, %s8633_s2  ;;  %3289 = vrot.lane.b32.xlu0 %v2744_v43, %s8633_s2  ;;  %v9536_v43 = vrot.slane %v1551_v19, %v8780_v21 }
 0x214   : > { %v9520_v8 = vpop.permute.xlu1 %3071  ;;  %v9523_v58 = vpop.permute.xlu0 %3081 }
 0x215   : > { %14092 = vst [vmem:[#allocation68_spill] sm:$0xff] %v9520_v8  ;;  %14093 = vst [vmem:[#allocation69_spill] sm:$0xff] %v9523_v58 }
 0x216   : > { %3283 = vrot.lane.b32.xlu1 %v2450_v45, %s8633_s2  ;;  %3293 = vrot.lane.b32.xlu0 %v2940_v34, %s8633_s2  ;;  %v1761_v34 = vrot.slane %v1747_v4, %v8780_v21  ;;  %v2139_v4 = vcombine.high %v9350_v46, %v14052_v14  ;;  %v2335_v46 = vcombine.high %v9376_v53, %v14052_v14 }
 0x217   : > { %v2531_v53 = vcombine.high %v9398_v44, %v14052_v14  ;;  %v2727_v44 = vcombine.high %v9418_v59, %v14052_v14  ;;  %v2923_v59 = vcombine.high %v9434_v7, %v14052_v14 }
 0x218   : > { %v9530_v22 = vpop.permute.xlu1 %3075  ;;  %v9533_v11 = vpop.permute.xlu0 %3085  ;;  %v9580_v61 = vrot.slane %v2139_v4, %v8780_v21  ;;  %v9598_v4 = vrot.slane %v2335_v46, %v8780_v21 }
 0x219   : > { %14094 = vst [vmem:[#allocation70_spill] sm:$0xff] %v9530_v22  ;;  %14095 = vst [vmem:[#allocation71_spill] sm:$0xff] %v9533_v11  ;;  %v9616_v46 = vrot.slane %v2531_v53, %v8780_v21  ;;  %v9634_v53 = vrot.slane %v2727_v44, %v8780_v21  ;;  %v9652_v44 = vrot.slane %v2923_v59, %v8780_v21 }
 0x21a   : > { %3287 = vrot.lane.b32.xlu1 %v2646_v10, %s8633_s2  ;;  %3329 = vrot.lane.b32.xlu0 %v9536_v43, %s8634_s5  ;;  %v1467_v10 = vrot.slane %v1453_v36, %v8780_v21  ;;  %v1569_v59 = vcombine.high %v9536_v43, %v14052_v14  ;;  %v1031_v43 = vcombine.low %v8934_v0, %v9016_v63 }
 0x21c   : > { %v9543_v50 = vpop.permute.xlu1 %3079  ;;  %v9548_v45 = vpop.permute.xlu0 %3089 }
 0x21d   : > { %14096 = vst [vmem:[#allocation72_spill] sm:$0xff] %v9543_v50  ;;  %14097 = vst [vmem:[#allocation73_spill] sm:$0xff] %v9548_v45 }
 0x21e   : > { %3291 = vrot.lane.b32.xlu1 %v2842_v9, %s8633_s2  ;;  %3333 = vrot.lane.b32.xlu0 %v1761_v34, %s8634_s5  ;;  %v9573_v9 = vrot.slane %v1649_v1, %v8780_v21  ;;  %v9591_v1 = vrot.slane %v1845_v42, %v8780_v21  ;;  %v9609_v42 = vrot.slane %v2041_v32, %v8780_v21 }
 0x21f   : > { %v9627_v32 = vrot.slane %v2237_v13, %v8780_v21  ;;  %v9645_v13 = vrot.slane %v2433_v33, %v8780_v21  ;;  %v2825_v33 = vcombine.high %v9458_v55, %v14052_v14  ;;  %v1765_v55 = vcombine.high %v1761_v34, %v14052_v14 }
 0x220   : > { %v9555_v19 = vpop.permute.xlu1 %3083  ;;  %v9560_v50 = vpop.permute.xlu0 %3093  ;;  %v1047_v34 = vcombine.low %v9111_v27, %v9165_v52 }
 0x221   : > { %14098 = vst [vmem:[#allocation74_spill] sm:$0xff] %v9555_v19  ;;  %14099 = vst [vmem:[#allocation75_spill] sm:$0xff] %v9560_v50  ;;  %v1667_v50 = vcombine.high %v9573_v9, %v14052_v14 }
 0x222   : > { %3327 = vrot.lane.b32.xlu1 %v1467_v10, %s8634_s5  ;;  %3337 = vrot.lane.b32.xlu0 %v9563_v60, %s8634_s5 }
 0x224   : > { %v9570_v39 = vpop.permute.xlu1 %3087  ;;  %v9577_v36 = vpop.permute.xlu0 %3097 }
 0x225   : > { %14100 = vst [vmem:[#allocation76_spill] sm:$0xff] %v9570_v39  ;;  %14101 = vst [vmem:[#allocation77_spill] sm:$0xff] %v9577_v36 }
 0x226   : > { %3331 = vrot.lane.b32.xlu1 %v9573_v9, %s8634_s5  ;;  %3341 = vrot.lane.b32.xlu0 %v9580_v61, %s8634_s5  ;;  %v1064_v9 = vcombine.high %v9103_v20, %v9159_v57 }
 0x228   : > { %v9588_v39 = vpop.permute.xlu1 %3091  ;;  %v9595_v36 = vpop.permute.xlu0 %3101 }
 0x229   : > { %14102 = vst [vmem:[#allocation78_spill] sm:$0xff] %v9588_v39  ;;  %14103 = vst [vmem:[#allocation79_spill] sm:$0xff] %v9595_v36 }
 0x22a   : > { %3335 = vrot.lane.b32.xlu1 %v9591_v1, %s8634_s5  ;;  %3345 = vrot.lane.b32.xlu0 %v9598_v4, %s8634_s5 }
 0x22c   : > { %v9606_v39 = vpop.permute.xlu1 %3095  ;;  %v9613_v36 = vpop.permute.xlu0 %3137 }
 0x22d   : > { %14104 = vst [vmem:[#allocation80_spill] sm:$0xff] %v9606_v39  ;;  %14105 = vst [vmem:[#allocation81_spill] sm:$0xff] %v9613_v36 }
 0x22e   : > { %3339 = vrot.lane.b32.xlu1 %v9609_v42, %s8634_s5  ;;  %3349 = vrot.lane.b32.xlu0 %v9616_v46, %s8634_s5 }
 0x230   : > { %v9624_v39 = vpop.permute.xlu1 %3099  ;;  %v9631_v36 = vpop.permute.xlu0 %3141 }
 0x231   : > { %14106 = vst [vmem:[#allocation82_spill] sm:$0xff] %v9624_v39  ;;  %14107 = vst [vmem:[#allocation83_spill] sm:$0xff] %v9631_v36 }
 0x232   : > { %3343 = vrot.lane.b32.xlu1 %v9627_v32, %s8634_s5  ;;  %3353 = vrot.lane.b32.xlu0 %v9634_v53, %s8634_s5 }
 0x234   : > { %v9642_v39 = vpop.permute.xlu1 %3135  ;;  %v9649_v36 = vpop.permute.xlu0 %3145 }
 0x235   : > { %14108 = vst [vmem:[#allocation84_spill] sm:$0xff] %v9642_v39  ;;  %14109 = vst [vmem:[#allocation85_spill] sm:$0xff] %v9649_v36  ;;  %v9661_v39 = vrot.slane %v2629_v54, %v8780_v21 }
 0x236   : > { %3347 = vrot.lane.b32.xlu1 %v9645_v13, %s8634_s5  ;;  %3357 = vrot.lane.b32.xlu0 %v9652_v44, %s8634_s5 }
 0x238   : > { %v9658_v7 = vpop.permute.xlu1 %3139  ;;  %v9665_v48 = vpop.permute.xlu0 %3149 }
 0x239   : > { %14110 = vst [vmem:[#allocation86_spill] sm:$0xff] %v9658_v7  ;;  %14111 = vst [vmem:[#allocation87_spill] sm:$0xff] %v9665_v48  ;;  %v9675_v7 = vrot.slane %v2825_v33, %v8780_v21  ;;  %v1015_v33 = vcombine.low %v8942_v5, %v9029_v6 }
 0x23a   : > { %3351 = vrot.lane.b32.xlu1 %v9661_v39, %s8634_s5  ;;  %3393 = vrot.lane.b32.xlu0 %v1569_v59, %s8635_s12  ;;  %v1471_v59 = vcombine.high %v1467_v10, %v14052_v14  ;;  %v1039_v10 = vrot.slane %v1031_v43, %v8776_v15  ;;  %v1032_v43 = vcombine.high %v8934_v0, %v9016_v63 }
 0x23b   : > { %v1023_v19 = vrot.slane %v1015_v33, %v8776_v15  ;;  %v2353_v0 = vcombine.high %v9598_v4, %v14052_v14 }
 0x23c   : > { %v9672_v36 = vpop.permute.xlu1 %3143  ;;  %v9677_v54 = vpop.permute.xlu0 %3153 }
 0x23d   : > { %14112 = vst [vmem:[#allocation88_spill] sm:$0xff] %v9672_v36  ;;  %14113 = vst [vmem:[#allocation89_spill] sm:$0xff] %v9677_v54  ;;  %v1063_v54 = vcombine.low %v9103_v20, %v9159_v57  ;;  %v2059_v57 = vcombine.high %v9609_v42, %v14052_v14  ;;  %v1287_v42 = vcombine.low %v8980_v28, %v9072_v62 }
 0x23e   : > { %3355 = vrot.lane.b32.xlu1 %v9675_v7, %s8634_s5  ;;  %3397 = vrot.lane.b32.xlu0 %v1765_v55, %s8635_s12  ;;  %v1961_v55 = vcombine.high %v9563_v60, %v14052_v14  ;;  %v2157_v60 = vcombine.high %v9580_v61, %v14052_v14  ;;  %v1863_v61 = vcombine.high %v9591_v1, %v14052_v14 }
 0x23f   : > { %v1071_v45 = vrot.slane %v1063_v54, %v8776_v15  ;;  %v1048_v54 = vcombine.high %v9111_v27, %v9165_v52  ;;  %v1080_v52 = vcombine.high %v1023_v19, %v1039_v10 }
 0x240   : > { %v9685_v48 = vpop.permute.xlu1 %3147  ;;  %v9694_v36 = vpop.permute.xlu0 %3157 }
 0x241   : > { %14114 = vst [vmem:[#allocation90_spill] sm:$0xff] %v9685_v48  ;;  %14115 = vst [vmem:[#allocation91_spill] sm:$0xff] %v9694_v36  ;;  %v1055_v36 = vrot.slane %v1047_v34, %v8776_v15  ;;  %v1062_v20 = vrot.slane %v1048_v54, %v8776_v15 }
 0x242   : > { %3391 = vrot.lane.b32.xlu1 %v1471_v59, %s8635_s12  ;;  %3401 = vrot.lane.b32.xlu0 %v1961_v55, %s8635_s12  ;;  %v1016_v59 = vcombine.high %v8942_v5, %v9029_v6  ;;  %v1046_v5 = vrot.slane %v1032_v43, %v8776_v15  ;;  %v1078_v6 = vrot.slane %v1064_v9, %v8776_v15 }
 0x243   : > { %v1111_v34 = vcombine.low %v1055_v36, %v1071_v45  ;;  %v1112_v4 = vcombine.high %v1055_v36, %v1071_v45  ;;  %v1094_v45 = vrot.slane %v1080_v52, %v8780_v21  ;;  %v1335_v9 = vcombine.low %v9142_v56, %v9178_v47 }
 0x244   : > { %v9701_v48 = vpop.permute.xlu1 %3151  ;;  %v9708_v11 = vpop.permute.xlu0 %3161  ;;  %v1030_v63 = vrot.slane %v1016_v59, %v8776_v15  ;;  %v1303_v59 = vcombine.low %v8976_v17, %v9065_v41  ;;  %v1127_v36 = vcombine.low %v1062_v20, %v1078_v6 }
 0x245   : > { %14116 = vst [vmem:[#allocation92_spill] sm:$0xff] %v9701_v48  ;;  %14117 = vst [vmem:[#allocation93_spill] sm:$0xff] %v9708_v11 }
 0x246   : > { %3395 = vrot.lane.b32.xlu1 %v1667_v50, %s8635_s12  ;;  %3405 = vrot.lane.b32.xlu0 %v2157_v60, %s8635_s12  ;;  %v1079_v50 = vcombine.low %v1023_v19, %v1039_v10  ;;  %v9742_v60 = vrot.slane %v1111_v34, %v8780_v21  ;;  %v2549_v19 = vcombine.high %v9616_v46, %v14052_v14 }
 0x247   : > { %v1095_v10 = vcombine.low %v1030_v63, %v1046_v5  ;;  %v2255_v46 = vcombine.high %v9627_v32, %v14052_v14  ;;  %v1311_v32 = vrot.slane %v1303_v59, %v8776_v15 }
 0x248   : > { %v9722_v33 = vpop.permute.xlu1 %3155  ;;  %v9726_v55 = vpop.permute.xlu0 %3165  ;;  %v1087_v1 = vrot.slane %v1079_v50, %v8780_v21  ;;  %v1319_v50 = vcombine.low %v9145_v12, %v9181_v51 }
 0x249   : > { %14118 = vst [vmem:[#allocation94_spill] sm:$0xff] %v9722_v33  ;;  %14119 = vst [vmem:[#allocation95_spill] sm:$0xff] %v9726_v55 }
 0x24a   : > { %3399 = vrot.lane.b32.xlu1 %v1863_v61, %s8635_s12  ;;  %3409 = vrot.lane.b32.xlu0 %v2353_v0, %s8635_s12  ;;  %v9762_v61 = vrot.slane %v1112_v4, %v8780_v21  ;;  %v2745_v0 = vcombine.high %v9634_v53, %v14052_v14  ;;  %v1144_v52 = vcombine.high %v1087_v1, %v9742_v60 }
 0x24b   : > { %v1295_v4 = vrot.slane %v1287_v42, %v8776_v15  ;;  %v1288_v42 = vcombine.high %v8980_v28, %v9072_v62  ;;  %v2647_v28 = vcombine.high %v9661_v39, %v14052_v14 }
 0x24c   : > { %v9736_v27 = vpop.permute.xlu1 %3159  ;;  %v9744_v43 = vpop.permute.xlu0 %3201  ;;  %v9790_v59 = vrot.slane %v1144_v52, %v8776_v15 }
 0x24d   : > { %14120 = vst [vmem:[#allocation96_spill] sm:$0xff] %v9736_v27  ;;  %14121 = vst [vmem:[#allocation97_spill] sm:$0xff] %v9744_v43  ;;  %v9777_v43 = vrot.slane %v1127_v36, %v8780_v21  ;;  %v1336_v36 = vcombine.high %v9142_v56, %v9178_v47  ;;  %v1352_v39 = vcombine.high %v1295_v4, %v1311_v32 }
 0x24e   : > { %3403 = vrot.lane.b32.xlu1 %v2059_v57, %s8635_s12  ;;  %3413 = vrot.lane.b32.xlu0 %v2549_v19, %s8635_s12  ;;  %v1096_v57 = vcombine.high %v1030_v63, %v1046_v5  ;;  %v1103_v19 = vrot.slane %v1095_v10, %v8780_v21  ;;  %v1327_v5 = vrot.slane %v1319_v50, %v8776_v15 }
 0x24f   : > { %v2941_v10 = vcombine.high %v9652_v44, %v14052_v14  ;;  %v1320_v44 = vcombine.high %v9145_v12, %v9181_v51  ;;  %v9818_v56 = vrot.slane %v9790_v59, %v8780_v21  ;;  %v1350_v52 = vrot.slane %v1336_v36, %v8776_v15 }
 0x250   : > { %v9757_v54 = vpop.permute.xlu1 %3163  ;;  %v9766_v34 = vpop.permute.xlu0 %3205  ;;  %v1148_v51 = vcombine.high %v1103_v19, %v9777_v43 }
 0x251   : > { %14122 = vst [vmem:[#allocation98_spill] sm:$0xff] %v9757_v54  ;;  %14123 = vst [vmem:[#allocation99_spill] sm:$0xff] %v9766_v34  ;;  %v1128_v54 = vcombine.high %v1062_v20, %v1078_v6  ;;  %v1343_v34 = vrot.slane %v1335_v9, %v8776_v15  ;;  %v1146_v6 = vcombine.high %v1094_v45, %v9762_v61 }
 0x252   : > { %3407 = vrot.lane.b32.xlu1 %v2255_v46, %s8635_s12  ;;  %3417 = vrot.lane.b32.xlu0 %v2745_v0, %s8635_s12  ;;  %v2451_v46 = vcombine.high %v9645_v13, %v14052_v14  ;;  %v1304_v20 = vcombine.high %v8976_v17, %v9065_v41  ;;  %v1351_v13 = vcombine.low %v1295_v4, %v1311_v32 }
 0x253   : > { %v1110_v9 = vrot.slane %v1096_v57, %v8780_v21  ;;  %v9805_v50 = vrot.slane %v1128_v54, %v8780_v21  ;;  %v9812_v41 = vcombine.low %v1087_v1, %v9742_v60  ;;  %v1383_v62 = vcombine.low %v1327_v5, %v1343_v34 }
 0x254   : > { %v9780_v53 = vpop.permute.xlu1 %3199  ;;  %v9785_v63 = vpop.permute.xlu0 %3209  ;;  %v9821_v12 = vrot.slane %v1146_v6, %v8776_v15  ;;  %v1318_v54 = vrot.slane %v1304_v20, %v8776_v15  ;;  %v1302_v0 = vrot.slane %v1288_v42, %v8776_v15  ;;  %v1359_v1 = vrot.slane %v1351_v13, %v8780_v21 }
 0x255   : > { %14124 = vst [vmem:[#allocation100_spill] sm:$0xff] %v9780_v53  ;;  %14125 = vst [vmem:[#allocation101_spill] sm:$0xff] %v9785_v63  ;;  %v1334_v57 = vrot.slane %v1320_v44, %v8776_v15  ;;  %v2843_v6 = vcombine.high %v9675_v7, %v14052_v14  ;;  %v9838_v20 = vrot.slane %v9812_v41, %v8776_v15 }
 0x256   : > { %3411 = vrot.lane.b32.xlu1 %v2451_v46, %s8635_s12  ;;  %3421 = vrot.lane.b32.xlu0 %v2941_v10, %s8635_s12  ;;  %v1384_v46 = vcombine.high %v1327_v5, %v1343_v34  ;;  %v9841_v32 = vcombine.low %v1094_v45, %v9762_v61  ;;  %v9844_v4 = vrot.slane %v1383_v62, %v8780_v21 }
 0x257   : > { %v9850_v34 = vrot.slane %v9821_v12, %v8780_v21  ;;  %v9853_v5 = vrot.slane %v1148_v51, %v8776_v15  ;;  %v1150_v7 = vcombine.high %v1110_v9, %v9805_v50  ;;  %v1366_v13 = vrot.slane %v1352_v39, %v8780_v21 }
 0x258   : > { %v9807_v17 = vpop.permute.xlu1 %3203  ;;  %v9814_v47 = vpop.permute.xlu0 %3213  ;;  %v1367_v45 = vcombine.low %v1302_v0, %v1318_v54  ;;  %v1399_v36 = vcombine.low %v1334_v57, %v1350_v52  ;;  %v9868_v62 = vrot.slane %v9841_v32, %v8776_v15  ;;  %v9871_v51 = vcombine.low %v1103_v19, %v9777_v43 }
 0x259   : > { %14126 = vst [vmem:[#allocation102_spill] sm:$0xff] %v9807_v17  ;;  %14127 = vst [vmem:[#allocation103_spill] sm:$0xff] %v9814_v47  ;;  %v9874_v39 = vrot.slane %v1384_v46, %v8780_v21  ;;  %v1368_v47 = vcombine.high %v1302_v0, %v1318_v54  ;;  %v1400_v46 = vcombine.high %v1334_v57, %v1350_v52 }
 0x25a   : > { %3415 = vrot.lane.b32.xlu1 %v2647_v28, %s8635_s12  ;;  %3457 = vrot.lane.b32.xlu0 %v9818_v56, %s8636_s13  ;;  %v9864_v28 = vrot.slane %v9838_v20, %v8780_v21  ;;  %v1375_v19 = vrot.slane %v1367_v45, %v8780_v21  ;;  %v9895_v17 = vrot.slane %v9868_v62, %v8780_v21 }
 0x25b   : > { %v9902_v63 = vcombine.low %v1110_v9, %v9805_v50  ;;  %v9905_v54 = vrot.slane %v1399_v36, %v8780_v21  ;;  %v1418_v45 = vcombine.high %v1366_v13, %v9874_v39  ;;  %v1382_v9 = vrot.slane %v1368_v47, %v8780_v21 }
 0x25c   : > { %v9832_v10 = vpop.permute.xlu1 %3207  ;;  %v9846_v42 = vpop.permute.xlu0 %3217  ;;  %v9936_v53 = vrot.slane %v1400_v46, %v8780_v21  ;;  %v9958_v33 = vcombine.low %v1366_v13, %v9874_v39  ;;  %v1811_v16 = vcombine.high %v9850_v34, %v14052_v14 }
 0x25d   : > { %14128 = vst [vmem:[#allocation104_spill] sm:$0xff] %v9832_v10  ;;  %14129 = vst [vmem:[#allocation105_spill] sm:$0xff] %v9846_v42  ;;  %v9880_v42 = vrot.slane %v9853_v5, %v8780_v21  ;;  %v1416_v10 = vcombine.high %v1359_v1, %v9844_v4  ;;  %v1420_v55 = vcombine.high %v1375_v19, %v9905_v54 }
 0x25e   : > { %3419 = vrot.lane.b32.xlu1 %v2843_v6, %s8635_s12  ;;  %3461 = vrot.lane.b32.xlu0 %v9850_v34, %s8636_s13  ;;  %v9979_v58 = vcombine.low %v1375_v19, %v9905_v54  ;;  %v1713_v34 = vcombine.high %v9895_v17, %v14052_v14 }
 0x25f   : > { %v9914_v57 = vrot.slane %v1416_v10, %v8776_v15  ;;  %v9930_v10 = vrot.slane %v9902_v63, %v8776_v15  ;;  %v9965_v48 = vrot.slane %v1420_v55, %v8776_v15 }
 0x260   : > { %v9860_v44 = vpop.permute.xlu1 %3211  ;;  %v9876_v6 = vpop.permute.xlu0 %3221  ;;  %v9996_v19 = vrot.slane %v9979_v58, %v8776_v15 }
 0x261   : > { %14130 = vst [vmem:[#allocation106_spill] sm:$0xff] %v9860_v44  ;;  %14131 = vst [vmem:[#allocation107_spill] sm:$0xff] %v9876_v6  ;;  %v9883_v44 = vrot.slane %v1150_v7, %v8776_v15  ;;  %v9899_v7 = vrot.slane %v9871_v51, %v8776_v15  ;;  %v2376_v47 = vrot.slane %v9914_v57, %v8780_v21 }
 0x262   : > { %3455 = vrot.lane.b32.xlu1 %v9864_v28, %s8636_s13  ;;  %3465 = vrot.lane.b32.xlu0 %v9880_v42, %s8636_s13  ;;  %v2082_v46 = vrot.slane %v9930_v10, %v8780_v21  ;;  %v2768_v8 = vrot.slane %v9965_v48, %v8780_v21  ;;  %v2670_v31 = vrot.slane %v9996_v19, %v8780_v21 }
 0x263   : > { %v9911_v52 = vrot.slane %v9883_v44, %v8780_v21 }
 0x264   : > { %v9891_v6 = vpop.permute.xlu1 %3215  ;;  %v9907_v0 = vpop.permute.xlu0 %3225 }
 0x265   : > { %14132 = vst [vmem:[#allocation108_spill] sm:$0xff] %v9891_v6  ;;  %14133 = vst [vmem:[#allocation109_spill] sm:$0xff] %v9907_v0  ;;  %v9926_v0 = vrot.slane %v9899_v7, %v8780_v21  ;;  %v9933_v6 = vcombine.low %v1359_v1, %v9844_v4 }
 0x266   : > { %3459 = vrot.lane.b32.xlu1 %v9895_v17, %s8636_s13  ;;  %3469 = vrot.lane.b32.xlu0 %v9911_v52, %s8636_s13 }
 0x268   : > { %v9922_v36 = vpop.permute.xlu1 %3219  ;;  %v9938_v27 = vpop.permute.xlu0 %3229 }
 0x269   : > { %14134 = vst [vmem:[#allocation110_spill] sm:$0xff] %v9922_v36  ;;  %14135 = vst [vmem:[#allocation111_spill] sm:$0xff] %v9938_v27  ;;  %v9943_v36 = vrot.slane %v1418_v45, %v8776_v15  ;;  %v9955_v27 = vrot.slane %v9933_v6, %v8776_v15 }
 0x26a   : > { %3463 = vrot.lane.b32.xlu1 %v9926_v0, %s8636_s13  ;;  %3473 = vrot.lane.b32.xlu0 %v2376_v47, %s8636_s13 }
 0x26b   : > { %v2572_v11 = vrot.slane %v9943_v36, %v8780_v21  ;;  %v2278_v13 = vrot.slane %v9955_v27, %v8780_v21 }
 0x26c   : > { %v9949_v1 = vpop.permute.xlu1 %3223  ;;  %v9960_v45 = vpop.permute.xlu0 %3265 }
 0x26d   : > { %14136 = vst [vmem:[#allocation112_spill] sm:$0xff] %v9949_v1  ;;  %14137 = vst [vmem:[#allocation113_spill] sm:$0xff] %v9960_v45  ;;  %v1422_v1 = vcombine.high %v1382_v9, %v9936_v53  ;;  %v9976_v45 = vrot.slane %v9958_v33, %v8776_v15 }
 0x26e   : > { %3467 = vrot.lane.b32.xlu1 %v2082_v46, %s8636_s13  ;;  %3477 = vrot.lane.b32.xlu0 %v2572_v11, %s8636_s13 }
 0x26f   : > { %v9986_v24 = vrot.slane %v1422_v1, %v8776_v15  ;;  %v2474_v25 = vrot.slane %v9976_v45, %v8780_v21 }
 0x270   : > { %v9970_v22 = vpop.permute.xlu1 %3227  ;;  %v9981_v55 = vpop.permute.xlu0 %3269 }
 0x271   : > { %14138 = vst [vmem:[#allocation114_spill] sm:$0xff] %v9970_v22  ;;  %14139 = vst [vmem:[#allocation115_spill] sm:$0xff] %v9981_v55  ;;  %v9999_v55 = vcombine.low %v1382_v9, %v9936_v53  ;;  %v2964_v1 = vrot.slane %v9986_v24, %v8780_v21 }
 0x272   : > { %3471 = vrot.lane.b32.xlu1 %v2278_v13, %s8636_s13  ;;  %3481 = vrot.lane.b32.xlu0 %v2768_v8, %s8636_s13 }
 0x273   : > { %v10013_v23 = vrot.slane %v9999_v55, %v8776_v15 }
 0x274   : > { %v9990_v22 = vpop.permute.xlu1 %3263  ;;  %v10001_v29 = vpop.permute.xlu0 %3273 }
 0x275   : > { %14140 = vst [vmem:[#allocation116_spill] sm:$0xff] %v9990_v22  ;;  %14141 = vst [vmem:[#allocation117_spill] sm:$0xff] %v10001_v29  ;;  %v1615_v29 = vcombine.high %v9818_v56, %v14052_v14 }
 0x276   : > { %3475 = vrot.lane.b32.xlu1 %v2474_v25, %s8636_s13  ;;  %3485 = vrot.lane.b32.xlu0 %v2964_v1, %s8636_s13 }
 0x278   : > { %v10007_v22 = vpop.permute.xlu1 %3267  ;;  %v10015_v9 = vpop.permute.xlu0 %3277 }
 0x279   : > { %14142 = vst [vmem:[#allocation118_spill] sm:$0xff] %v10007_v22  ;;  %14143 = vst [vmem:[#allocation119_spill] sm:$0xff] %v10015_v9  ;;  %v2866_v22 = vrot.slane %v10013_v23, %v8780_v21  ;;  %v1517_v9 = vcombine.high %v9864_v28, %v14052_v14 }
 0x27a   : > { %3479 = vrot.lane.b32.xlu1 %v2670_v31, %s8636_s13  ;;  %3521 = vrot.lane.b32.xlu0 %v1615_v29, %s8637_s15 }
 0x27c   : > { %v10021_v37 = vpop.permute.xlu1 %3271  ;;  %v10025_v35 = vpop.permute.xlu0 %3281 }
 0x27d   : > { %14144 = vst [vmem:[#allocation120_spill] sm:$0xff] %v10021_v37  ;;  %14145 = vst [vmem:[#allocation121_spill] sm:$0xff] %v10025_v35  ;;  %v2007_v37 = vcombine.high %v9880_v42, %v14052_v14  ;;  %v1909_v42 = vcombine.high %v9926_v0, %v14052_v14 }
 0x27e   : > { %3483 = vrot.lane.b32.xlu1 %v2866_v22, %s8636_s13  ;;  %3525 = vrot.lane.b32.xlu0 %v1811_v16, %s8637_s15 }
 0x280   : > { %v10031_v56 = vpop.permute.xlu1 %3275  ;;  %v10035_v29 = vpop.permute.xlu0 %3285 }
 0x281   : > { %14146 = vst [vmem:[#allocation122_spill] sm:$0xff] %v10031_v56  ;;  %v2203_v56 = vcombine.high %v9911_v52, %v14052_v14  ;;  %v2105_v52 = vcombine.high %v2082_v46, %v14052_v14 }
 0x282   : > { %3519 = vrot.lane.b32.xlu1 %v1517_v9, %s8637_s15  ;;  %3529 = vrot.lane.b32.xlu0 %v2007_v37, %s8637_s15  ;;  %v2399_v9 = vcombine.high %v2376_v47, %v14052_v14  ;;  %v2301_v47 = vcombine.high %v2278_v13, %v14052_v14  ;;  %v2693_v13 = vcombine.high %v2670_v31, %v14052_v14 }
 0x283   : > { %v1487_v31 = vcombine.high %v9838_v20, %v14052_v14 }
 0x284   : > { %v10041_v35 = vpop.permute.xlu1 %3279  ;;  %v10045_v16 = vpop.permute.xlu0 %3289 }
 0x286   : > { %3523 = vrot.lane.b32.xlu1 %v1713_v34, %s8637_s15  ;;  %3533 = vrot.lane.b32.xlu0 %v2203_v56, %s8637_s15  ;;  %v2595_v56 = vcombine.high %v2572_v11, %v14052_v14  ;;  %v2497_v11 = vcombine.high %v2474_v25, %v14052_v14  ;;  %v1781_v25 = vcombine.high %v9821_v12, %v14052_v14 }
 0x287   : > { %v1977_v12 = vcombine.high %v9853_v5, %v14052_v14 }
 0x288   : > { %v10051_v28 = vpop.permute.xlu1 %3283  ;;  %v10055_v37 = vpop.permute.xlu0 %3293 }
 0x289   : > { %14147 = vst [vmem:[#allocation123_spill] sm:$0xff] %v10055_v37  ;;  %v1991_v20 = vrot.slane %v1977_v12, %v8780_v21  ;;  %v2369_v12 = vcombine.high %v9914_v57, %v14052_v14 }
 0x28a   : > { %3527 = vrot.lane.b32.xlu1 %v1909_v42, %s8637_s15  ;;  %3537 = vrot.lane.b32.xlu0 %v2399_v9, %s8637_s15  ;;  %v2791_v42 = vcombine.high %v2768_v8, %v14052_v14 }
 0x28c   : > { %v10060_v17 = vpop.permute.xlu1 %3287  ;;  %v10063_v34 = vpop.permute.xlu0 %3329 }
 0x28d   : > { %14148 = vst [vmem:[#allocation124_spill] sm:$0xff] %v10060_v17  ;;  %14149 = vst [vmem:[#allocation125_spill] sm:$0xff] %v10063_v34  ;;  %v14332_v34 = vld [vmem:[#allocation66_spill] sm:$0xff]  ;;  %v14334_v17 = vld [vmem:[#allocation67_spill] sm:$0xff] }
 0x28e   : > { %3531 = vrot.lane.b32.xlu1 %v2105_v52, %s8637_s15  ;;  %3541 = vrot.lane.b32.xlu0 %v2595_v56, %s8637_s15  ;;  %v2987_v52 = vcombine.high %v2964_v1, %v14052_v14  ;;  %v1585_v56 = vcombine.high %v9790_v59, %v14052_v14  ;;  %v2889_v1 = vcombine.high %v2866_v22, %v14052_v14 }
 0x28f   : > { %v1683_v22 = vcombine.high %v9868_v62, %v14052_v14 }
 0x290   : > { %v10068_v0 = vpop.permute.xlu1 %3291  ;;  %v10071_v37 = vpop.permute.xlu0 %3333 }
 0x291   : > { %14150 = vst [vmem:[#allocation126_spill] sm:$0xff] %v10068_v0  ;;  %14151 = vst [vmem:[#allocation127_spill] sm:$0xff] %v10071_v37 }
 0x292   : > { %3535 = vrot.lane.b32.xlu1 %v2301_v47, %s8637_s15  ;;  %3545 = vrot.lane.b32.xlu0 %v2791_v42, %s8637_s15  ;;  %v10092_v42 = vrot.slane %v1585_v56, %v8780_v21 }
 0x294   : > { %v10076_v46 = vpop.permute.xlu1 %3327  ;;  %v10079_v9 = vpop.permute.xlu0 %3337 }
 0x295   : > { %14152 = vst [vmem:[#allocation128_spill] sm:$0xff] %v10076_v46  ;;  %14153 = vst [vmem:[#allocation129_spill] sm:$0xff] %v10079_v9  ;;  %v14331_v46 = vld [vmem:[#allocation65_spill] sm:$0xff] }
 0x296   : > { %3539 = vrot.lane.b32.xlu1 %v2497_v11, %s8637_s15  ;;  %3549 = vrot.lane.b32.xlu0 %v2987_v52, %s8637_s15  ;;  %v1795_v52 = vrot.slane %v1781_v25, %v8780_v21  ;;  %v2173_v25 = vcombine.high %v9883_v44, %v14052_v14 }
 0x298   : > { %v10086_v8 = vpop.permute.xlu1 %3331  ;;  %v10089_v47 = vpop.permute.xlu0 %3341  ;;  %v2187_v62 = vrot.slane %v2173_v25, %v8780_v21  ;;  %v2565_v25 = vcombine.high %v9943_v36, %v14052_v14 }
 0x299   : > { %14154 = vst [vmem:[#allocation130_spill] sm:$0xff] %v10086_v8  ;;  %14155 = vst [vmem:[#allocation131_spill] sm:$0xff] %v10089_v47  ;;  %v14326_v47 = vld [vmem:[#allocation63_spill] sm:$0xff]  ;;  %v14327_v8 = vld [vmem:[#allocation30_spill] sm:$0xff] }
 0x29a   : > { %3543 = vrot.lane.b32.xlu1 %v2693_v13, %s8637_s15  ;;  %3585 = vrot.lane.b32.xlu0 %v10092_v42, %s8638_s16  ;;  %v1501_v13 = vrot.slane %v1487_v31, %v8780_v21  ;;  %v1879_v31 = vcombine.high %v9899_v7, %v14052_v14  ;;  %v2383_v7 = vrot.slane %v2369_v12, %v8780_v21 }
 0x29b   : > { %v2761_v12 = vcombine.high %v9965_v48, %v14052_v14 }
 0x29c   : > { %v10099_v59 = vpop.permute.xlu1 %3335  ;;  %v10104_v11 = vpop.permute.xlu0 %3345 }
 0x29d   : > { %14156 = vst [vmem:[#allocation132_spill] sm:$0xff] %v10099_v59  ;;  %14157 = vst [vmem:[#allocation133_spill] sm:$0xff] %v10104_v11 }
 0x29e   : > { %3547 = vrot.lane.b32.xlu1 %v2889_v1, %s8637_s15  ;;  %3589 = vrot.lane.b32.xlu0 %v1795_v52, %s8638_s16  ;;  %v1697_v1 = vrot.slane %v1683_v22, %v8780_v21  ;;  %v2075_v22 = vcombine.high %v9930_v10, %v14052_v14  ;;  %v2579_v10 = vrot.slane %v2565_v25, %v8780_v21 }
 0x29f   : > { %v2957_v25 = vcombine.high %v9986_v24, %v14052_v14 }
 0x2a0   : > { %v10111_v56 = vpop.permute.xlu1 %3339  ;;  %v10116_v0 = vpop.permute.xlu0 %3349 }
 0x2a1   : > { %14158 = vst [vmem:[#allocation134_spill] sm:$0xff] %v10111_v56  ;;  %14159 = vst [vmem:[#allocation135_spill] sm:$0xff] %v10116_v0 }
 0x2a2   : > { %3583 = vrot.lane.b32.xlu1 %v1501_v13, %s8638_s16  ;;  %3593 = vrot.lane.b32.xlu0 %v1991_v20, %s8638_s16 }
 0x2a4   : > { %v10123_v5 = vpop.permute.xlu1 %3343  ;;  %v10128_v56 = vpop.permute.xlu0 %3353 }
 0x2a5   : > { %14160 = vst [vmem:[#allocation136_spill] sm:$0xff] %v10123_v5  ;;  %14161 = vst [vmem:[#allocation137_spill] sm:$0xff] %v10128_v56  ;;  %v1893_v5 = vrot.slane %v1879_v31, %v8780_v21  ;;  %v2271_v31 = vcombine.high %v9955_v27, %v14052_v14  ;;  %v2775_v27 = vrot.slane %v2761_v12, %v8780_v21 }
 0x2a6   : > { %3587 = vrot.lane.b32.xlu1 %v1697_v1, %s8638_s16  ;;  %3597 = vrot.lane.b32.xlu0 %v2187_v62, %s8638_s16 }
 0x2a8   : > { %v10135_v44 = vpop.permute.xlu1 %3347  ;;  %v10140_v0 = vpop.permute.xlu0 %3357 }
 0x2a9   : > { %14162 = vst [vmem:[#allocation138_spill] sm:$0xff] %v10135_v44  ;;  %14163 = vst [vmem:[#allocation139_spill] sm:$0xff] %v10140_v0  ;;  %v2089_v44 = vrot.slane %v2075_v22, %v8780_v21  ;;  %v2467_v22 = vcombine.high %v9976_v45, %v14052_v14  ;;  %v2971_v45 = vrot.slane %v2957_v25, %v8780_v21 }
 0x2aa   : > { %3591 = vrot.lane.b32.xlu1 %v1893_v5, %s8638_s16  ;;  %3601 = vrot.lane.b32.xlu0 %v2383_v7, %s8638_s16 }
 0x2ac   : > { %v10147_v57 = vpop.permute.xlu1 %3351  ;;  %v10152_v56 = vpop.permute.xlu0 %3393 }
 0x2ad   : > { %14164 = vst [vmem:[#allocation140_spill] sm:$0xff] %v10147_v57  ;;  %14165 = vst [vmem:[#allocation141_spill] sm:$0xff] %v10152_v56  ;;  %v2285_v57 = vrot.slane %v2271_v31, %v8780_v21  ;;  %v2663_v31 = vcombine.high %v9996_v19, %v14052_v14  ;;  %v1616_v19 = vcombine.high %v10092_v42, %v14052_v14 }
 0x2ae   : > { %3595 = vrot.lane.b32.xlu1 %v2089_v44, %s8638_s16  ;;  %3605 = vrot.lane.b32.xlu0 %v2579_v10, %s8638_s16  ;;  %v1518_v42 = vcombine.high %v1501_v13, %v14052_v14 }
 0x2af   : > { %v2677_v12 = vrot.slane %v2663_v31, %v8780_v21  ;;  %v1812_v31 = vcombine.high %v1795_v52, %v14052_v14  ;;  %v1714_v52 = vcombine.high %v1697_v1, %v14052_v14 }
 0x2b0   : > { %v10159_v36 = vpop.permute.xlu1 %3355  ;;  %v10164_v0 = vpop.permute.xlu0 %3397 }
 0x2b1   : > { %14166 = vst [vmem:[#allocation142_spill] sm:$0xff] %v10159_v36  ;;  %14167 = vst [vmem:[#allocation143_spill] sm:$0xff] %v10164_v0  ;;  %v2481_v36 = vrot.slane %v2467_v22, %v8780_v21 }
 0x2b2   : > { %3599 = vrot.lane.b32.xlu1 %v2285_v57, %s8638_s16  ;;  %3609 = vrot.lane.b32.xlu0 %v2775_v27, %s8638_s16 }
 0x2b4   : > { %v10171_v48 = vpop.permute.xlu1 %3391  ;;  %v10176_v56 = vpop.permute.xlu0 %3401 }
 0x2b5   : > { %14168 = vst [vmem:[#allocation144_spill] sm:$0xff] %v10171_v48  ;;  %14169 = vst [vmem:[#allocation145_spill] sm:$0xff] %v10176_v56  ;;  %v2859_v48 = vcombine.high %v10013_v23, %v14052_v14 }
 0x2b6   : > { %3603 = vrot.lane.b32.xlu1 %v2481_v36, %s8638_s16  ;;  %3613 = vrot.lane.b32.xlu0 %v2971_v45, %s8638_s16 }
 0x2b7   : > { %v2873_v25 = vrot.slane %v2859_v48, %v8780_v21 }
 0x2b8   : > { %v10181_v24 = vpop.permute.xlu1 %3395  ;;  %v10186_v0 = vpop.permute.xlu0 %3405 }
 0x2b9   : > { %14170 = vst [vmem:[#allocation146_spill] sm:$0xff] %v10181_v24  ;;  %14171 = vst [vmem:[#allocation147_spill] sm:$0xff] %v10186_v0 }
 0x2ba   : > { %3607 = vrot.lane.b32.xlu1 %v2677_v12, %s8638_s16  ;;  %3649 = vrot.lane.b32.xlu0 %v1616_v19, %s8639_s17  ;;  %v2008_v19 = vcombine.high %v1991_v20, %v14052_v14  ;;  %v1910_v20 = vcombine.high %v1893_v5, %v14052_v14 }
 0x2bc   : > { %v10192_v22 = vpop.permute.xlu1 %3399  ;;  %v10195_v24 = vpop.permute.xlu0 %3409 }
 0x2bd   : > { %14172 = vst [vmem:[#allocation148_spill] sm:$0xff] %v10192_v22  ;;  %14173 = vst [vmem:[#allocation149_spill] sm:$0xff] %v10195_v24 }
 0x2be   : > { %3611 = vrot.lane.b32.xlu1 %v2873_v25, %s8638_s16  ;;  %3653 = vrot.lane.b32.xlu0 %v1812_v31, %s8639_s17  ;;  %v2204_v31 = vcombine.high %v2187_v62, %v14052_v14  ;;  %v2106_v62 = vcombine.high %v2089_v44, %v14052_v14 }
 0x2c0   : > { %v10200_v23 = vpop.permute.xlu1 %3403  ;;  %v10203_v0 = vpop.permute.xlu0 %3413 }
 0x2c1   : > { %14174 = vst [vmem:[#allocation150_spill] sm:$0xff] %v10200_v23  ;;  %14175 = vst [vmem:[#allocation151_spill] sm:$0xff] %v10203_v0 }
 0x2c2   : > { %3647 = vrot.lane.b32.xlu1 %v1518_v42, %s8639_s17  ;;  %3657 = vrot.lane.b32.xlu0 %v2008_v19, %s8639_s17  ;;  %v2400_v42 = vcombine.high %v2383_v7, %v14052_v14  ;;  %v2302_v7 = vcombine.high %v2285_v57, %v14052_v14 }
 0x2c4   : > { %v10208_v48 = vpop.permute.xlu1 %3407  ;;  %v10211_v24 = vpop.permute.xlu0 %3417 }
 0x2c5   : > { %14176 = vst [vmem:[#allocation152_spill] sm:$0xff] %v10208_v48  ;;  %14177 = vst [vmem:[#allocation153_spill] sm:$0xff] %v10211_v24 }
 0x2c6   : > { %3651 = vrot.lane.b32.xlu1 %v1714_v52, %s8639_s17  ;;  %3661 = vrot.lane.b32.xlu0 %v2204_v31, %s8639_s17  ;;  %v2596_v52 = vcombine.high %v2579_v10, %v14052_v14  ;;  %v2498_v10 = vcombine.high %v2481_v36, %v14052_v14  ;;  %v1472_v36 = vcombine.high %v9812_v41, %v14052_v14 }
 0x2c7   : > { %v2890_v41 = vcombine.high %v2873_v25, %v14052_v14 }
 0x2c8   : > { %v10216_v13 = vpop.permute.xlu1 %3411  ;;  %v10219_v0 = vpop.permute.xlu0 %3421 }
 0x2c9   : > { %14178 = vst [vmem:[#allocation154_spill] sm:$0xff] %v10216_v13  ;;  %14179 = vst [vmem:[#allocation155_spill] sm:$0xff] %v10219_v0 }
 0x2ca   : > { %3655 = vrot.lane.b32.xlu1 %v1910_v20, %s8639_s17  ;;  %3665 = vrot.lane.b32.xlu0 %v2400_v42, %s8639_s17  ;;  %v2792_v20 = vcombine.high %v2775_v27, %v14052_v14  ;;  %v8384_v42 = vcombine.high %v9742_v60, %v14052_v14  ;;  %v8386_v27 = vcombine.high %v9762_v61, %v14052_v14 }
 0x2cb   : > { %v8388_v61 = vcombine.high %v9777_v43, %v14052_v14 }
 0x2cc   : > { %v10224_v1 = vpop.permute.xlu1 %3415  ;;  %v10227_v19 = vpop.permute.xlu0 %3457  ;;  %v10249_v57 = vrot.slane %v8384_v42, %v8776_v15  ;;  %v10267_v42 = vrot.slane %v8386_v27, %v8776_v15 }
 0x2cd   : > { %14180 = vst [vmem:[#allocation156_spill] sm:$0xff] %v10224_v1  ;;  %14181 = vst [vmem:[#allocation157_spill] sm:$0xff] %v10227_v19 }
 0x2ce   : > { %3659 = vrot.lane.b32.xlu1 %v2106_v62, %s8639_s17  ;;  %3669 = vrot.lane.b32.xlu0 %v2596_v52, %s8639_s17  ;;  %v2988_v52 = vcombine.high %v2971_v45, %v14052_v14  ;;  %v10264_v45 = vrot.slane %v10249_v57, %v8780_v21  ;;  %v10286_v43 = vrot.slane %v10267_v42, %v8780_v21 }
 0x2d0   : > { %v10232_v5 = vpop.permute.xlu1 %3419  ;;  %v10235_v31 = vpop.permute.xlu0 %3461 }
 0x2d1   : > { %14182 = vst [vmem:[#allocation158_spill] sm:$0xff] %v10232_v5  ;;  %14183 = vst [vmem:[#allocation159_spill] sm:$0xff] %v10235_v31  ;;  %v8390_v5 = vcombine.high %v9805_v50, %v14052_v14 }
 0x2d2   : > { %3663 = vrot.lane.b32.xlu1 %v2302_v7, %s8639_s17  ;;  %3673 = vrot.lane.b32.xlu0 %v2792_v20, %s8639_s17  ;;  %v2694_v7 = vcombine.high %v2677_v12, %v14052_v14 }
 0x2d4   : > { %v10242_v44 = vpop.permute.xlu1 %3455  ;;  %v10245_v62 = vpop.permute.xlu0 %3465 }
 0x2d5   : > { %14184 = vst [vmem:[#allocation160_spill] sm:$0xff] %v10242_v44  ;;  %14185 = vst [vmem:[#allocation161_spill] sm:$0xff] %v10245_v62  ;;  %v2648_v44 = vcombine.high %v9979_v58, %v14052_v14  ;;  %v2844_v58 = vcombine.high %v9999_v55, %v14052_v14  ;;  %v1617_v55 = vcombine.high %v10264_v45, %v14052_v14 }
 0x2d6   : > { %3667 = vrot.lane.b32.xlu1 %v2498_v10, %s8639_s17  ;;  %3677 = vrot.lane.b32.xlu0 %v2988_v52, %s8639_s17  ;;  %v10278_v10 = vrot.slane %v1472_v36, %v8776_v15  ;;  %v1668_v52 = vcombine.high %v9841_v32, %v14052_v14 }
 0x2d7   : > { %v10414_v48 = vrot.slane %v2648_v44, %v8776_v15  ;;  %v10429_v44 = vrot.slane %v2844_v58, %v8776_v15  ;;  %v1813_v58 = vcombine.high %v10286_v43, %v14052_v14 }
 0x2d8   : > { %v10255_v60 = vpop.permute.xlu1 %3459  ;;  %v10260_v20 = vpop.permute.xlu0 %3469  ;;  %v10300_v32 = vrot.slane %v10278_v10, %v8780_v21  ;;  %v10303_v36 = vrot.slane %v1668_v52, %v8776_v15 }
 0x2d9   : > { %14186 = vst [vmem:[#allocation162_spill] sm:$0xff] %v10255_v60  ;;  %14187 = vst [vmem:[#allocation163_spill] sm:$0xff] %v10260_v20 }
 0x2da   : > { %3671 = vrot.lane.b32.xlu1 %v2694_v7, %s8639_s17  ;;  %3713 = vrot.lane.b32.xlu0 %v10264_v45, %s8640_s22  ;;  %v10289_v7 = vrot.slane %v8388_v61, %v8776_v15  ;;  %v1864_v61 = vcombine.high %v9871_v51, %v14052_v14  ;;  %v10326_v51 = vrot.slane %v10303_v36, %v8780_v21 }
 0x2dc   : > { %v10274_v12 = vpop.permute.xlu1 %3463  ;;  %v10282_v27 = vpop.permute.xlu0 %3473  ;;  %v10311_v50 = vrot.slane %v10289_v7, %v8780_v21 }
 0x2dd   : > { %14188 = vst [vmem:[#allocation164_spill] sm:$0xff] %v10274_v12  ;;  %14189 = vst [vmem:[#allocation165_spill] sm:$0xff] %v10282_v27 }
 0x2de   : > { %3675 = vrot.lane.b32.xlu1 %v2890_v41, %s8639_s17  ;;  %3717 = vrot.lane.b32.xlu0 %v10286_v43, %s8640_s22  ;;  %v10314_v41 = vrot.slane %v8390_v5, %v8776_v15  ;;  %v2060_v5 = vcombine.high %v9902_v63, %v14052_v14  ;;  %v1715_v43 = vcombine.high %v10326_v51, %v14052_v14 }
 0x2e0   : > { %v10296_v25 = vpop.permute.xlu1 %3467  ;;  %v10307_v27 = vpop.permute.xlu0 %3477 }
 0x2e1   : > { %14190 = vst [vmem:[#allocation166_spill] sm:$0xff] %v10296_v25  ;;  %14191 = vst [vmem:[#allocation167_spill] sm:$0xff] %v10307_v27  ;;  %v8392_v25 = vcombine.high %v9844_v4, %v14052_v14  ;;  %v10329_v27 = vrot.slane %v1864_v61, %v8776_v15  ;;  %v10337_v4 = vrot.slane %v10314_v41, %v8780_v21 }
 0x2e2   : > { %3711 = vrot.lane.b32.xlu1 %v10300_v32, %s8640_s22  ;;  %3721 = vrot.lane.b32.xlu0 %v10311_v50, %s8640_s22 }
 0x2e3   : > { %v10340_v20 = vrot.slane %v8392_v25, %v8776_v15  ;;  %v10352_v63 = vrot.slane %v10329_v27, %v8780_v21  ;;  %v2256_v25 = vcombine.high %v9933_v6, %v14052_v14 }
 0x2e4   : > { %v10322_v52 = vpop.permute.xlu1 %3471  ;;  %v10333_v12 = vpop.permute.xlu0 %3481 }
 0x2e5   : > { %14192 = vst [vmem:[#allocation168_spill] sm:$0xff] %v10322_v52  ;;  %14193 = vst [vmem:[#allocation169_spill] sm:$0xff] %v10333_v12  ;;  %v8394_v52 = vcombine.high %v9874_v39, %v14052_v14  ;;  %v10355_v12 = vrot.slane %v2060_v5, %v8776_v15  ;;  %v2391_v39 = vrot.slane %v10340_v20, %v8780_v21 }
 0x2e6   : > { %3715 = vrot.lane.b32.xlu1 %v10326_v51, %s8640_s22  ;;  %3725 = vrot.lane.b32.xlu0 %v10337_v4, %s8640_s22 }
 0x2e7   : > { %v10364_v1 = vrot.slane %v8394_v52, %v8776_v15  ;;  %v2097_v6 = vrot.slane %v10355_v12, %v8780_v21  ;;  %v2452_v52 = vcombine.high %v9958_v33, %v14052_v14 }
 0x2e8   : > { %v10348_v61 = vpop.permute.xlu1 %3475  ;;  %v10359_v60 = vpop.permute.xlu0 %3485 }
 0x2e9   : > { %14194 = vst [vmem:[#allocation170_spill] sm:$0xff] %v10348_v61  ;;  %14195 = vst [vmem:[#allocation171_spill] sm:$0xff] %v10359_v60  ;;  %v8396_v61 = vcombine.high %v9905_v54, %v14052_v14  ;;  %v10376_v60 = vrot.slane %v2256_v25, %v8776_v15  ;;  %v2587_v54 = vrot.slane %v10364_v1, %v8780_v21 }
 0x2ea   : > { %3719 = vrot.lane.b32.xlu1 %v10352_v63, %s8640_s22  ;;  %3729 = vrot.lane.b32.xlu0 %v2391_v39, %s8640_s22  ;;  %v10396_v13 = vrot.slane %v2452_v52, %v8776_v15 }
 0x2eb   : > { %v10385_v62 = vrot.slane %v8396_v61, %v8776_v15  ;;  %v2293_v33 = vrot.slane %v10376_v60, %v8780_v21 }
 0x2ec   : > { %v10371_v5 = vpop.permute.xlu1 %3479  ;;  %v10380_v0 = vpop.permute.xlu0 %3521  ;;  %v2489_v52 = vrot.slane %v10396_v13, %v8780_v21 }
 0x2ed   : > { %14196 = vst [vmem:[#allocation172_spill] sm:$0xff] %v10371_v5  ;;  %14197 = vst [vmem:[#allocation173_spill] sm:$0xff] %v10380_v0  ;;  %v8398_v5 = vcombine.high %v9936_v53, %v14052_v14  ;;  %v2783_v53 = vrot.slane %v10385_v62, %v8780_v21 }
 0x2ee   : > { %3723 = vrot.lane.b32.xlu1 %v2097_v6, %s8640_s22  ;;  %3733 = vrot.lane.b32.xlu0 %v2587_v54, %s8640_s22 }
 0x2ef   : > { %v10405_v24 = vrot.slane %v8398_v5, %v8776_v15 }
 0x2f0   : > { %v10391_v25 = vpop.permute.xlu1 %3483  ;;  %v10400_v61 = vpop.permute.xlu0 %3525 }
 0x2f1   : > { %14198 = vst [vmem:[#allocation174_spill] sm:$0xff] %v10391_v25  ;;  %14199 = vst [vmem:[#allocation175_spill] sm:$0xff] %v10400_v61  ;;  %v2979_v5 = vrot.slane %v10405_v24, %v8780_v21 }
 0x2f2   : > { %3727 = vrot.lane.b32.xlu1 %v2293_v33, %s8640_s22  ;;  %3737 = vrot.lane.b32.xlu0 %v2783_v53, %s8640_s22 }
 0x2f4   : > { %v10409_v25 = vpop.permute.xlu1 %3519  ;;  %v10418_v61 = vpop.permute.xlu0 %3529 }
 0x2f5   : > { %14200 = vst [vmem:[#allocation176_spill] sm:$0xff] %v10409_v25  ;;  %14201 = vst [vmem:[#allocation177_spill] sm:$0xff] %v10418_v61  ;;  %v2685_v25 = vrot.slane %v10414_v48, %v8780_v21 }
 0x2f6   : > { %3731 = vrot.lane.b32.xlu1 %v2489_v52, %s8640_s22  ;;  %3741 = vrot.lane.b32.xlu0 %v2979_v5, %s8640_s22 }
 0x2f8   : > { %v10424_v23 = vpop.permute.xlu1 %3523  ;;  %v10431_v31 = vpop.permute.xlu0 %3533 }
 0x2f9   : > { %14202 = vst [vmem:[#allocation178_spill] sm:$0xff] %v10424_v23  ;;  %14203 = vst [vmem:[#allocation179_spill] sm:$0xff] %v10431_v31  ;;  %v2881_v23 = vrot.slane %v10429_v44, %v8780_v21  ;;  %v1519_v31 = vcombine.high %v10300_v32, %v14052_v14 }
 0x2fa   : > { %3735 = vrot.lane.b32.xlu1 %v2685_v25, %s8640_s22  ;;  %3777 = vrot.lane.b32.xlu0 %v1617_v55, %s8641_s23 }
 0x2fc   : > { %v10437_v61 = vpop.permute.xlu1 %3527  ;;  %v10441_v22 = vpop.permute.xlu0 %3537 }
 0x2fd   : > { %14204 = vst [vmem:[#allocation180_spill] sm:$0xff] %v10437_v61  ;;  %14205 = vst [vmem:[#allocation181_spill] sm:$0xff] %v10441_v22  ;;  %v2009_v61 = vcombine.high %v10311_v50, %v14052_v14 }
 0x2fe   : > { %3739 = vrot.lane.b32.xlu1 %v2881_v23, %s8640_s22  ;;  %3781 = vrot.lane.b32.xlu0 %v1813_v58, %s8641_s23 }
 0x300   : > { %v10447_v45 = vpop.permute.xlu1 %3531  ;;  %v10451_v55 = vpop.permute.xlu0 %3541 }
 0x301   : > { %14206 = vst [vmem:[#allocation182_spill] sm:$0xff] %v10447_v45  ;;  %14207 = vst [vmem:[#allocation183_spill] sm:$0xff] %v10451_v55  ;;  %v2205_v45 = vcombine.high %v10337_v4, %v14052_v14  ;;  %v2107_v4 = vcombine.high %v2097_v6, %v14052_v14 }
 0x302   : > { %3775 = vrot.lane.b32.xlu1 %v1519_v31, %s8641_s23  ;;  %3785 = vrot.lane.b32.xlu0 %v2009_v61, %s8641_s23  ;;  %v1911_v31 = vcombine.high %v10352_v63, %v14052_v14  ;;  %v2401_v61 = vcombine.high %v2391_v39, %v14052_v14  ;;  %v2303_v39 = vcombine.high %v2293_v33, %v14052_v14 }
 0x304   : > { %v10457_v22 = vpop.permute.xlu1 %3535  ;;  %v10461_v58 = vpop.permute.xlu0 %3545 }
 0x305   : > { %14208 = vst [vmem:[#allocation184_spill] sm:$0xff] %v10457_v22  ;;  %14209 = vst [vmem:[#allocation185_spill] sm:$0xff] %v10461_v58 }
 0x306   : > { %3779 = vrot.lane.b32.xlu1 %v1715_v43, %s8641_s23  ;;  %3789 = vrot.lane.b32.xlu0 %v2205_v45, %s8641_s23  ;;  %v2597_v45 = vcombine.high %v2587_v54, %v14052_v14  ;;  %v2499_v54 = vcombine.high %v2489_v52, %v14052_v14  ;;  %v1796_v52 = vcombine.high %v10267_v42, %v14052_v14 }
 0x307   : > { %v1992_v42 = vcombine.high %v10289_v7, %v14052_v14  ;;  %v2188_v7 = vcombine.high %v10314_v41, %v14052_v14  ;;  %v2384_v41 = vcombine.high %v10340_v20, %v14052_v14  ;;  %v2580_v20 = vcombine.high %v10364_v1, %v14052_v14 }
 0x308   : > { %v10467_v32 = vpop.permute.xlu1 %3539  ;;  %v10471_v50 = vpop.permute.xlu0 %3549  ;;  %v2776_v1 = vcombine.high %v10385_v62, %v14052_v14  ;;  %v2972_v62 = vcombine.high %v10405_v24, %v14052_v14 }
 0x309   : > { %14210 = vst [vmem:[#allocation186_spill] sm:$0xff] %v10467_v32  ;;  %14211 = vst [vmem:[#allocation187_spill] sm:$0xff] %v10471_v50 }
 0x30a   : > { %3783 = vrot.lane.b32.xlu1 %v1911_v31, %s8641_s23  ;;  %3793 = vrot.lane.b32.xlu0 %v2401_v61, %s8641_s23  ;;  %v2793_v31 = vcombine.high %v2783_v53, %v14052_v14  ;;  %v2695_v53 = vcombine.high %v2685_v25, %v14052_v14  ;;  %v1502_v25 = vcombine.high %v10278_v10, %v14052_v14 }
 0x30b   : > { %v1698_v10 = vcombine.high %v10303_v36, %v14052_v14  ;;  %v1894_v36 = vcombine.high %v10329_v27, %v14052_v14  ;;  %v2090_v27 = vcombine.high %v10355_v12, %v14052_v14  ;;  %v2286_v12 = vcombine.high %v10376_v60, %v14052_v14 }
 0x30c   : > { %v10476_v51 = vpop.permute.xlu1 %3543  ;;  %v10479_v43 = vpop.permute.xlu0 %3585  ;;  %v2482_v60 = vcombine.high %v10396_v13, %v14052_v14  ;;  %v2678_v13 = vcombine.high %v10414_v48, %v14052_v14 }
 0x30d   : > { %14212 = vst [vmem:[#allocation188_spill] sm:$0xff] %v10476_v51  ;;  %14213 = vst [vmem:[#allocation189_spill] sm:$0xff] %v10479_v43  ;;  %v14311_v43 = vld [vmem:[#allocation23_spill] sm:$0xff] }
 0x30e   : > { %3787 = vrot.lane.b32.xlu1 %v2107_v4, %s8641_s23  ;;  %3797 = vrot.lane.b32.xlu0 %v2597_v45, %s8641_s23  ;;  %v2989_v4 = vcombine.high %v2979_v5, %v14052_v14  ;;  %v1600_v45 = vcombine.high %v10249_v57, %v14052_v14  ;;  %v2891_v5 = vcombine.high %v2881_v23, %v14052_v14 }
 0x30f   : > { %v10533_v23 = vrot.slane %v1502_v25, %v8780_v21  ;;  %v10551_v25 = vrot.slane %v1698_v10, %v8780_v21  ;;  %v10569_v10 = vrot.slane %v1894_v36, %v8780_v21  ;;  %v10587_v36 = vrot.slane %v2090_v27, %v8780_v21 }
 0x310   : > { %v10484_v63 = vpop.permute.xlu1 %3547  ;;  %v10487_v50 = vpop.permute.xlu0 %3589  ;;  %v10605_v27 = vrot.slane %v2286_v12, %v8780_v21  ;;  %v10623_v12 = vrot.slane %v2482_v60, %v8780_v21  ;;  %v10639_v58 = vrot.slane %v2678_v13, %v8780_v21  ;;  %v2874_v60 = vcombine.high %v10429_v44, %v14052_v14 }
 0x311   : > { %14214 = vst [vmem:[#allocation190_spill] sm:$0xff] %v10484_v63  ;;  %14215 = vst [vmem:[#allocation191_spill] sm:$0xff] %v10487_v50  ;;  %v4968_v13 = vcombine.low %v9192_v38, %v9224_v26  ;;  %v4984_v44 = vcombine.low %v9197_v49, %v9229_v18 }
 0x312   : > { %3791 = vrot.lane.b32.xlu1 %v2303_v39, %s8641_s23  ;;  %3801 = vrot.lane.b32.xlu0 %v2793_v31, %s8641_s23  ;;  %v10508_v31 = vrot.slane %v1600_v45, %v8780_v21 }
 0x314   : > { %v10492_v6 = vpop.permute.xlu1 %3583  ;;  %v10495_v61 = vpop.permute.xlu0 %3593 }
 0x315   : > { %14216 = vst [vmem:[#allocation192_spill] sm:$0xff] %v10492_v6  ;;  %14217 = vst [vmem:[#allocation193_spill] sm:$0xff] %v10495_v61 }
 0x316   : > { %3795 = vrot.lane.b32.xlu1 %v2499_v54, %s8641_s23  ;;  %3805 = vrot.lane.b32.xlu0 %v2989_v4, %s8641_s23  ;;  %v10523_v4 = vrot.slane %v1796_v52, %v8780_v21  ;;  %v10540_v52 = vrot.slane %v1992_v42, %v8780_v21  ;;  %v10558_v42 = vrot.slane %v2188_v7, %v8780_v21 }
 0x317   : > { %v10576_v7 = vrot.slane %v2384_v41, %v8780_v21  ;;  %v10594_v41 = vrot.slane %v2580_v20, %v8780_v21  ;;  %v10612_v20 = vrot.slane %v2776_v1, %v8780_v21  ;;  %v10630_v1 = vrot.slane %v2972_v62, %v8780_v21 }
 0x318   : > { %v10502_v33 = vpop.permute.xlu1 %3587  ;;  %v10505_v39 = vpop.permute.xlu0 %3597  ;;  %v1618_v62 = vcombine.high %v10508_v31, %v14052_v14 }
 0x319   : > { %14218 = vst [vmem:[#allocation194_spill] sm:$0xff] %v10502_v33  ;;  %14219 = vst [vmem:[#allocation195_spill] sm:$0xff] %v10505_v39  ;;  %v10682_v39 = vrot.slane %v4984_v44, %v8776_v15  ;;  %v2010_v33 = vcombine.high %v10540_v52, %v14052_v14  ;;  %v2402_v6 = vcombine.high %v10576_v7, %v14052_v14 }
 0x31a   : > { %3799 = vrot.lane.b32.xlu1 %v2695_v53, %s8641_s23  ;;  %3841 = vrot.lane.b32.xlu0 %v10508_v31, %s8642_s24  ;;  %v1814_v31 = vcombine.high %v10523_v4, %v14052_v14 }
 0x31c   : > { %v10515_v57 = vpop.permute.xlu1 %3591  ;;  %v10520_v54 = vpop.permute.xlu0 %3601 }
 0x31d   : > { %14220 = vst [vmem:[#allocation196_spill] sm:$0xff] %v10515_v57  ;;  %14221 = vst [vmem:[#allocation197_spill] sm:$0xff] %v10520_v54  ;;  %v4969_v57 = vcombine.high %v9192_v38, %v9224_v26 }
 0x31e   : > { %3803 = vrot.lane.b32.xlu1 %v2891_v5, %s8641_s23  ;;  %3845 = vrot.lane.b32.xlu0 %v10523_v4, %s8642_s24  ;;  %v10677_v4 = vrot.slane %v4968_v13, %v8776_v15 }
 0x320   : > { %v10530_v45 = vpop.permute.xlu1 %3595  ;;  %v10537_v53 = vpop.permute.xlu0 %3605 }
 0x321   : > { %14222 = vst [vmem:[#allocation198_spill] sm:$0xff] %v10530_v45  ;;  %14223 = vst [vmem:[#allocation199_spill] sm:$0xff] %v10537_v53  ;;  %v10653_v53 = vrot.slane %v2874_v60, %v8780_v21  ;;  %v14239_v60 = vld [vmem:[#allocation10_spill] sm:$0xff] }
 0x322   : > { %3839 = vrot.lane.b32.xlu1 %v10533_v23, %s8642_s24  ;;  %3849 = vrot.lane.b32.xlu0 %v10540_v52, %s8642_s24  ;;  %v14243_v52 = vld [vmem:[#allocation33_spill] sm:$0xff] }
 0x324   : > { %v10548_v5 = vpop.permute.xlu1 %3599  ;;  %v10555_v63 = vpop.permute.xlu0 %3609 }
 0x325   : > { %14224 = vst [vmem:[#allocation200_spill] sm:$0xff] %v10548_v5  ;;  %14225 = vst [vmem:[#allocation201_spill] sm:$0xff] %v10555_v63 }
 0x326   : > { %3843 = vrot.lane.b32.xlu1 %v10551_v25, %s8642_s24  ;;  %3853 = vrot.lane.b32.xlu0 %v10558_v42, %s8642_s24 }
 0x328   : > { %v10566_v51 = vpop.permute.xlu1 %3603  ;;  %v10573_v32 = vpop.permute.xlu0 %3613 }
 0x329   : > { %14226 = vst [vmem:[#allocation202_spill] sm:$0xff] %v10566_v51  ;;  %14227 = vst [vmem:[#allocation203_spill] sm:$0xff] %v10573_v32 }
 0x32a   : > { %3847 = vrot.lane.b32.xlu1 %v10569_v10, %s8642_s24  ;;  %3857 = vrot.lane.b32.xlu0 %v10576_v7, %s8642_s24 }
 0x32c   : > { %v10584_v51 = vpop.permute.xlu1 %3607  ;;  %v10591_v32 = vpop.permute.xlu0 %3649 }
 0x32d   : > { %14228 = vst [vmem:[#allocation204_spill] sm:$0xff] %v10584_v51  ;;  %14229 = vst [vmem:[#allocation205_spill] sm:$0xff] %v10591_v32  ;;  %v14307_v32 = vld [vmem:[#allocation21_spill] sm:$0xff] }
 0x32e   : > { %3851 = vrot.lane.b32.xlu1 %v10587_v36, %s8642_s24  ;;  %3861 = vrot.lane.b32.xlu0 %v10594_v41, %s8642_s24 }
 0x330   : > { %v10602_v51 = vpop.permute.xlu1 %3611  ;;  %v10609_v63 = vpop.permute.xlu0 %3653 }
 0x331   : > { %14230 = vst [vmem:[#allocation206_spill] sm:$0xff] %v10602_v51  ;;  %14231 = vst [vmem:[#allocation207_spill] sm:$0xff] %v10609_v63 }
 0x332   : > { %3855 = vrot.lane.b32.xlu1 %v10605_v27, %s8642_s24  ;;  %3865 = vrot.lane.b32.xlu0 %v10612_v20, %s8642_s24 }
 0x334   : > { %v10620_v51 = vpop.permute.xlu1 %3647  ;;  %v10627_v5 = vpop.permute.xlu0 %3657 }
 0x335   : > { %14232 = vst [vmem:[#allocation208_spill] sm:$0xff] %v10620_v51  ;;  %14233 = vst [vmem:[#allocation209_spill] sm:$0xff] %v10627_v5 }
 0x336   : > { %3859 = vrot.lane.b32.xlu1 %v10623_v12, %s8642_s24  ;;  %3869 = vrot.lane.b32.xlu0 %v10630_v1, %s8642_s24 }
 0x338   : > { %v10636_v24 = vpop.permute.xlu1 %3651  ;;  %v10643_v48 = vpop.permute.xlu0 %3661 }
 0x339   : > { %14234 = vst [vmem:[#allocation210_spill] sm:$0xff] %v10636_v24  ;;  %14235 = vst [vmem:[#allocation211_spill] sm:$0xff] %v10643_v48  ;;  %v4985_v24 = vcombine.high %v9197_v49, %v9229_v18  ;;  %v10701_v18 = vrot.slane %v4969_v57, %v8776_v15  ;;  %v2206_v57 = vcombine.high %v10558_v42, %v14052_v14 }
 0x33a   : > { %3863 = vrot.lane.b32.xlu1 %v10639_v58, %s8642_s24  ;;  %3905 = vrot.lane.b32.xlu0 %v1618_v62, %s8643_s25  ;;  %v14238_v62 = vld [vmem:[#allocation14_spill] sm:$0xff] }
 0x33b   : > { %v4952_v55 = vcombine.low %v14238_v62, %v8890_v30  ;;  %v4953_v26 = vcombine.high %v14238_v62, %v8890_v30  ;;  %v10710_v30 = vrot.slane %v4985_v24, %v8776_v15  ;;  %v14247_v24 = vld [vmem:[#allocation16_spill] sm:$0xff] }
 0x33c   : > { %v10650_v22 = vpop.permute.xlu1 %3655  ;;  %v10659_v45 = vpop.permute.xlu0 %3665 }
 0x33d   : > { %14236 = vst [vmem:[#allocation212_spill] sm:$0xff] %v10650_v22  ;;  %14237 = vst [vmem:[#allocation213_spill] sm:$0xff] %v10659_v45  ;;  %v14240_v22 = vld [vmem:[#allocation12_spill] sm:$0xff]  ;;  %v1520_v45 = vcombine.high %v10533_v23, %v14052_v14  ;;  %v10694_v23 = vrot.slane %v4952_v55, %v8776_v15  ;;  %v5032_v55 = vcombine.low %v10677_v4, %v10682_v39 }
 0x33e   : > { %3867 = vrot.lane.b32.xlu1 %v10653_v53, %s8642_s24  ;;  %3909 = vrot.lane.b32.xlu0 %v1814_v31, %s8643_s25  ;;  %v4936_v54 = vcombine.low %v14240_v22, %v14239_v60  ;;  %v4937_v38 = vcombine.high %v14240_v22, %v14239_v60  ;;  %v1716_v22 = vcombine.high %v10551_v25, %v14052_v14  ;;  %v14248_v60 = vld [vmem:[#allocation15_spill] sm:$0xff] }
 0x33f   : > { %v10722_v62 = vrot.slane %v4953_v26, %v8776_v15  ;;  %v1912_v26 = vcombine.high %v10569_v10, %v14052_v14  ;;  %v10740_v51 = vrot.slane %v5032_v55, %v8780_v21  ;;  %v5049_v61 = vcombine.high %v10701_v18, %v10710_v30 }
 0x340   : > { %v10672_v48 = vpop.permute.xlu1 %3659  ;;  %v10684_v31 = vpop.permute.xlu0 %3669  ;;  %v10698_v49 = vrot.slane %v4936_v54, %v8776_v15 }
 0x341   : > { %14241 = vst [vmem:[#allocation14_spill] sm:$0xff] %v10672_v48  ;;  %14242 = vst [vmem:[#allocation10_spill] sm:$0xff] %v10684_v31  ;;  %v10730_v31 = vrot.slane %v4937_v38, %v8776_v15  ;;  %v14250_v48 = vld [vmem:[#allocation13_spill] sm:$0xff] }
 0x342   : > { %3903 = vrot.lane.b32.xlu1 %v1520_v45, %s8643_s25  ;;  %3913 = vrot.lane.b32.xlu0 %v2010_v33, %s8643_s25  ;;  %v5240_v45 = vcombine.low %v14243_v52, %v9238_v40  ;;  %v14245_v33 = vld [vmem:[#allocation34_spill] sm:$0xff]  ;;  %v5000_v25 = vcombine.low %v10698_v49, %v10694_v23 }
 0x343   : > { %v5256_v54 = vcombine.low %v14245_v33, %v9241_v3  ;;  %v5017_v10 = vcombine.high %v10730_v31, %v10722_v62 }
 0x344   : > { %v10705_v13 = vpop.permute.xlu1 %3663  ;;  %v10716_v44 = vpop.permute.xlu0 %3673  ;;  %v5248_v42 = vrot.slane %v5240_v45, %v8776_v15  ;;  %v5008_v45 = vrot.slane %v5000_v25, %v8780_v21  ;;  %v2108_v25 = vcombine.high %v10587_v36, %v14052_v14 }
 0x345   : > { %14244 = vst [vmem:[#allocation12_spill] sm:$0xff] %v10705_v13  ;;  %14246 = vst [vmem:[#allocation33_spill] sm:$0xff] %v10716_v44  ;;  %v5224_v13 = vcombine.low %v14248_v60, %v14247_v24  ;;  %v14249_v44 = vld [vmem:[#allocation11_spill] sm:$0xff] }
 0x346   : > { %3907 = vrot.lane.b32.xlu1 %v1716_v22, %s8643_s25  ;;  %3917 = vrot.lane.b32.xlu0 %v2206_v57, %s8643_s25  ;;  %v5208_v5 = vcombine.low %v14250_v48, %v14249_v44  ;;  %v5264_v57 = vrot.slane %v5256_v54, %v8776_v15  ;;  %v5241_v54 = vcombine.high %v14243_v52, %v9238_v40 }
 0x347   : > { %v5232_v55 = vrot.slane %v5224_v13, %v8776_v15  ;;  %v5209_v40 = vcombine.high %v14250_v48, %v14249_v44  ;;  %v5033_v52 = vcombine.high %v10677_v4, %v10682_v39  ;;  %v2304_v44 = vcombine.high %v10605_v27, %v14052_v14 }
 0x348   : > { %v10735_v22 = vpop.permute.xlu1 %3667  ;;  %v10745_v38 = vpop.permute.xlu0 %3677  ;;  %v5304_v63 = vcombine.low %v5248_v42, %v5264_v57  ;;  %v2794_v39 = vcombine.high %v10612_v20, %v14052_v14  ;;  %v5001_v27 = vcombine.high %v10698_v49, %v10694_v23  ;;  %v2500_v23 = vcombine.high %v10623_v12, %v14052_v14 }
 0x349   : > { %14251 = vst [vmem:[#allocation34_spill] sm:$0xff] %v10735_v22  ;;  %14252 = vst [vmem:[#allocation16_spill] sm:$0xff] %v10745_v38  ;;  %v5216_v22 = vrot.slane %v5208_v5, %v8776_v15  ;;  %v5257_v38 = vcombine.high %v14245_v33, %v9241_v3  ;;  %v5065_v5 = vcombine.high %v5008_v45, %v10740_v51 }
 0x34a   : > { %3911 = vrot.lane.b32.xlu1 %v1912_v26, %s8643_s25  ;;  %3921 = vrot.lane.b32.xlu0 %v2402_v6, %s8643_s25  ;;  %v10765_v26 = vrot.slane %v5049_v61, %v8780_v21  ;;  %v2598_v6 = vcombine.high %v10594_v41, %v14052_v14  ;;  %v10776_v3 = vrot.slane %v5017_v10, %v8780_v21 }
 0x34b   : > { %v5225_v61 = vcombine.high %v14248_v60, %v14247_v24  ;;  %v5272_v36 = vcombine.low %v5216_v22, %v5232_v55  ;;  %v5255_v41 = vrot.slane %v5241_v54, %v8776_v15  ;;  %v5271_v33 = vrot.slane %v5257_v38, %v8776_v15 }
 0x34c   : > { %v10760_v7 = vpop.permute.xlu1 %3671  ;;  %14254 = vst [vmem:[#allocation11_spill] sm:$0xff] %v10765_v26  ;;  %v10767_v13 = vpop.permute.xlu0 %3713  ;;  %v10790_v10 = vrot.slane %v5304_v63, %v8780_v21  ;;  %v10797_v4 = vrot.slane %v5065_v5, %v8776_v15  ;;  %v10801_v60 = vcombine.low %v10776_v3, %v10765_v26  ;;  %v10812_v20 = vrot.slane %v5033_v52, %v8780_v21 }
 0x34d   : > { %14253 = vst [vmem:[#allocation15_spill] sm:$0xff] %v10760_v7  ;;  %14255 = vst [vmem:[#allocation13_spill] sm:$0xff] %v10767_v13  ;;  %v5305_v7 = vcombine.high %v5248_v42, %v5264_v57  ;;  %v5223_v42 = vrot.slane %v5209_v40, %v8776_v15  ;;  %v5239_v63 = vrot.slane %v5225_v61, %v8776_v15 }
 0x34e   : > { %3915 = vrot.lane.b32.xlu1 %v2108_v25, %s8643_s25  ;;  %3925 = vrot.lane.b32.xlu0 %v2598_v6, %s8643_s25  ;;  %14257 = vst [vmem:[#allocation215_spill] sm:$0xff] %v10790_v10  ;;  %v5273_v57 = vcombine.high %v5216_v22, %v5232_v55  ;;  %v10809_v38 = vrot.slane %v5272_v36, %v8780_v21 }
 0x34f   : > { %v10816_v54 = vrot.slane %v5305_v7, %v8780_v21  ;;  %v5320_v25 = vcombine.low %v5255_v41, %v5271_v33  ;;  %v10823_v49 = vcombine.low %v5008_v45, %v10740_v51  ;;  %v2990_v55 = vcombine.high %v10630_v1, %v14052_v14 }
 0x350   : > { %v10785_v48 = vpop.permute.xlu1 %3675  ;;  %v10792_v24 = vpop.permute.xlu0 %3717  ;;  %v10831_v5 = vrot.slane %v10797_v4, %v8780_v21  ;;  %v10835_v7 = vrot.slane %v10801_v60, %v8776_v15  ;;  %v10839_v40 = vcombine.low %v10809_v38, %v10790_v10  ;;  %v5015_v12 = vrot.slane %v5001_v27, %v8780_v21 }
 0x351   : > { %14256 = vst [vmem:[#allocation214_spill] sm:$0xff] %v10785_v48  ;;  %14258 = vst [vmem:[#allocation216_spill] sm:$0xff] %v10792_v24  ;;  %v10844_v45 = vrot.slane %v5273_v57, %v8780_v21  ;;  %v5288_v1 = vcombine.low %v5223_v42, %v5239_v63  ;;  %v5048_v61 = vcombine.low %v10701_v18, %v10710_v30 }
 0x352   : > { %3919 = vrot.lane.b32.xlu1 %v2304_v44, %s8643_s25  ;;  %3929 = vrot.lane.b32.xlu0 %v2794_v39, %s8643_s25  ;;  %14259 = vst [vmem:[#allocation217_spill] sm:$0xff] %v10816_v54  ;;  %14262 = vst [vmem:[#allocation220_spill] sm:$0xff] %v10831_v5  ;;  %v5321_v36 = vcombine.high %v5255_v41, %v5271_v33  ;;  %v10850_v52 = vrot.slane %v5320_v25, %v8780_v21 }
 0x353   : > { %v2696_v39 = vcombine.high %v10639_v58, %v14052_v14  ;;  %v10858_v27 = vrot.slane %v10823_v49, %v8776_v15  ;;  %v10861_v57 = vcombine.low %v5015_v12, %v10812_v20  ;;  %v5623_v18 = vcombine.high %v10831_v5, %v14052_v14 }
 0x354   : > { %v10818_v6 = vpop.permute.xlu1 %3711  ;;  %v10825_v22 = vpop.permute.xlu0 %3721  ;;  %14263 = vst [vmem:[#allocation221_spill] sm:$0xff] %v10850_v52  ;;  %v10869_v30 = vrot.slane %v10835_v7, %v8780_v21  ;;  %v10873_v41 = vrot.slane %v10839_v40, %v8776_v15  ;;  %v10877_v58 = vcombine.low %v10844_v45, %v10816_v54  ;;  %v5016_v33 = vcombine.low %v10730_v31, %v10722_v62 }
 0x355   : > { %14260 = vst [vmem:[#allocation218_spill] sm:$0xff] %v10818_v6  ;;  %14261 = vst [vmem:[#allocation219_spill] sm:$0xff] %v10825_v22  ;;  %v5289_v25 = vcombine.high %v5223_v42, %v5239_v63  ;;  %v10886_v5 = vrot.slane %v5048_v61, %v8780_v21  ;;  %v10889_v48 = vrot.slane %v5321_v36, %v8780_v21 }
 0x356   : > { %3923 = vrot.lane.b32.xlu1 %v2500_v23, %s8643_s25  ;;  %3933 = vrot.lane.b32.xlu0 %v2990_v55, %s8643_s25  ;;  %14266 = vst [vmem:[#allocation224_spill] sm:$0xff] %v10869_v30  ;;  %v10883_v55 = vrot.slane %v5288_v1, %v8780_v21  ;;  %v10898_v31 = vrot.slane %v10858_v27, %v8780_v21 }
 0x357   : > { %14267 = vst [vmem:[#allocation225_spill] sm:$0xff] %v10889_v48  ;;  %v5683_v62 = vrot.slane %v10861_v57, %v8776_v15  ;;  %v5067_v42 = vcombine.high %v5015_v12, %v10812_v20  ;;  %v6113_v1 = vcombine.high %v10869_v30, %v14052_v14  ;;  %v10909_v61 = vrot.slane %v10873_v41, %v8780_v21 }
 0x358   : > { %v10852_v44 = vpop.permute.xlu1 %3715  ;;  %v10863_v23 = vpop.permute.xlu0 %3725  ;;  %14269 = vst [vmem:[#allocation227_spill] sm:$0xff] %v10898_v31  ;;  %v10917_v36 = vcombine.low %v10883_v55, %v10850_v52  ;;  %v10922_v12 = vrot.slane %v5289_v25, %v8780_v21  ;;  %v5525_v30 = vcombine.high %v10898_v31, %v14052_v14  ;;  %v5071_v50 = vcombine.high %v10776_v3, %v10765_v26 }
 0x359   : > { %14264 = vst [vmem:[#allocation222_spill] sm:$0xff] %v10852_v44  ;;  %14265 = vst [vmem:[#allocation223_spill] sm:$0xff] %v10863_v23  ;;  %v2892_v44 = vcombine.high %v10653_v53, %v14052_v14  ;;  %v10913_v53 = vrot.slane %v10877_v58, %v8776_v15  ;;  %v6309_v25 = vcombine.high %v10909_v61, %v14052_v14 }
 0x35a   : > { %3927 = vrot.lane.b32.xlu1 %v2696_v39, %s8643_s25  ;;  %7066 = vrot.lane.b32.xlu0 %v5623_v18, %s8629_s18  ;;  %14271 = vst [vmem:[#allocation229_spill] sm:$0xff] %v10909_v61  ;;  %v5024_v39 = vrot.slane %v5016_v33, %v8780_v21  ;;  %v10948_v31 = vrot.slane %v10917_v36, %v8776_v15 }
 0x35b   : > { %v11012_v26 = vrot.slane %v5071_v50, %v8776_v15 }
 0x35c   : > { %v10892_v23 = vpop.permute.xlu1 %3719  ;;  %v10903_v63 = vpop.permute.xlu0 %3729  ;;  %v10936_v33 = vcombine.low %v5024_v39, %v10886_v5  ;;  %v5069_v6 = vcombine.high %v5024_v39, %v10886_v5 }
 0x35d   : > { %14268 = vst [vmem:[#allocation226_spill] sm:$0xff] %v10892_v23  ;;  %14270 = vst [vmem:[#allocation228_spill] sm:$0xff] %v10903_v63  ;;  %v10930_v63 = vrot.slane %v5683_v62, %v8780_v21  ;;  %v10933_v23 = vrot.slane %v5067_v42, %v8776_v15  ;;  %v10952_v42 = vcombine.low %v10922_v12, %v10889_v48 }
 0x35e   : > { %3931 = vrot.lane.b32.xlu1 %v2892_v44, %s8643_s25  ;;  %7076 = vrot.lane.b32.xlu0 %v6113_v1, %s8629_s18  ;;  %v10944_v1 = vrot.slane %v10913_v53, %v8780_v21  ;;  %v5879_v22 = vrot.slane %v10936_v33, %v8776_v15 }
 0x35f   : > { %14273 = vst [vmem:[#allocation231_spill] sm:$0xff] %v10930_v63  ;;  %v5721_v61 = vcombine.high %v10930_v63, %v14052_v14  ;;  %v10977_v63 = vrot.slane %v10952_v42, %v8776_v15 }
 0x360   : > { %v10925_v18 = vpop.permute.xlu1 %3723  ;;  %v10938_v44 = vpop.permute.xlu0 %3733  ;;  %14275 = vst [vmem:[#allocation233_spill] sm:$0xff] %v10944_v1 }
 0x361   : > { %14272 = vst [vmem:[#allocation230_spill] sm:$0xff] %v10925_v18  ;;  %14274 = vst [vmem:[#allocation232_spill] sm:$0xff] %v10938_v44  ;;  %v10962_v18 = vrot.slane %v10933_v23, %v8780_v21 }
 0x362   : > { %7064 = vrot.lane.b32.xlu1 %v5525_v30, %s8629_s18  ;;  %7080 = vrot.lane.b32.xlu0 %v6309_v25, %s8629_s18  ;;  %v6505_v30 = vcombine.high %v10944_v1, %v14052_v14  ;;  %v10973_v25 = vrot.slane %v10948_v31, %v8780_v21  ;;  %v10989_v1 = vrot.slane %v5069_v6, %v8776_v15 }
 0x363   : > { %14277 = vst [vmem:[#allocation235_spill] sm:$0xff] %v10962_v18  ;;  %v5819_v39 = vcombine.high %v10962_v18, %v14052_v14 }
 0x364   : > { %v10956_v44 = vpop.permute.xlu1 %3727  ;;  %v10967_v24 = vpop.permute.xlu0 %3737  ;;  %14279 = vst [vmem:[#allocation237_spill] sm:$0xff] %v10973_v25  ;;  %v11009_v3 = vrot.slane %v10989_v1, %v8780_v21 }
 0x365   : > { %14276 = vst [vmem:[#allocation234_spill] sm:$0xff] %v10956_v44  ;;  %14278 = vst [vmem:[#allocation236_spill] sm:$0xff] %v10967_v24  ;;  %v10986_v24 = vrot.slane %v5879_v22, %v8780_v21 }
 0x366   : > { %7068 = vrot.lane.b32.xlu1 %v5721_v61, %s8629_s18  ;;  %7084 = vrot.lane.b32.xlu0 %v6505_v30, %s8629_s18  ;;  %v6701_v61 = vcombine.high %v10973_v25, %v14052_v14  ;;  %v10999_v30 = vrot.slane %v10977_v63, %v8780_v21  ;;  %14285 = vst [vmem:[#allocation243_spill] sm:$0xff] %v11009_v3 }
 0x367   : > { %14281 = vst [vmem:[#allocation239_spill] sm:$0xff] %v10986_v24  ;;  %v5917_v6 = vcombine.high %v10986_v24, %v14052_v14  ;;  %v5337_v25 = vcombine.high %v10809_v38, %v10790_v10  ;;  %v6015_v50 = vcombine.high %v11009_v3, %v14052_v14  ;;  %v11030_v38 = vrot.slane %v11012_v26, %v8780_v21 }
 0x368   : > { %v10981_v44 = vpop.permute.xlu1 %3731  ;;  %v10993_v13 = vpop.permute.xlu0 %3741  ;;  %14283 = vst [vmem:[#allocation241_spill] sm:$0xff] %v10999_v30 }
 0x369   : > { %14280 = vst [vmem:[#allocation238_spill] sm:$0xff] %v10981_v44  ;;  %14282 = vst [vmem:[#allocation240_spill] sm:$0xff] %v10993_v13  ;;  %v11033_v10 = vrot.slane %v5337_v25, %v8776_v15  ;;  %v6211_v25 = vcombine.high %v11030_v38, %v14052_v14  ;;  %v14300_v44 = vld [vmem:[#allocation18_spill] sm:$0xff] }
 0x36a   : > { %7070 = vrot.lane.b32.xlu1 %v5819_v39, %s8629_s18  ;;  %7088 = vrot.lane.b32.xlu0 %v6701_v61, %s8629_s18  ;;  %v6897_v39 = vcombine.high %v10999_v30, %v14052_v14  ;;  %v5495_v61 = vcombine.high %v10858_v27, %v14052_v14  ;;  %14288 = vst [vmem:[#allocation246_spill] sm:$0xff] %v11030_v38 }
 0x36b   : > { %v5339_v30 = vcombine.high %v10844_v45, %v10816_v54  ;;  %v11052_v45 = vrot.slane %v11033_v10, %v8780_v21 }
 0x36c   : > { %v11003_v18 = vpop.permute.xlu1 %3735  ;;  %v11016_v13 = vpop.permute.xlu0 %3777 }
 0x36d   : > { %14284 = vst [vmem:[#allocation242_spill] sm:$0xff] %v11003_v18  ;;  %14286 = vst [vmem:[#allocation244_spill] sm:$0xff] %v11016_v13  ;;  %v11055_v54 = vrot.slane %v5339_v30, %v8776_v15  ;;  %v6407_v30 = vcombine.high %v11052_v45, %v14052_v14  ;;  %v6083_v18 = vcombine.high %v10835_v7, %v14052_v14  ;;  %v14298_v7 = vld [vmem:[#allocation17_spill] sm:$0xff]  ;;  %v14305_v13 = vld [vmem:[#allocation20_spill] sm:$0xff] }
 0x36e   : > { %7072 = vrot.lane.b32.xlu1 %v5917_v6, %s8629_s18  ;;  %7092 = vrot.lane.b32.xlu0 %v6897_v39, %s8629_s18  ;;  %v11040_v6 = vrot.slane %v5495_v61, %v8780_v21  ;;  %v5691_v39 = vcombine.high %v5683_v62, %v14052_v14  ;;  %14291 = vst [vmem:[#allocation249_spill] sm:$0xff] %v11052_v45 }
 0x36f   : > { %v5341_v62 = vcombine.high %v10883_v55, %v10850_v52  ;;  %v11074_v55 = vrot.slane %v11055_v54, %v8780_v21 }
 0x370   : > { %v11024_v24 = vpop.permute.xlu1 %3739  ;;  %v11037_v27 = vpop.permute.xlu0 %3781 }
 0x371   : > { %14287 = vst [vmem:[#allocation245_spill] sm:$0xff] %v11024_v24  ;;  %14289 = vst [vmem:[#allocation247_spill] sm:$0xff] %v11037_v27  ;;  %v5887_v24 = vcombine.high %v5879_v22, %v14052_v14  ;;  %v11077_v52 = vrot.slane %v5341_v62, %v8776_v15  ;;  %v5343_v22 = vcombine.high %v10922_v12, %v10889_v48  ;;  %v14299_v48 = vld [vmem:[#allocation51_spill] sm:$0xff]  ;;  %v14304_v27 = vld [vmem:[#allocation53_spill] sm:$0xff] }
 0x372   : > { %7074 = vrot.lane.b32.xlu1 %v6015_v50, %s8629_s18  ;;  %7128 = vrot.lane.b32.xlu0 %v11040_v6, %s8630_s27  ;;  %v11062_v50 = vrot.slane %v5691_v39, %v8780_v21  ;;  %14294 = vst [vmem:[#allocation252_spill] sm:$0xff] %v11074_v55  ;;  %v6603_v12 = vcombine.high %v11074_v55, %v14052_v14 }
 0x373   : > { %v11097_v45 = vrot.slane %v11077_v52, %v8780_v21  ;;  %v6279_v55 = vcombine.high %v10873_v41, %v14052_v14  ;;  %v14310_v41 = vld [vmem:[#allocation56_spill] sm:$0xff] }
 0x374   : > { %v11046_v3 = vpop.permute.xlu1 %3775  ;;  %v11059_v61 = vpop.permute.xlu0 %3785  ;;  %v3956_v56 = vsel %vm3951_vm0, %v14311_v43, %v14310_v41  ;;  %v14320_v43 = vld [vmem:[#allocation61_spill] sm:$0xff]  ;;  %v14321_v41 = vld [vmem:[#allocation27_spill] sm:$0xff] }
 0x375   : > { %14290 = vst [vmem:[#allocation248_spill] sm:$0xff] %v11046_v3  ;;  %14292 = vst [vmem:[#allocation250_spill] sm:$0xff] %v11059_v61  ;;  %v14302_v61 = vld [vmem:[#allocation52_spill] sm:$0xff]  ;;  %v14303_v3 = vld [vmem:[#allocation19_spill] sm:$0xff]  ;;  %v3965_v59 = vsel %vm3951_vm0, %v14321_v41, %v14320_v43  ;;  %v6293_v43 = vrot.slane %v6279_v55, %v8780_v21  ;;  %v6475_v41 = vcombine.high %v10913_v53, %v14052_v14 }
 0x376   : > { %7078 = vrot.lane.b32.xlu1 %v6211_v25, %s8629_s18  ;;  %7132 = vrot.lane.b32.xlu0 %v11062_v50, %s8630_s27  ;;  %v11084_v25 = vrot.slane %v5887_v24, %v8780_v21  ;;  %14297 = vst [vmem:[#allocation255_spill] sm:$0xff] %v11097_v45  ;;  %v11100_v24 = vrot.slane %v5343_v22, %v8776_v15  ;;  %v14336_v53 = vld [vmem:[#allocation69_spill] sm:$0xff] }
 0x377   : > { %v3954_v22 = vsel %vm3951_vm0, %v14303_v3, %v14302_v61  ;;  %v14312_v3 = vld [vmem:[#allocation57_spill] sm:$0xff]  ;;  %v14313_v61 = vld [vmem:[#allocation24_spill] sm:$0xff] }
 0x378   : > { %v11068_v38 = vpop.permute.xlu1 %3779  ;;  %v11081_v39 = vpop.permute.xlu0 %3789  ;;  %v3961_v0 = vsel %vm3951_vm0, %v14313_v61, %v14312_v3  ;;  %v6799_v61 = vcombine.high %v11097_v45, %v14052_v14  ;;  %v14329_v45 = vld [vmem:[#allocation64_spill] sm:$0xff] }
 0x379   : > { %14293 = vst [vmem:[#allocation251_spill] sm:$0xff] %v11068_v38  ;;  %14295 = vst [vmem:[#allocation253_spill] sm:$0xff] %v11081_v39  ;;  %v3952_v39 = vsel %vm3951_vm0, %v14300_v44, %v14299_v48  ;;  %v14308_v44 = vld [vmem:[#allocation55_spill] sm:$0xff] }
 0x37a   : > { %7082 = vrot.lane.b32.xlu1 %v6407_v30, %s8629_s18  ;;  %7136 = vrot.lane.b32.xlu0 %v11084_v25, %s8630_s27  ;;  %v3953_v30 = vsel %vm3951_vm0, %v14298_v7, %v9406_v2  ;;  %v3957_v2 = vsel %vm3951_vm0, %v14305_v13, %v14304_v27  ;;  %v14306_v7 = vld [vmem:[#allocation54_spill] sm:$0xff]  ;;  %v14315_v27 = vld [vmem:[#allocation25_spill] sm:$0xff] }
 0x37b   : > { %v3955_v48 = vsel %vm3951_vm0, %v14307_v32, %v14306_v7  ;;  %v14314_v13 = vld [vmem:[#allocation58_spill] sm:$0xff]  ;;  %v14316_v32 = vld [vmem:[#allocation59_spill] sm:$0xff]  ;;  %v3970_v37 = vsel %vm3968_vm1, %v3953_v30, %v14331_v46 }
 0x37c   : > { %v11091_v62 = vpop.permute.xlu1 %3783  ;;  %v11108_v38 = vpop.permute.xlu0 %3793  ;;  %v3958_v19 = vsel %vm3951_vm0, %v14315_v27, %v14314_v13  ;;  %v14317_v7 = vld [vmem:[#allocation26_spill] sm:$0xff]  ;;  %v11154_v13 = vrot.slane %v11100_v24, %v8780_v21  ;;  %v14338_v46 = vld [vmem:[#allocation71_spill] sm:$0xff] }
 0x37d   : > { %14296 = vst [vmem:[#allocation254_spill] sm:$0xff] %v11091_v62  ;;  %14301 = vst [vmem:[#allocation17_spill] sm:$0xff] %v11108_v38  ;;  %v11111_v62 = vrot.slane %v6083_v18, %v8780_v21  ;;  %v14309_v38 = vld [vmem:[#allocation22_spill] sm:$0xff]  ;;  %v3963_v11 = vsel %vm3951_vm0, %v14317_v7, %v14316_v32  ;;  %v14325_v32 = vld [vmem:[#allocation29_spill] sm:$0xff] }
 0x37e   : > { %v3959_v18 = vsel %vm3951_vm0, %v14309_v38, %v14308_v44  ;;  %7086 = vrot.lane.b32.xlu1 %v6603_v12, %s8629_s18  ;;  %v14318_v38 = vld [vmem:[#allocation60_spill] sm:$0xff]  ;;  %14323 = vst [vmem:[#allocation18_spill] sm:$0xff] %v11154_v13  ;;  %v14324_v27 = vld [vmem:[#allocation62_spill] sm:$0xff] }
 0x37f   : > { %7140 = vrot.lane.b32.xlu0 %v11111_v62, %s8630_s27  ;;  %v14319_v12 = vld [vmem:[#allocation28_spill] sm:$0xff]  ;;  %v3962_v7 = vsel %vm3951_vm0, %v14325_v32, %v14324_v27  ;;  %v11190_v30 = vsel %vm3968_vm1, %v3959_v18, %v14338_v46  ;;  %v14344_v46 = vld [vmem:[#allocation75_spill] sm:$0xff] }
 0x380   : > { %v3960_v44 = vsel %vm3951_vm0, %v14319_v12, %v14318_v38  ;;  %v11148_v3 = vpop.permute.xlu1 %3787  ;;  %v3967_v38 = vsel %vm3951_vm0, %v14327_v8, %v14326_v47  ;;  %v11162_v12 = vpop.permute.xlu0 %3797  ;;  %v14333_v27 = vld [vmem:[#allocation32_spill] sm:$0xff]  ;;  %v3972_v8 = vsel %vm3968_vm1, %v3955_v48, %v14334_v17  ;;  %v14340_v48 = vld [vmem:[#allocation73_spill] sm:$0xff] }
 0x381   : > { %14322 = vst [vmem:[#allocation51_spill] sm:$0xff] %v11148_v3  ;;  %14328 = vst [vmem:[#allocation52_spill] sm:$0xff] %v11162_v12  ;;  %v14330_v3 = vld [vmem:[#allocation31_spill] sm:$0xff]  ;;  %v3966_v32 = vsel %vm3951_vm0, %v14333_v27, %v14332_v34  ;;  %v14335_v47 = vld [vmem:[#allocation68_spill] sm:$0xff]  ;;  %v11182_v12 = vsel %vm3968_vm1, %v3957_v2, %v14336_v53  ;;  %v6489_v27 = vrot.slane %v6475_v41, %v8780_v21 }
 0x382   : > { %v3964_v9 = vsel %vm3951_vm0, %v14330_v3, %v14329_v45  ;;  %7090 = vrot.lane.b32.xlu1 %v6799_v61, %s8629_s18  ;;  %v3969_v55 = vsel %vm3968_vm1, %v3952_v39, %v14335_v47  ;;  %v14337_v45 = vld [vmem:[#allocation70_spill] sm:$0xff]  ;;  %v14339_v17 = vld [vmem:[#allocation72_spill] sm:$0xff]  ;;  %v11199_v39 = vsel %vm3968_vm1, %v3961_v0, %v14340_v48  ;;  %v5593_v61 = vcombine.high %v10797_v4, %v14052_v14 }
 0x383   : > { %v11186_v3 = vsel %vm3968_vm1, %v3954_v22, %v14337_v45  ;;  %7144 = vrot.lane.b32.xlu0 %v6293_v43, %s8630_s27  ;;  %v11195_v34 = vsel %vm3968_vm1, %v3956_v56, %v14339_v17  ;;  %v6995_v22 = vcombine.high %v11154_v13, %v14052_v14  ;;  %v6671_v56 = vcombine.high %v10948_v31, %v14052_v14  ;;  %v14343_v53 = vld [vmem:[#allocation74_spill] sm:$0xff]  ;;  %v14345_v17 = vld [vmem:[#allocation76_spill] sm:$0xff]  ;;  %v14346_v31 = vld [vmem:[#allocation77_spill] sm:$0xff] }
 0x384   : > { %v11201_v2 = vpop.permute.xlu1 %3791  ;;  %v11207_v18 = vpop.permute.xlu0 %3801  ;;  %v5789_v47 = vcombine.high %v10933_v23, %v14052_v14  ;;  %v6867_v0 = vcombine.high %v10977_v63, %v14052_v14  ;;  %v11218_v45 = vsel %vm3968_vm1, %v3958_v19, %v14343_v53  ;;  %v11222_v4 = vsel %vm3968_vm1, %v3963_v11, %v14344_v46  ;;  %v14347_v48 = vld [vmem:[#allocation78_spill] sm:$0xff]  ;;  %v14348_v53 = vld [vmem:[#allocation79_spill] sm:$0xff] }
 0x385   : > { %14341 = vst [vmem:[#allocation19_spill] sm:$0xff] %v11201_v2  ;;  %14342 = vst [vmem:[#allocation53_spill] sm:$0xff] %v11207_v18  ;;  %v11226_v41 = vsel %vm3968_vm1, %v3960_v44, %v14345_v17  ;;  %v5985_v23 = vcombine.high %v10989_v1, %v14052_v14  ;;  %v11233_v63 = vsel %vm3968_vm1, %v3965_v59, %v14346_v31  ;;  %v14351_v17 = vld [vmem:[#allocation81_spill] sm:$0xff] }
 0x386   : > { %7094 = vrot.lane.b32.xlu1 %v6995_v22, %s8629_s18  ;;  %v11237_v19 = vsel %vm3968_vm1, %v3962_v7, %v14347_v48  ;;  %v11241_v11 = vsel %vm3968_vm1, %v3967_v38, %v14348_v53  ;;  %v6181_v44 = vcombine.high %v11012_v26, %v14052_v14  ;;  %v14349_v22 = vld [vmem:[#allocation80_spill] sm:$0xff]  ;;  %v5607_v59 = vrot.slane %v5593_v61, %v8780_v21 }
 0x387   : > { %7148 = vrot.lane.b32.xlu0 %v6489_v27, %s8630_s27  ;;  %v11248_v1 = vsel %vm3968_vm1, %v3964_v9, %v14349_v22  ;;  %v6377_v7 = vcombine.high %v11033_v10, %v14052_v14  ;;  %v6573_v38 = vcombine.high %v11055_v54, %v14052_v14  ;;  %v11259_v31 = vsel %vm3985_vm2, %v3970_v37, %v14351_v17  ;;  %v14353_v22 = vld [vmem:[#allocation82_spill] sm:$0xff] }
 0x388   : > { %v11250_v46 = vpop.permute.xlu1 %3795  ;;  %v11261_v48 = vpop.permute.xlu0 %3805  ;;  %v6685_v26 = vrot.slane %v6671_v56, %v8780_v21  ;;  %v5803_v9 = vrot.slane %v5789_v47, %v8780_v21  ;;  %v6881_v53 = vrot.slane %v6867_v0, %v8780_v21  ;;  %v11268_v61 = vsel %vm3968_vm1, %v3966_v32, %v14353_v22  ;;  %v14354_v56 = vld [vmem:[#allocation83_spill] sm:$0xff] }
 0x389   : > { %14350 = vst [vmem:[#allocation20_spill] sm:$0xff] %v11250_v46  ;;  %14352 = vst [vmem:[#allocation54_spill] sm:$0xff] %v11261_v48  ;;  %v5999_v10 = vrot.slane %v5985_v23, %v8780_v21  ;;  %v5526_v37 = vcombine.high %v11040_v6, %v14052_v14  ;;  %v11276_v54 = vcombine.high %v11062_v50, %v14052_v14  ;;  %v14366_v48 = vld [vmem:[#allocation86_spill] sm:$0xff]  ;;  %v14367_v46 = vld [vmem:[#allocation87_spill] sm:$0xff] }
 0x38a   : > { %7130 = vrot.lane.b32.xlu1 %v5607_v59, %s8630_s27  ;;  %v11280_v47 = vsel %vm3985_vm2, %v3972_v8, %v14354_v56  ;;  %v6195_v32 = vrot.slane %v6181_v44, %v8780_v21  ;;  %v11286_v0 = vcombine.high %v11084_v25, %v14052_v14  ;;  %v6769_v23 = vcombine.high %v11077_v52, %v14052_v14  ;;  %v14356_v56 = vld [vmem:[#allocation84_spill] sm:$0xff] }
 0x38b   : > { %7152 = vrot.lane.b32.xlu0 %v6685_v26, %s8630_s27  ;;  %v11293_v50 = vrot.slane %v6377_v7, %v8780_v21  ;;  %v11296_v17 = vrot.slane %v6573_v38, %v8780_v21  ;;  %v11300_v8 = vcombine.high %v11111_v62, %v14052_v14  ;;  %v6965_v44 = vcombine.high %v11100_v24, %v14052_v14 }
 0x38c   : > { %v11290_v6 = vpop.permute.xlu1 %3799  ;;  %v11304_v25 = vpop.permute.xlu0 %3841  ;;  %v11307_v22 = vcombine.high %v6293_v43, %v14052_v14  ;;  %v11310_v52 = vcombine.high %v6489_v27, %v14052_v14  ;;  %v11313_v7 = vcombine.high %v5607_v59, %v14052_v14  ;;  %v11316_v38 = vcombine.high %v6685_v26, %v14052_v14 }
 0x38d   : > { %14355 = vst [vmem:[#allocation21_spill] sm:$0xff] %v11290_v6  ;;  %v5480_v62 = vcombine.high %v10823_v49, %v14052_v14  ;;  %v5676_v24 = vcombine.high %v10861_v57, %v14052_v14  ;;  %v5872_v43 = vcombine.high %v10936_v33, %v14052_v14  ;;  %v6068_v27 = vcombine.high %v10801_v60, %v14052_v14 }
 0x38e   : > { %7134 = vrot.lane.b32.xlu1 %v5803_v9, %s8630_s27  ;;  %v11329_v59 = vsel %vm3985_vm2, %v3969_v55, %v14356_v56  ;;  %v11333_v26 = vrot.slane %v6769_v23, %v8780_v21  ;;  %v11336_v49 = vcombine.high %v5803_v9, %v14052_v14  ;;  %v6264_v57 = vcombine.high %v10839_v40, %v14052_v14  ;;  %v14358_v9 = vld [vmem:[#allocation85_spill] sm:$0xff] }
 0x38f   : > { %7156 = vrot.lane.b32.xlu0 %v6881_v53, %s8630_s27  ;;  %v11343_v60 = vrot.slane %v6965_v44, %v8780_v21  ;;  %v11346_v55 = vcombine.high %v6881_v53, %v14052_v14  ;;  %v6460_v56 = vcombine.high %v10877_v58, %v14052_v14  ;;  %v8403_v23 = vcombine.high %v10740_v51, %v14052_v14 }
 0x390   : > { %v11340_v33 = vpop.permute.xlu1 %3803  ;;  %v3991_v13 = vsel %vm3985_vm2, %v11182_v12, %v14358_v9  ;;  %v11355_v40 = vpop.permute.xlu0 %3845  ;;  %v11361_v44 = vcombine.high %v6195_v32, %v14052_v14  ;;  %v6656_v53 = vcombine.high %v10917_v36, %v14052_v14  ;;  %v11367_v58 = vrot.slane %v5480_v62, %v8776_v15 }
 0x391   : > { %14357 = vst [vmem:[#allocation55_spill] sm:$0xff] %v11340_v33  ;;  %v11358_v33 = vcombine.high %v5999_v10, %v14052_v14  ;;  %v11370_v51 = vrot.slane %v5676_v24, %v8776_v15  ;;  %v11373_v12 = vrot.slane %v5872_v43, %v8776_v15  ;;  %v11376_v9 = vrot.slane %v6068_v27, %v8776_v15 }
 0x392   : > { %7138 = vrot.lane.b32.xlu1 %v5999_v10, %s8630_s27  ;;  %14359 = vst [vmem:[#allocation22_spill] sm:$0xff] %v11367_v58  ;;  %v11381_v6 = vcombine.high %v11293_v50, %v14052_v14  ;;  %v11385_v36 = vcombine.high %v11296_v17, %v14052_v14  ;;  %v11388_v10 = vrot.slane %v6264_v57, %v8776_v15 }
 0x393   : > { %14360 = vst [vmem:[#allocation56_spill] sm:$0xff] %v11370_v51  ;;  %14361 = vst [vmem:[#allocation23_spill] sm:$0xff] %v11373_v12  ;;  %7192 = vrot.lane.b32.xlu0 %v5526_v37, %s8631_s29  ;;  %v8405_v62 = vcombine.high %v10812_v20, %v14052_v14  ;;  %v11396_v37 = vcombine.high %v11333_v26, %v14052_v14  ;;  %v11399_v43 = vrot.slane %v6460_v56, %v8776_v15 }
 0x394   : > { %14362 = vst [vmem:[#allocation57_spill] sm:$0xff] %v11376_v9  ;;  %14363 = vst [vmem:[#allocation24_spill] sm:$0xff] %v11388_v10  ;;  %v11392_v24 = vpop.permute.xlu1 %3839  ;;  %v11402_v27 = vrot.slane %v8403_v23, %v8776_v15  ;;  %v6852_v57 = vcombine.high %v10952_v42, %v14052_v14  ;;  %v3988_v20 = vsel %vm3985_vm2, %v11186_v3, %v14366_v48  ;;  %v11412_v2 = vpop.permute.xlu0 %3849  ;;  %v14369_v48 = vld [vmem:[#allocation88_spill] sm:$0xff] }
 0x395   : > { %14364 = vst [vmem:[#allocation58_spill] sm:$0xff] %v11399_v43  ;;  %v3993_v18 = vsel %vm3985_vm2, %v11190_v30, %v14367_v46  ;;  %v11416_v56 = vcombine.high %v11343_v60, %v14052_v14  ;;  %v11419_v23 = vrot.slane %v6656_v53, %v8776_v15  ;;  %v11424_v42 = vrot.slane %v11367_v58, %v8780_v21  ;;  %v14370_v53 = vld [vmem:[#allocation89_spill] sm:$0xff] }
 0x396   : > { %14365 = vst [vmem:[#allocation25_spill] sm:$0xff] %v11402_v27  ;;  %7142 = vrot.lane.b32.xlu1 %v6195_v32, %s8630_s27  ;;  %v11428_v3 = vrot.slane %v11370_v51, %v8780_v21  ;;  %v11432_v30 = vrot.slane %v11373_v12, %v8780_v21  ;;  %v11436_v46 = vrot.slane %v11376_v9, %v8780_v21 }
 0x397   : > { %14368 = vst [vmem:[#allocation59_spill] sm:$0xff] %v11419_v23  ;;  %v3990_v32 = vsel %vm3985_vm2, %v11195_v34, %v14369_v48  ;;  %v3995_v58 = vsel %vm3985_vm2, %v11199_v39, %v14370_v53  ;;  %7196 = vrot.lane.b32.xlu0 %v11276_v54, %s8631_s29  ;;  %v11448_v51 = vrot.slane %v11388_v10, %v8780_v21  ;;  %v14376_v10 = vld [vmem:[#allocation91_spill] sm:$0xff] }
 0x398   : > { %v11451_v12 = vrot.slane %v8405_v62, %v8776_v15  ;;  %v11453_v9 = vpop.permute.xlu1 %3843  ;;  %v11457_v34 = vrot.slane %v11399_v43, %v8780_v21  ;;  %v11461_v39 = vrot.slane %v11402_v27, %v8780_v21  ;;  %v11464_v54 = vrot.slane %v6852_v57, %v8776_v15  ;;  %v14375_v62 = vld [vmem:[#allocation90_spill] sm:$0xff]  ;;  %v14392_v15 = vld [vmem:[#allocation107_spill] sm:$0xff] }
 0x399   : > { %v11468_v48 = vcombine.high %v10886_v5, %v14052_v14  ;;  %v3992_v53 = vsel %vm3985_vm2, %v11218_v45, %v14375_v62  ;;  %v3997_v43 = vsel %vm3985_vm2, %v11222_v4, %v14376_v10  ;;  %v11483_v57 = vrot.slane %v11419_v23, %v8780_v21  ;;  %v14378_v5 = vld [vmem:[#allocation93_spill] sm:$0xff]  ;;  %v14379_v14 = vld [vmem:[#allocation94_spill] sm:$0xff]  ;;  %v14380_v62 = vld [vmem:[#allocation95_spill] sm:$0xff] }
 0x39a   : > { %14371 = vst [vmem:[#allocation26_spill] sm:$0xff] %v11451_v12  ;;  %14372 = vst [vmem:[#allocation60_spill] sm:$0xff] %v11461_v39  ;;  %v14377_v12 = vld [vmem:[#allocation92_spill] sm:$0xff]  ;;  %v11479_v39 = vpop.permute.xlu0 %3853  ;;  %v3996_v45 = vsel %vm3985_vm2, %v11237_v19, %v14379_v14  ;;  %v4001_v4 = vsel %vm3985_vm2, %v11241_v11, %v14380_v62  ;;  %7146 = vrot.lane.b32.xlu1 %v11293_v50, %s8630_s27  ;;  %v14384_v14 = vld [vmem:[#allocation99_spill] sm:$0xff] }
 0x39b   : > { %14373 = vst [vmem:[#allocation28_spill] sm:$0xff] %v11464_v54  ;;  %14374 = vst [vmem:[#allocation61_spill] sm:$0xff] %v11468_v48  ;;  %v3994_v27 = vsel %vm3985_vm2, %v11226_v41, %v14377_v12  ;;  %v3999_v54 = vsel %vm3985_vm2, %v11233_v63, %v14378_v5  ;;  %v14381_v10 = vld [vmem:[#allocation96_spill] sm:$0xff]  ;;  %v14382_v12 = vld [vmem:[#allocation97_spill] sm:$0xff]  ;;  %v4006_v19 = vsel %vm4002_vm3, %v11280_v47, %v14384_v14  ;;  %7200 = vrot.lane.b32.xlu0 %v11286_v0, %s8631_s29 }
 0x39c   : > { %v3998_v41 = vsel %vm3985_vm2, %v11248_v1, %v14381_v10  ;;  %v4004_v23 = vsel %vm4002_vm3, %v11259_v31, %v14382_v12  ;;  %v14383_v63 = vld [vmem:[#allocation98_spill] sm:$0xff]  ;;  %v14385_v11 = vld [vmem:[#allocation100_spill] sm:$0xff]  ;;  %v14386_v1 = vld [vmem:[#allocation101_spill] sm:$0xff]  ;;  %v11521_v14 = vpop.permute.xlu1 %3847 }
 0x39d   : > { %v4000_v5 = vsel %vm3985_vm2, %v11268_v61, %v14383_v63  ;;  %v4003_v62 = vsel %vm4002_vm3, %v11329_v59, %v14385_v11  ;;  %v4008_v50 = vsel %vm4002_vm3, %v3991_v13, %v14386_v1  ;;  %v14387_v31 = vld [vmem:[#allocation102_spill] sm:$0xff]  ;;  %v14388_v12 = vld [vmem:[#allocation103_spill] sm:$0xff]  ;;  %v14389_v63 = vld [vmem:[#allocation104_spill] sm:$0xff]  ;;  %v4014_v13 = vsel %vm4002_vm3, %v3997_v43, %v14392_v15 }
 0x39e   : > { %v4005_v10 = vsel %vm4002_vm3, %v3988_v20, %v14387_v31  ;;  %v4010_v61 = vsel %vm4002_vm3, %v3993_v18, %v14388_v12  ;;  %v4007_v47 = vsel %vm4002_vm3, %v3990_v32, %v14389_v63  ;;  %v14390_v59 = vld [vmem:[#allocation105_spill] sm:$0xff]  ;;  %v14391_v48 = vld [vmem:[#allocation106_spill] sm:$0xff]  ;;  %v14393_v1 = vld [vmem:[#allocation108_spill] sm:$0xff]  ;;  %v11531_v31 = vpop.permute.xlu0 %3857  ;;  %7150 = vrot.lane.b32.xlu1 %v11296_v17, %s8630_s27 }
 0x39f   : > { %v4012_v11 = vsel %vm4002_vm3, %v3995_v58, %v14390_v59  ;;  %v4009_v0 = vsel %vm4002_vm3, %v3992_v53, %v14391_v48  ;;  %v4011_v20 = vsel %vm4002_vm3, %v3994_v27, %v14393_v1  ;;  %v14394_v18 = vld [vmem:[#allocation109_spill] sm:$0xff]  ;;  %v14395_v12 = vld [vmem:[#allocation110_spill] sm:$0xff]  ;;  %v14396_v21 = vld [vmem:[#allocation111_spill] sm:$0xff]  ;;  %7204 = vrot.lane.b32.xlu0 %v11300_v8, %s8631_s29 }
 0x3a0   : > { %v4016_v32 = vsel %vm4002_vm3, %v3999_v54, %v14394_v18  ;;  %v4013_v63 = vsel %vm4002_vm3, %v3996_v45, %v14395_v12  ;;  %v4018_v58 = vsel %vm4002_vm3, %v4001_v4, %v14396_v21  ;;  %v14397_v59 = vld [vmem:[#allocation112_spill] sm:$0xff]  ;;  %v14398_v15 = vld [vmem:[#allocation113_spill] sm:$0xff]  ;;  %v14399_v27 = vld [vmem:[#allocation114_spill] sm:$0xff]  ;;  %v11561_v12 = vpop.permute.xlu1 %3851 }
 0x3a1   : > { %v4015_v48 = vsel %vm4002_vm3, %v3998_v41, %v14397_v59  ;;  %v4021_v43 = vsel %vm4019_vm4, %v4004_v23, %v14398_v15  ;;  %v11547_v53 = vsel %vm4002_vm3, %v4000_v5, %v14399_v27  ;;  %v14400_v54 = vld [vmem:[#allocation115_spill] sm:$0xff]  ;;  %v14401_v21 = vld [vmem:[#allocation116_spill] sm:$0xff]  ;;  %v14402_v4 = vld [vmem:[#allocation117_spill] sm:$0xff] }
 0x3a2   : > { %v4023_v1 = vsel %vm4019_vm4, %v4006_v19, %v14400_v54  ;;  %v4020_v45 = vsel %vm4019_vm4, %v4003_v62, %v14401_v21  ;;  %v4025_v17 = vsel %vm4019_vm4, %v4008_v50, %v14402_v4  ;;  %v14403_v41 = vld [vmem:[#allocation118_spill] sm:$0xff]  ;;  %v14404_v18 = vld [vmem:[#allocation119_spill] sm:$0xff]  ;;  %v14405_v59 = vld [vmem:[#allocation120_spill] sm:$0xff]  ;;  %v4031_v50 = vsel %vm4019_vm4, %v4014_v13, %v10035_v29  ;;  %v11571_v54 = vpop.permute.xlu0 %3861  ;;  %7154 = vrot.lane.b32.xlu1 %v11333_v26, %s8630_s27 }
 0x3a3   : > { %v4022_v23 = vsel %vm4019_vm4, %v4005_v10, %v14403_v41  ;;  %v4027_v5 = vsel %vm4019_vm4, %v4010_v61, %v14404_v18  ;;  %v4024_v19 = vsel %vm4019_vm4, %v4007_v47, %v14405_v59  ;;  %v14406_v15 = vld [vmem:[#allocation121_spill] sm:$0xff]  ;;  %v14407_v27 = vld [vmem:[#allocation122_spill] sm:$0xff]  ;;  %v4028_v10 = vsel %vm4019_vm4, %v4011_v20, %v10041_v35  ;;  %v14408_v21 = vld [vmem:[#allocation123_spill] sm:$0xff]  ;;  %7208 = vrot.lane.b32.xlu0 %v11307_v22, %s8631_s29 }
 0x3a4   : > { %v4029_v8 = vsel %vm4019_vm4, %v4012_v11, %v14406_v15  ;;  %v4026_v62 = vsel %vm4019_vm4, %v4009_v0, %v14407_v27  ;;  %v4033_v61 = vsel %vm4019_vm4, %v4016_v32, %v10045_v16  ;;  %v4030_v47 = vsel %vm4019_vm4, %v4013_v63, %v10051_v28  ;;  %v14409_v0 = vld [vmem:[#allocation124_spill] sm:$0xff]  ;;  %v14410_v13 = vld [vmem:[#allocation125_spill] sm:$0xff]  ;;  %v14411_v41 = vld [vmem:[#allocation127_spill] sm:$0xff] }
 0x3a5   : > { %v4035_v11 = vsel %vm4019_vm4, %v4018_v58, %v14408_v21  ;;  %v4032_v29 = vsel %vm4019_vm4, %v4015_v48, %v14409_v0  ;;  %v4038_v4 = vsel %vm4036_vm5, %v4021_v43, %v14410_v13  ;;  %v4040_v35 = vsel %vm4036_vm5, %v4023_v1, %v14411_v41  ;;  %v14412_v16 = vld [vmem:[#allocation128_spill] sm:$0xff]  ;;  %v14413_v20 = vld [vmem:[#allocation129_spill] sm:$0xff]  ;;  %v14414_v26 = vld [vmem:[#allocation130_spill] sm:$0xff]  ;;  %v11599_v43 = vpop.permute.xlu1 %3855 }
 0x3a6   : > { %v4037_v28 = vsel %vm4036_vm5, %v4020_v45, %v14412_v16  ;;  %v4042_v32 = vsel %vm4036_vm5, %v4025_v17, %v14413_v20  ;;  %v4039_v63 = vsel %vm4036_vm5, %v4022_v23, %v14414_v26  ;;  %v14415_v58 = vld [vmem:[#allocation131_spill] sm:$0xff]  ;;  %v14416_v18 = vld [vmem:[#allocation132_spill] sm:$0xff]  ;;  %v14417_v59 = vld [vmem:[#allocation133_spill] sm:$0xff]  ;;  %v11609_v21 = vpop.permute.xlu0 %3865  ;;  %7158 = vrot.lane.b32.xlu1 %v11343_v60, %s8630_s27  ;;  %s8281_s27 = sshll.u32 %s11709_s3, 4  ;;  %s13888_s27 = int_to_ptr.vmem [resolvable:$true] %s8281_s27 }
 0x3a7   : > { %v4044_v48 = vsel %vm4036_vm5, %v4027_v5, %v14415_v58  ;;  %v4041_v1 = vsel %vm4036_vm5, %v4024_v19, %v14416_v18  ;;  %v4046_v22 = vsel %vm4036_vm5, %v4029_v8, %v14417_v59  ;;  %v14418_v15 = vld [vmem:[#allocation134_spill] sm:$0xff]  ;;  %v14419_v27 = vld [vmem:[#allocation135_spill] sm:$0xff]  ;;  %v14420_v23 = vld [vmem:[#allocation136_spill] sm:$0xff]  ;;  %7212 = vrot.lane.b32.xlu0 %v11310_v52, %s8631_s29 }
 0x3a8   : > { %v4043_v45 = vsel %vm4036_vm5, %v4026_v62, %v14418_v15  ;;  %v4048_v17 = vsel %vm4036_vm5, %v4031_v50, %v14419_v27  ;;  %v4045_v0 = vsel %vm4036_vm5, %v4028_v10, %v14420_v23  ;;  %v14421_v5 = vld [vmem:[#allocation137_spill] sm:$0xff]  ;;  %v14422_v41 = vld [vmem:[#allocation138_spill] sm:$0xff]  ;;  %v14424_v62 = vld [vmem:[#allocation139_spill] sm:$0xff] }
 0x3a9   : > { %v4050_v13 = vsel %vm4036_vm5, %v4033_v61, %v14421_v5  ;;  %v4047_v19 = vsel %vm4036_vm5, %v4030_v47, %v14422_v41  ;;  %v14423_v16 = vld [vmem:[#allocation141_spill] sm:$0xff]  ;;  %v4052_v50 = vsel %vm4036_vm5, %v4035_v11, %v14424_v62  ;;  %v14425_v20 = vld [vmem:[#allocation140_spill] sm:$0xff]  ;;  %v14427_v61 = vld [vmem:[#allocation143_spill] sm:$0xff]  ;;  %v11635_v11 = vpop.permute.xlu1 %3859 }
 0x3aa   : > { %v4055_v8 = vsel %vm4053_vm6, %v4038_v4, %v14423_v16  ;;  %v4049_v26 = vsel %vm4036_vm5, %v4032_v29, %v14425_v20  ;;  %v14426_v10 = vld [vmem:[#allocation157_spill] sm:$0xff]  ;;  %v4057_v47 = vsel %vm4053_vm6, %v4040_v35, %v14427_v61  ;;  %v14428_v4 = vld [vmem:[#allocation144_spill] sm:$0xff]  ;;  %v14431_v27 = vld [vmem:[#allocation146_spill] sm:$0xff]  ;;  %v11643_v35 = vpop.permute.xlu0 %3869  ;;  %7194 = vrot.lane.b32.xlu1 %v11313_v7, %s8631_s29 }
 0x3ab   : > { %v4072_v58 = vsel %vm4070_vm7, %v4055_v8, %v14426_v10  ;;  %v4054_v60 = vsel %vm4053_vm6, %v4037_v28, %v14428_v4  ;;  %v14429_v18 = vld [vmem:[#allocation173_spill] sm:$0xff]  ;;  %v4056_v23 = vsel %vm4053_vm6, %v4039_v63, %v14431_v27  ;;  %v14433_v28 = vld [vmem:[#allocation147_spill] sm:$0xff]  ;;  %v14434_v16 = vld [vmem:[#allocation148_spill] sm:$0xff]  ;;  %7216 = vrot.lane.b32.xlu0 %v11316_v38, %s8631_s29 }
 0x3ac   : > { %v4089_v59 = vsel %vm4087_vm8, %v4072_v58, %v14429_v18  ;;  %v14430_v29 = vld [vmem:[#allocation145_spill] sm:$0xff]  ;;  %v4061_v41 = vsel %vm4053_vm6, %v4044_v48, %v14433_v28  ;;  %v11650_v8 = vsel %vm4053_vm6, %v4041_v1, %v14434_v16  ;;  %v14437_v10 = vld [vmem:[#allocation159_spill] sm:$0xff]  ;;  %v14439_v1 = vld [vmem:[#allocation150_spill] sm:$0xff] }
 0x3ad   : > { %v4059_v15 = vsel %vm4053_vm6, %v4042_v32, %v14430_v29  ;;  %v14432_v5 = vld [vmem:[#allocation189_spill] sm:$0xff]  ;;  %v4074_v58 = vsel %vm4070_vm7, %v4057_v47, %v14437_v10  ;;  %v11668_v4 = vsel %vm4053_vm6, %v4043_v45, %v14439_v1  ;;  %v14440_v18 = vld [vmem:[#allocation175_spill] sm:$0xff]  ;;  %v11674_v29 = vpop.permute.xlu1 %3863 }
 0x3ae   : > { %v4106_v52 = vsel %vm4104_vm9, %v4089_v59, %v14432_v5  ;;  %v14435_v62 = vld [vmem:[#allocation205_spill] sm:$0xff]  ;;  %v4091_v7 = vsel %vm4087_vm8, %v4074_v58, %v14440_v18  ;;  %v14441_v59 = vld [vmem:[#allocation244_spill] sm:$0xff]  ;;  %v14442_v47 = vld [vmem:[#allocation151_spill] sm:$0xff]  ;;  %v3906_v16 = vpop.permute.xlu0 %3905  ;;  %7198 = vrot.lane.b32.xlu1 %v11336_v49, %s8631_s29 }
 0x3af   : > { %v4123_v32 = vsel %vm4121_vm10, %v4106_v52, %v14435_v62  ;;  %v14436_v63 = vld [vmem:[#allocation149_spill] sm:$0xff]  ;;  %v11678_v27 = vsel %vm4053_vm6, %v4048_v17, %v14442_v47  ;;  %v14443_v5 = vld [vmem:[#allocation152_spill] sm:$0xff]  ;;  %v14444_v52 = vld [vmem:[#allocation191_spill] sm:$0xff]  ;;  %7220 = vrot.lane.b32.xlu0 %v11346_v55, %s8631_s29 }
 0x3b0   : > { %v11658_v20 = vsel %vm4053_vm6, %v4046_v22, %v14436_v63  ;;  %v14438_v61 = vld [vmem:[#allocation13_spill] sm:$0xff]  ;;  %v11682_v38 = vsel %vm4053_vm6, %v4045_v0, %v14443_v5  ;;  %v4108_v45 = vsel %vm4104_vm9, %v4091_v7, %v14444_v52  ;;  %v14446_v63 = vld [vmem:[#allocation160_spill] sm:$0xff]  ;;  %v14447_v17 = vld [vmem:[#allocation207_spill] sm:$0xff] }
 0x3b1   : > { %v4140_v48 = vsel %vm4138_vm11, %v4123_v32, %v14438_v61  ;;  %v14445_v62 = vld [vmem:[#allocation153_spill] sm:$0xff]  ;;  %v4071_v10 = vsel %vm4070_vm7, %v4054_v60, %v14446_v63  ;;  %v4125_v58 = vsel %vm4121_vm10, %v4108_v45, %v14447_v17  ;;  %v14448_v61 = vld [vmem:[#allocation154_spill] sm:$0xff]  ;;  %v14451_v7 = vld [vmem:[#allocation216_spill] sm:$0xff]  ;;  %v11725_v45 = vpop.permute.xlu1 %3867 }
 0x3b2   : > { %v4157_v22 = vsel %vm4155_vm12, %v4140_v48, %v14441_v59  ;;  %v11690_v32 = vsel %vm4053_vm6, %v4050_v13, %v14445_v62  ;;  %v11701_v48 = vsel %vm4053_vm6, %v4047_v19, %v14448_v61  ;;  %v14450_v13 = vld [vmem:[#allocation176_spill] sm:$0xff]  ;;  %v4142_v60 = vsel %vm4138_vm11, %v4125_v58, %v14451_v7  ;;  %v14452_v49 = vld [vmem:[#allocation155_spill] sm:$0xff]  ;;  %v14453_v59 = vld [vmem:[#allocation177_spill] sm:$0xff]  ;;  %v3910_v17 = vpop.permute.xlu0 %3909  ;;  %7202 = vrot.lane.b32.xlu1 %v11358_v33, %s8631_s29 }
 0x3b3   : > { %v4174_v28 = vsel %vm4172_vm13, %v4157_v22, %v11304_v25  ;;  %v14449_v25 = vld [vmem:[#allocation161_spill] sm:$0xff]  ;;  %v4088_v18 = vsel %vm4087_vm8, %v4071_v10, %v14450_v13  ;;  %v11717_v19 = vsel %vm4053_vm6, %v4052_v50, %v14452_v49  ;;  %v14454_v22 = vld [vmem:[#allocation192_spill] sm:$0xff]  ;;  %v14455_v5 = vld [vmem:[#allocation247_spill] sm:$0xff]  ;;  %7256 = vrot.lane.b32.xlu0 %v11424_v42, %s8632_s30 }
 0x3b4   : > { %v4191_v0 = vsel %vm4189_vm14, %v4174_v28, %v3906_v16  ;;  %v4076_v1 = vsel %vm4070_vm7, %v4059_v15, %v14449_v25  ;;  %v4105_v47 = vsel %vm4104_vm9, %v4088_v18, %v14454_v22  ;;  %v4159_v52 = vsel %vm4155_vm12, %v4142_v60, %v14455_v5  ;;  %v14456_v28 = vld [vmem:[#allocation156_spill] sm:$0xff]  ;;  %v14457_v55 = vld [vmem:[#allocation193_spill] sm:$0xff]  ;;  %v14459_v58 = vld [vmem:[#allocation162_spill] sm:$0xff] }
 0x3b5   : > { %4208 = vst.msk [vmem:[%s11709_s3 + $0x2] sm:$0x1] %vm4206_vm15, %v4191_v0  ;;  %v4093_v15 = vsel %vm4087_vm8, %v4076_v1, %v14453_v59  ;;  %v11729_v16 = vsel %vm4053_vm6, %v4049_v26, %v14456_v28  ;;  %v14458_v62 = vld [vmem:[#allocation208_spill] sm:$0xff]  ;;  %v4176_v10 = vsel %vm4172_vm13, %v4159_v52, %v11355_v40  ;;  %v4073_v0 = vsel %vm4070_vm7, %v4056_v23, %v14459_v58  ;;  %v14460_v61 = vld [vmem:[#allocation209_spill] sm:$0xff]  ;;  %v14461_v1 = vld [vmem:[#allocation218_spill] sm:$0xff] }
 0x3b6   : > { %v4110_v50 = vsel %vm4104_vm9, %v4093_v15, %v14457_v55  ;;  %v4122_v63 = vsel %vm4121_vm10, %v4105_v47, %v14458_v62  ;;  %v4193_v13 = vsel %vm4189_vm14, %v4176_v10, %v3910_v17  ;;  %v14462_v18 = vld [vmem:[#allocation163_spill] sm:$0xff]  ;;  %v14463_v60 = vld [vmem:[#allocation178_spill] sm:$0xff]  ;;  %v14465_v59 = vld [vmem:[#allocation248_spill] sm:$0xff]  ;;  %v3904_v55 = vpop.permute.xlu1 %3903  ;;  %7206 = vrot.lane.b32.xlu1 %v11361_v44, %s8631_s29 }
 0x3b7   : > { %v4127_v25 = vsel %vm4121_vm10, %v4110_v50, %v14460_v61  ;;  %v4139_v26 = vsel %vm4138_vm11, %v4122_v63, %v14461_v1  ;;  %v4078_v7 = vsel %vm4070_vm7, %v4061_v41, %v14462_v18  ;;  %v4090_v40 = vsel %vm4087_vm8, %v4073_v0, %v14463_v60  ;;  %v14464_v49 = vld [vmem:[#allocation219_spill] sm:$0xff]  ;;  %4210 = vst.msk [vmem:[%s11709_s3 + $0x6] sm:$0x1] %vm4206_vm15, %v4193_v13  ;;  %v14467_v47 = vld [vmem:[#allocation194_spill] sm:$0xff]  ;;  %v3914_v0 = vpop.permute.xlu0 %3913  ;;  %v14471_v61 = vld [vmem:[#allocation164_spill] sm:$0xff] }
 0x3b8   : > { %v4144_v23 = vsel %vm4138_vm11, %v4127_v25, %v14464_v49  ;;  %v4156_v15 = vsel %vm4155_vm12, %v4139_v26, %v14465_v59  ;;  %v14466_v22 = vld [vmem:[#allocation179_spill] sm:$0xff]  ;;  %v4107_v41 = vsel %vm4104_vm9, %v4090_v40, %v14467_v47  ;;  %v14468_v5 = vld [vmem:[#allocation250_spill] sm:$0xff]  ;;  %v4075_v25 = vsel %vm4070_vm7, %v11650_v8, %v14471_v61  ;;  %v14475_v60 = vld [vmem:[#allocation180_spill] sm:$0xff]  ;;  %7260 = vrot.lane.b32.xlu0 %v11428_v3, %s8632_s30 }
 0x3b9   : > { %v4095_v33 = vsel %vm4087_vm8, %v4078_v7, %v14466_v22  ;;  %v4161_v52 = vsel %vm4155_vm12, %v4144_v23, %v14468_v5  ;;  %v4173_v28 = vsel %vm4172_vm13, %v4156_v15, %v11392_v24  ;;  %v14469_v50 = vld [vmem:[#allocation195_spill] sm:$0xff]  ;;  %v14470_v63 = vld [vmem:[#allocation210_spill] sm:$0xff]  ;;  %v4092_v8 = vsel %vm4087_vm8, %v4075_v25, %v14475_v60  ;;  %v14478_v44 = vld [vmem:[#allocation181_spill] sm:$0xff] }
 0x3ba   : > { %v4112_v62 = vsel %vm4104_vm9, %v4095_v33, %v14469_v50  ;;  %v4124_v10 = vsel %vm4121_vm10, %v4107_v41, %v14470_v63  ;;  %v4178_v17 = vsel %vm4172_vm13, %v4161_v52, %v11412_v2  ;;  %v4190_v58 = vsel %vm4189_vm14, %v4173_v28, %v3904_v55  ;;  %v14472_v1 = vld [vmem:[#allocation211_spill] sm:$0xff]  ;;  %v14473_v26 = vld [vmem:[#allocation222_spill] sm:$0xff]  ;;  %v14474_v2 = vld [vmem:[#allocation165_spill] sm:$0xff]  ;;  %v3908_v5 = vpop.permute.xlu1 %3907  ;;  %7210 = vrot.lane.b32.xlu1 %v11381_v6, %s8631_s29 }
 0x3bb   : > { %v4129_v24 = vsel %vm4121_vm10, %v4112_v62, %v14472_v1  ;;  %v4141_v13 = vsel %vm4138_vm11, %v4124_v10, %v14473_v26  ;;  %4207 = vst.msk [vmem:[%s11709_s3] sm:$0x1] %vm4206_vm15, %v4190_v58  ;;  %v4195_v18 = vsel %vm4189_vm14, %v4178_v17, %v3914_v0  ;;  %v4080_v7 = vsel %vm4070_vm7, %v11658_v20, %v14474_v2  ;;  %v14476_v40 = vld [vmem:[#allocation223_spill] sm:$0xff]  ;;  %v14479_v22 = vld [vmem:[#allocation196_spill] sm:$0xff]  ;;  %v14480_v33 = vld [vmem:[#allocation253_spill] sm:$0xff]  ;;  %v3918_v10 = vpop.permute.xlu0 %3917 }
 0x3bc   : > { %v4146_v49 = vsel %vm4138_vm11, %v4129_v24, %v14476_v40  ;;  %v14477_v23 = vld [vmem:[#allocation251_spill] sm:$0xff]  ;;  %4212 = vst.msk [vmem:[%s11709_s3 + $0xa] sm:$0x1] %vm4206_vm15, %v4195_v18  ;;  %v4097_v15 = vsel %vm4087_vm8, %v4080_v7, %v14478_v44  ;;  %v4109_v20 = vsel %vm4104_vm9, %v4092_v8, %v14479_v22  ;;  %v14481_v52 = vld [vmem:[#allocation197_spill] sm:$0xff]  ;;  %v14482_v55 = vld [vmem:[#allocation212_spill] sm:$0xff]  ;;  %7264 = vrot.lane.b32.xlu0 %v11432_v30, %s8632_s30 }
 0x3bd   : > { %v4158_v59 = vsel %vm4155_vm12, %v4141_v13, %v14477_v23  ;;  %v4163_v47 = vsel %vm4155_vm12, %v4146_v49, %v14480_v33  ;;  %v4114_v28 = vsel %vm4104_vm9, %v4097_v15, %v14481_v52  ;;  %v4126_v50 = vsel %vm4121_vm10, %v4109_v20, %v14482_v55  ;;  %v14483_v17 = vld [vmem:[#allocation166_spill] sm:$0xff]  ;;  %v14484_v0 = vld [vmem:[#allocation213_spill] sm:$0xff]  ;;  %v14488_v13 = vld [vmem:[#allocation228_spill] sm:$0xff] }
 0x3be   : > { %v4175_v41 = vsel %vm4172_vm13, %v4158_v59, %v11453_v9  ;;  %v4180_v62 = vsel %vm4172_vm13, %v4163_v47, %v11479_v39  ;;  %v4077_v58 = vsel %vm4070_vm7, %v11668_v4, %v14483_v17  ;;  %v4131_v9 = vsel %vm4121_vm10, %v4114_v28, %v14484_v0  ;;  %v14485_v61 = vld [vmem:[#allocation226_spill] sm:$0xff]  ;;  %v14486_v39 = vld [vmem:[#allocation167_spill] sm:$0xff]  ;;  %v14492_v40 = vld [vmem:[#allocation17_spill] sm:$0xff]  ;;  %v3912_v59 = vpop.permute.xlu1 %3911  ;;  %7214 = vrot.lane.b32.xlu1 %v11385_v36, %s8631_s29 }
 0x3bf   : > { %v4192_v63 = vsel %vm4189_vm14, %v4175_v41, %v3908_v5  ;;  %v4143_v25 = vsel %vm4138_vm11, %v4126_v50, %v14485_v61  ;;  %v4197_v1 = vsel %vm4189_vm14, %v4180_v62, %v3918_v10  ;;  %v4082_v24 = vsel %vm4070_vm7, %v11678_v27, %v14486_v39  ;;  %v14487_v26 = vld [vmem:[#allocation182_spill] sm:$0xff]  ;;  %v14490_v6 = vld [vmem:[#allocation183_spill] sm:$0xff]  ;;  %v3922_v41 = vpop.permute.xlu0 %3921  ;;  %v14495_v5 = vld [vmem:[#allocation168_spill] sm:$0xff] }
 0x3c0   : > { %4209 = vst.msk [vmem:[%s11709_s3 + $0x4] sm:$0x1] %vm4206_vm15, %v4192_v63  ;;  %v4094_v4 = vsel %vm4087_vm8, %v4077_v58, %v14487_v26  ;;  %v4148_v18 = vsel %vm4138_vm11, %v4131_v9, %v14488_v13  ;;  %v14489_v2 = vld [vmem:[#allocation254_spill] sm:$0xff]  ;;  %4214 = vst.msk [vmem:[%s11709_s3 + $0xe] sm:$0x1] %vm4206_vm15, %v4197_v1  ;;  %v4099_v60 = vsel %vm4087_vm8, %v4082_v24, %v14490_v6  ;;  %v14493_v44 = vld [vmem:[#allocation199_spill] sm:$0xff]  ;;  %7268 = vrot.lane.b32.xlu0 %v11436_v46, %s8632_s30 }
 0x3c1   : > { %v4160_v7 = vsel %vm4155_vm12, %v4143_v25, %v14489_v2  ;;  %v14491_v8 = vld [vmem:[#allocation198_spill] sm:$0xff]  ;;  %v4165_v49 = vsel %vm4155_vm12, %v4148_v18, %v14492_v40  ;;  %v4116_v15 = vsel %vm4104_vm9, %v4099_v60, %v14493_v44  ;;  %v4079_v52 = vsel %vm4070_vm7, %v11682_v38, %v14495_v5  ;;  %v14499_v10 = vld [vmem:[#allocation184_spill] sm:$0xff]  ;;  %v14501_v0 = vld [vmem:[#allocation51_spill] sm:$0xff] }
 0x3c2   : > { %v4111_v27 = vsel %vm4104_vm9, %v4094_v4, %v14491_v8  ;;  %v4177_v23 = vsel %vm4172_vm13, %v4160_v7, %v11521_v14  ;;  %v14494_v22 = vld [vmem:[#allocation14_spill] sm:$0xff]  ;;  %v4182_v33 = vsel %vm4172_vm13, %v4165_v49, %v11531_v31  ;;  %v14498_v31 = vld [vmem:[#allocation169_spill] sm:$0xff]  ;;  %v4096_v38 = vsel %vm4087_vm8, %v4079_v52, %v14499_v10  ;;  %v14500_v17 = vld [vmem:[#allocation232_spill] sm:$0xff]  ;;  %v3916_v26 = vpop.permute.xlu1 %3915  ;;  %7218 = vrot.lane.b32.xlu1 %v11396_v37, %s8631_s29 }
 0x3c3   : > { %v4128_v20 = vsel %vm4121_vm10, %v4111_v27, %v14494_v22  ;;  %v4194_v47 = vsel %vm4189_vm14, %v4177_v23, %v3912_v59  ;;  %v14496_v28 = vld [vmem:[#allocation10_spill] sm:$0xff]  ;;  %v4199_v62 = vsel %vm4189_vm14, %v4182_v33, %v3922_v41  ;;  %v4084_v63 = vsel %vm4070_vm7, %v11690_v32, %v14498_v31  ;;  %v14502_v36 = vld [vmem:[#allocation185_spill] sm:$0xff]  ;;  %v14503_v25 = vld [vmem:[#allocation200_spill] sm:$0xff]  ;;  %v3926_v60 = vpop.permute.xlu0 %3925 }
 0x3c4   : > { %v4133_v14 = vsel %vm4121_vm10, %v4116_v15, %v14496_v28  ;;  %v14497_v55 = vld [vmem:[#allocation230_spill] sm:$0xff]  ;;  %4211 = vst.msk [vmem:[%s11709_s3 + $0x8] sm:$0x1] %vm4206_vm15, %v4194_v47  ;;  %4216 = vst.msk [vmem:[%s11709_s3 + $0x12] sm:$0x1] %vm4206_vm15, %v4199_v62  ;;  %v4101_v61 = vsel %vm4087_vm8, %v4084_v63, %v14502_v36  ;;  %v4113_v32 = vsel %vm4104_vm9, %v4096_v38, %v14503_v25  ;;  %v14504_v1 = vld [vmem:[#allocation52_spill] sm:$0xff]  ;;  %7272 = vrot.lane.b32.xlu0 %v11448_v51, %s8632_s30 }
 0x3c5   : > { %v4145_v50 = vsel %vm4138_vm11, %v4128_v20, %v14497_v55  ;;  %v4150_v58 = vsel %vm4138_vm11, %v4133_v14, %v14500_v17  ;;  %v14505_v4 = vld [vmem:[#allocation201_spill] sm:$0xff]  ;;  %v14506_v18 = vld [vmem:[#allocation12_spill] sm:$0xff]  ;;  %v14507_v8 = vld [vmem:[#allocation170_spill] sm:$0xff] }
 0x3c6   : > { %v4162_v9 = vsel %vm4155_vm12, %v4145_v50, %v14501_v0  ;;  %v4167_v39 = vsel %vm4155_vm12, %v4150_v58, %v14504_v1  ;;  %v4118_v13 = vsel %vm4104_vm9, %v4101_v61, %v14505_v4  ;;  %v4130_v2 = vsel %vm4121_vm10, %v4113_v32, %v14506_v18  ;;  %v14508_v40 = vld [vmem:[#allocation33_spill] sm:$0xff]  ;;  %v14509_v49 = vld [vmem:[#allocation234_spill] sm:$0xff]  ;;  %v14512_v22 = vld [vmem:[#allocation236_spill] sm:$0xff]  ;;  %v3920_v55 = vpop.permute.xlu1 %3919  ;;  %7222 = vrot.lane.b32.xlu1 %v11416_v56, %s8631_s29 }
 0x3c7   : > { %v4179_v24 = vsel %vm4172_vm13, %v4162_v9, %v11561_v12  ;;  %v4184_v7 = vsel %vm4172_vm13, %v4167_v39, %v11571_v54  ;;  %v4081_v27 = vsel %vm4070_vm7, %v11701_v48, %v14507_v8  ;;  %v4135_v12 = vsel %vm4121_vm10, %v4118_v13, %v14508_v40  ;;  %v14510_v54 = vld [vmem:[#allocation171_spill] sm:$0xff]  ;;  %v14511_v15 = vld [vmem:[#allocation186_spill] sm:$0xff]  ;;  %v14516_v52 = vld [vmem:[#allocation53_spill] sm:$0xff]  ;;  %v3930_v17 = vpop.permute.xlu0 %3929 }
 0x3c8   : > { %v4196_v6 = vsel %vm4189_vm14, %v4179_v24, %v3916_v26  ;;  %v4147_v23 = vsel %vm4138_vm11, %v4130_v2, %v14509_v49  ;;  %v4201_v59 = vsel %vm4189_vm14, %v4184_v7, %v3926_v60  ;;  %v4086_v44 = vsel %vm4070_vm7, %v11717_v19, %v14510_v54  ;;  %v14513_v33 = vld [vmem:[#allocation19_spill] sm:$0xff]  ;;  %v14515_v5 = vld [vmem:[#allocation202_spill] sm:$0xff]  ;;  %v14519_v58 = vld [vmem:[#allocation172_spill] sm:$0xff]  ;;  %7276 = vrot.lane.b32.xlu0 %v11457_v34, %s8632_s30 }
 0x3c9   : > { %4213 = vst.msk [vmem:[%s11709_s3 + $0xc] sm:$0x1] %vm4206_vm15, %v4196_v6  ;;  %v4098_v48 = vsel %vm4087_vm8, %v4081_v27, %v14511_v15  ;;  %v4152_v20 = vsel %vm4138_vm11, %v4135_v12, %v14512_v22  ;;  %v4164_v47 = vsel %vm4155_vm12, %v4147_v23, %v14513_v33  ;;  %4218 = vst.msk [vmem:[%s11709_s3 + $0x16] sm:$0x1] %vm4206_vm15, %v4201_v59  ;;  %v14514_v37 = vld [vmem:[#allocation187_spill] sm:$0xff]  ;;  %v14518_v31 = vld [vmem:[#allocation34_spill] sm:$0xff] }
 0x3ca   : > { %v4103_v41 = vsel %vm4087_vm8, %v4086_v44, %v14514_v37  ;;  %v4115_v19 = vsel %vm4104_vm9, %v4098_v48, %v14515_v5  ;;  %v4169_v28 = vsel %vm4155_vm12, %v4152_v20, %v14516_v52  ;;  %v4181_v14 = vsel %vm4172_vm13, %v4164_v47, %v11599_v43  ;;  %v14517_v50 = vld [vmem:[#allocation203_spill] sm:$0xff]  ;;  %v14520_v9 = vld [vmem:[#allocation16_spill] sm:$0xff]  ;;  %v14521_v36 = vld [vmem:[#allocation238_spill] sm:$0xff]  ;;  %v3924_v60 = vpop.permute.xlu1 %3923 }
 0x3cb   : > { %v4120_v62 = vsel %vm4104_vm9, %v4103_v41, %v14517_v50  ;;  %v4132_v63 = vsel %vm4121_vm10, %v4115_v19, %v14518_v31  ;;  %v4186_v10 = vsel %vm4172_vm13, %v4169_v28, %v11609_v21  ;;  %v4198_v38 = vsel %vm4189_vm14, %v4181_v14, %v3920_v55  ;;  %v14522_v21 = vld [vmem:[#allocation126_spill] sm:$0xff]  ;;  %v14523_v1 = vld [vmem:[#allocation188_spill] sm:$0xff]  ;;  %v14530_v40 = vld [vmem:[#allocation15_spill] sm:$0xff]  ;;  %v3934_v59 = vpop.permute.xlu0 %3933 }
 0x3cc   : > { %v4083_v0 = vsel %vm4070_vm7, %v11729_v16, %v14519_v58  ;;  %v4137_v43 = vsel %vm4121_vm10, %v4120_v62, %v14520_v9  ;;  %v4149_v61 = vsel %vm4138_vm11, %v4132_v63, %v14521_v36  ;;  %4215 = vst.msk [vmem:[%s11709_s3 + $0x10] sm:$0x1] %vm4206_vm15, %v4198_v38  ;;  %v4203_v25 = vsel %vm4189_vm14, %v4186_v10, %v3930_v17  ;;  %v14524_v39 = vld [vmem:[#allocation240_spill] sm:$0xff]  ;;  %v14526_v56 = vld [vmem:[#allocation142_spill] sm:$0xff]  ;;  %v14535_v33 = vld [vmem:[#allocation21_spill] sm:$0xff] }
 0x3cd   : > { %v4034_v32 = vsel %vm4019_vm4, %v11547_v53, %v14522_v21  ;;  %v4100_v16 = vsel %vm4087_vm8, %v4083_v0, %v14523_v1  ;;  %v4154_v24 = vsel %vm4138_vm11, %v4137_v43, %v14524_v39  ;;  %v14525_v26 = vld [vmem:[#allocation20_spill] sm:$0xff]  ;;  %4220 = vst.msk [vmem:[%s11709_s3 + $0x1a] sm:$0x1] %vm4206_vm15, %v4203_v25  ;;  %v14528_v2 = vld [vmem:[#allocation54_spill] sm:$0xff]  ;;  %7280 = vrot.lane.b32.xlu0 %v11483_v57, %s8632_s30  ;;  %v14536_v37 = vld [vmem:[#allocation9_spill] sm:$0xff]  ;;  %v14541_v31 = vmov 0.0  }
 0x3ce   : > { %v4166_v4 = vsel %vm4155_vm12, %v4149_v61, %v14525_v26  ;;  %v4051_v13 = vsel %vm4036_vm5, %v4034_v32, %v14526_v56  ;;  %v14527_v18 = vld [vmem:[#allocation204_spill] sm:$0xff]  ;;  %v4171_v7 = vsel %vm4155_vm12, %v4154_v24, %v14528_v2  ;;  %v14529_v8 = vld [vmem:[#allocation158_spill] sm:$0xff]  ;;  %v3928_v14 = vpop.permute.xlu1 %3927  ;;  %v14540_v50 = vld [vmem:[#allocation61_spill] sm:$0xff]  ;;  %v5527_v56 = vcombine.high %v11424_v42, %v14541_v31 }
 0x3cf   : > { %v4117_v53 = vsel %vm4104_vm9, %v4100_v16, %v14527_v18  ;;  %v4183_v6 = vsel %vm4172_vm13, %v4166_v4, %v11635_v11  ;;  %v4068_v27 = vsel %vm4053_vm6, %v4051_v13, %v14529_v8  ;;  %v4188_v49 = vsel %vm4172_vm13, %v4171_v7, %v11643_v35  ;;  %v14531_v54 = vld [vmem:[#allocation174_spill] sm:$0xff]  ;;  %v14533_v22 = vld [vmem:[#allocation60_spill] sm:$0xff]  ;;  %v14542_v63 = vld [vmem:[#allocation11_spill] sm:$0xff]  ;;  %v12007_v0 = vpop.permute.xlu0 %7066 }
 0x3d0   : > { %v4134_v12 = vsel %vm4121_vm10, %v4117_v53, %v14530_v40  ;;  %v4200_v23 = vsel %vm4189_vm14, %v4183_v6, %v3924_v60  ;;  %v4085_v44 = vsel %vm4070_vm7, %v4068_v27, %v14531_v54  ;;  %v14532_v15 = vld [vmem:[#allocation242_spill] sm:$0xff]  ;;  %v4205_v11 = vsel %vm4189_vm14, %v4188_v49, %v3934_v59  ;;  %7258 = vrot.lane.b32.xlu1 %v14533_v22, %s8632_s30  ;;  %v14539_v55 = vld [vmem:[#allocation8_spill] sm:$0xff]  ;;  %v14547_v61 = vld [vmem:[#allocation55_spill] sm:$0xff] }
 0x3d1   : > { %v4151_v48 = vsel %vm4138_vm11, %v4134_v12, %v14532_v15  ;;  %4217 = vst.msk [vmem:[%s11709_s3 + $0x14] sm:$0x1] %vm4206_vm15, %v4200_v23  ;;  %v14534_v20 = vld [vmem:[#allocation190_spill] sm:$0xff]  ;;  %4222 = vst.msk [vmem:[%s11709_s3 + $0x1e] sm:$0x1] %vm4206_vm15, %v4205_v11  ;;  %v12000_v62 = vrot.slane %v14540_v50, %v14539_v55  ;;  %v8409_v10 = vcombine.high %v14542_v63, %v14541_v31  ;;  %v14545_v9 = vld [vmem:[#allocation28_spill] sm:$0xff] }
 0x3d2   : > { %v4102_v35 = vsel %vm4087_vm8, %v4085_v44, %v14534_v20  ;;  %v4168_v47 = vsel %vm4155_vm12, %v4151_v48, %v14535_v33  ;;  %v14537_v41 = vld [vmem:[#allocation26_spill] sm:$0xff]  ;;  %14544 = vst [vmem:[#allocation27_spill] sm:$0xff] %v12007_v0  ;;  %v12011_v43 = vrot.slane %v14545_v9, %v14536_v37  ;;  %v3932_v32 = vpop.permute.xlu1 %3931  ;;  %v14548_v39 = vld [vmem:[#allocation215_spill] sm:$0xff]  ;;  %v14550_v53 = vld [vmem:[#allocation217_spill] sm:$0xff]  ;;  %v5723_v42 = vcombine.high %v11428_v3, %v14541_v31 }
 0x3d3   : > { %v11992_v5 = vrot.slane %v14537_v41, %v14536_v37  ;;  %v14538_v19 = vld [vmem:[#allocation206_spill] sm:$0xff]  ;;  %v4185_v28 = vsel %vm4172_vm13, %v4168_v47, %v11674_v29  ;;  %v14546_v29 = vld [vmem:[#allocation245_spill] sm:$0xff]  ;;  %v6007_v1 = vrot.slane %v12000_v62, %v14536_v37  ;;  %v12028_v16 = vrot.slane %v8409_v10, %v14539_v55  ;;  %v12033_v4 = vpop.permute.xlu0 %7076 }
 0x3d4   : > { %v4119_v52 = vsel %vm4104_vm9, %v4102_v35, %v14538_v19  ;;  %v14543_v38 = vld [vmem:[#allocation214_spill] sm:$0xff]  ;;  %v4202_v58 = vsel %vm4189_vm14, %v4185_v28, %v3928_v14  ;;  %7284 = vrot.lane.b32.xlu0 %v12011_v43, %s8632_s30  ;;  %v8411_v24 = vcombine.high %v14548_v39, %v14541_v31  ;;  %14549 = vst [vmem:[#allocation62_spill] sm:$0xff] %v12033_v4  ;;  %v14552_v27 = vld [vmem:[#allocation221_spill] sm:$0xff] }
 0x3d5   : > { %v4136_v17 = vsel %vm4121_vm10, %v4119_v52, %v14543_v38  ;;  %4219 = vst.msk [vmem:[%s11709_s3 + $0x18] sm:$0x1] %vm4206_vm15, %v4202_v58  ;;  %7262 = vrot.lane.b32.xlu1 %v11992_v5, %s8632_s30  ;;  %v6203_v13 = vrot.slane %v12028_v16, %v14536_v37  ;;  %v8413_v2 = vcombine.high %v14550_v53, %v14541_v31  ;;  %v14555_v54 = vld [vmem:[#allocation225_spill] sm:$0xff] }
 0x3d6   : > { %v4153_v36 = vsel %vm4138_vm11, %v4136_v17, %v14546_v29  ;;  %v12046_v18 = vrot.slane %v8411_v24, %v14539_v55  ;;  %v8415_v40 = vcombine.high %v14552_v27, %v14541_v31  ;;  %v5919_v3 = vcombine.high %v11432_v30, %v14541_v31 }
 0x3d7   : > { %v4170_v25 = vsel %vm4155_vm12, %v4153_v36, %v14547_v61  ;;  %v12050_v7 = vpop.permute.xlu0 %7080  ;;  %v12061_v8 = vrot.slane %v8413_v2, %v14539_v55  ;;  %v8417_v44 = vcombine.high %v14555_v54, %v14541_v31  ;;  %v6115_v30 = vcombine.high %v11436_v46, %v14541_v31  ;;  %v14566_v36 = vld [vmem:[#allocation56_spill] sm:$0xff] }
 0x3d8   : > { %v4187_v21 = vsel %vm4172_vm13, %v4170_v25, %v11725_v45  ;;  %7320 = vrot.lane.b32.xlu0 %v5527_v56, %s8633_s2  ;;  %v12041_v45 = vpop.permute.xlu1 %7064  ;;  %14551 = vst [vmem:[#allocation29_spill] sm:$0xff] %v12050_v7  ;;  %v6399_v60 = vrot.slane %v12046_v18, %v14536_v37  ;;  %v12076_v59 = vrot.slane %v8415_v40, %v14539_v55 }
 0x3d9   : > { %v4204_v26 = vsel %vm4189_vm14, %v4187_v21, %v3932_v32  ;;  %7266 = vrot.lane.b32.xlu1 %v6007_v1, %s8632_s30  ;;  %v6595_v23 = vrot.slane %v12061_v8, %v14536_v37  ;;  %v12091_v20 = vrot.slane %v8417_v44, %v14539_v55  ;;  %v6311_v33 = vcombine.high %v11448_v51, %v14541_v31 }
 0x3da   : > { %4221 = vst.msk [vmem:[%s11709_s3 + $0x1c] sm:$0x1] %vm4206_vm15, %v4204_v26  ;;  %v6791_v11 = vrot.slane %v12076_v59, %v14536_v37  ;;  %v6507_v52 = vcombine.high %v11457_v34, %v14541_v31  ;;  %v5625_v51 = vcombine.high %v14533_v22, %v14541_v31  ;;  %v6703_v50 = vcombine.high %v11483_v57, %v14541_v31  ;;  %v14563_v22 = vld [vmem:[#allocation22_spill] sm:$0xff] }
 0x3db   : > { %v12065_v12 = vpop.permute.xlu0 %7084  ;;  %v6987_v47 = vrot.slane %v12091_v20, %v14536_v37  ;;  %v5821_v34 = vcombine.high %v11992_v5, %v14541_v31  ;;  %v6899_v38 = vcombine.high %v12011_v43, %v14541_v31  ;;  %v5510_v17 = vcombine.high %v14563_v22, %v14541_v31 }
 0x3dc   : > { %7324 = vrot.lane.b32.xlu0 %v5723_v42, %s8633_s2  ;;  %v12056_v6 = vpop.permute.xlu1 %7068  ;;  %14553 = vst [vmem:[#allocation63_spill] sm:$0xff] %v12065_v12  ;;  %v6017_v58 = vcombine.high %v6007_v1, %v14541_v31  ;;  %v5706_v61 = vcombine.high %v14566_v36, %v14541_v31  ;;  %v6213_v25 = vcombine.high %v6203_v13, %v14541_v31  ;;  %v14569_v1 = vld [vmem:[#allocation23_spill] sm:$0xff] }
 0x3dd   : > { %7270 = vrot.lane.b32.xlu1 %v6203_v13, %s8632_s30  ;;  %v5524_v5 = vrot.slane %v5510_v17, %v14536_v37  ;;  %v5902_v39 = vcombine.high %v14569_v1, %v14541_v31  ;;  %v6409_v26 = vcombine.high %v6399_v60, %v14541_v31  ;;  %v14572_v13 = vld [vmem:[#allocation57_spill] sm:$0xff]  ;;  %v6605_v27 = vcombine.high %v6595_v23, %v14541_v31 }
 0x3de   : > { %v5720_v32 = vrot.slane %v5706_v61, %v14536_v37  ;;  %v6098_v2 = vcombine.high %v14572_v13, %v14541_v31 }
 0x3df   : > { %v12080_v15 = vpop.permute.xlu0 %7088  ;;  %v12157_v53 = vrot.slane %v5902_v39, %v14536_v37 }
 0x3e0   : > { %7328 = vrot.lane.b32.xlu0 %v5919_v3, %s8633_s2  ;;  %v12071_v49 = vpop.permute.xlu1 %7070  ;;  %14556 = vst [vmem:[#allocation64_spill] sm:$0xff] %v12080_v15  ;;  %v14575_v3 = vld [vmem:[#allocation24_spill] sm:$0xff] }
 0x3e1   : > { %7274 = vrot.lane.b32.xlu1 %v6399_v60, %s8632_s30  ;;  %14554 = vst [vmem:[#allocation30_spill] sm:$0xff] %v12071_v49  ;;  %v12170_v60 = vrot.slane %v6098_v2, %v14536_v37  ;;  %v6294_v54 = vcombine.high %v14575_v3, %v14541_v31 }
 0x3e3   : > { %v12093_v35 = vpop.permute.xlu0 %7092 }
 0x3e4   : > { %7332 = vrot.lane.b32.xlu0 %v6115_v30, %s8633_s2  ;;  %v12086_v48 = vpop.permute.xlu1 %7072  ;;  %v6801_v30 = vcombine.high %v6791_v11, %v14541_v31 }
 0x3e5   : > { %7278 = vrot.lane.b32.xlu1 %v6595_v23, %s8632_s30  ;;  %14557 = vst [vmem:[#allocation31_spill] sm:$0xff] %v12086_v48  ;;  %v12183_v23 = vrot.slane %v6294_v54, %v14536_v37 }
 0x3e7   : > { %v12103_v19 = vpop.permute.xlu0 %7128 }
 0x3e8   : > { %7336 = vrot.lane.b32.xlu0 %v6311_v33, %s8633_s2  ;;  %v12099_v46 = vpop.permute.xlu1 %7074 }
 0x3e9   : > { %7282 = vrot.lane.b32.xlu1 %v6791_v11, %s8632_s30  ;;  %14558 = vst [vmem:[#allocation65_spill] sm:$0xff] %v12099_v46 }
 0x3eb   : > { %v12113_v14 = vpop.permute.xlu0 %7132 }
 0x3ec   : > { %7340 = vrot.lane.b32.xlu0 %v6507_v52, %s8633_s2  ;;  %v12109_v28 = vpop.permute.xlu1 %7078  ;;  %14560 = vst [vmem:[#allocation32_spill] sm:$0xff] %v12113_v14  ;;  %v14577_v52 = vld [vmem:[#allocation58_spill] sm:$0xff] }
 0x3ed   : > { %7286 = vrot.lane.b32.xlu1 %v6987_v47, %s8632_s30  ;;  %14559 = vst [vmem:[#allocation66_spill] sm:$0xff] %v12109_v28  ;;  %v6784_v28 = vcombine.high %v12076_v59, %v14541_v31 }
 0x3ef   : > { %v12123_v10 = vpop.permute.xlu0 %7136 }
 0x3f0   : > { %7344 = vrot.lane.b32.xlu0 %v6703_v50, %s8633_s2  ;;  %v12119_v63 = vpop.permute.xlu1 %7082  ;;  %14562 = vst [vmem:[#allocation68_spill] sm:$0xff] %v12123_v10 }
 0x3f1   : > { %7322 = vrot.lane.b32.xlu1 %v5625_v51, %s8633_s2  ;;  %14561 = vst [vmem:[#allocation67_spill] sm:$0xff] %v12119_v63  ;;  %v6490_v51 = vcombine.high %v14577_v52, %v14541_v31  ;;  %v5528_v52 = vcombine.high %v5524_v5, %v14541_v31  ;;  %v5920_v63 = vcombine.high %v12157_v53, %v14541_v31 }
 0x3f3   : > { %v12134_v29 = vpop.permute.xlu0 %7140  ;;  %v12198_v17 = vrot.slane %v6490_v51, %v14536_v37 }
 0x3f4   : > { %7348 = vrot.lane.b32.xlu0 %v6899_v38, %s8633_s2  ;;  %v12131_v57 = vpop.permute.xlu1 %7086  ;;  %14565 = vst [vmem:[#allocation70_spill] sm:$0xff] %v12134_v29  ;;  %v14579_v38 = vld [vmem:[#allocation25_spill] sm:$0xff] }
 0x3f5   : > { %7326 = vrot.lane.b32.xlu1 %v5821_v34, %s8633_s2  ;;  %14564 = vst [vmem:[#allocation69_spill] sm:$0xff] %v12131_v57  ;;  %v6997_v34 = vcombine.high %v6987_v47, %v14541_v31  ;;  %v5608_v11 = vcombine.high %v14579_v38, %v14541_v31  ;;  %v6392_v38 = vcombine.high %v12046_v18, %v14541_v31  ;;  %v14597_v57 = vld [vmem:[#allocation44_spill] sm:$0xff] }
 0x3f6   : > { %v6588_v18 = vcombine.high %v12061_v8, %v14541_v31 }
 0x3f7   : > { %v12144_v21 = vpop.permute.xlu0 %7144  ;;  %v12208_v47 = vrot.slane %v5608_v11, %v14536_v37 }
 0x3f8   : > { %7384 = vrot.lane.b32.xlu0 %v5524_v5, %s8634_s5  ;;  %v12141_v43 = vpop.permute.xlu1 %7090  ;;  %14568 = vst [vmem:[#allocation72_spill] sm:$0xff] %v12144_v21  ;;  %v14589_v5 = vld [vmem:[#allocation39_spill] sm:$0xff] }
 0x3f9   : > { %7330 = vrot.lane.b32.xlu1 %v6017_v58, %s8633_s2  ;;  %14567 = vst [vmem:[#allocation71_spill] sm:$0xff] %v12141_v43  ;;  %v14580_v58 = vld [vmem:[#allocation59_spill] sm:$0xff] }
 0x3fa   : > { %v6686_v36 = vcombine.high %v14580_v58, %v14541_v31  ;;  %v14590_v58 = vld [vmem:[#allocation35_spill] sm:$0xff] }
 0x3fb   : > { %v12154_v56 = vpop.permute.xlu0 %7148 }
 0x3fc   : > { %7388 = vrot.lane.b32.xlu0 %v5720_v32, %s8634_s5  ;;  %v12151_v24 = vpop.permute.xlu1 %7094  ;;  %14571 = vst [vmem:[#allocation74_spill] sm:$0xff] %v12154_v56  ;;  %v12215_v39 = vrot.slane %v6686_v36, %v14536_v37  ;;  %v5072_v36 = vcombine.low %v14590_v58, %v14589_v5 }
 0x3fd   : > { %7334 = vrot.lane.b32.xlu1 %v6213_v25, %s8633_s2  ;;  %14570 = vst [vmem:[#allocation73_spill] sm:$0xff] %v12151_v24  ;;  %v5804_v25 = vcombine.high %v14537_v41, %v14541_v31  ;;  %v6000_v41 = vcombine.high %v12000_v62, %v14541_v31 }
 0x3fe   : > { %v5080_v8 = vrot.slane %v5072_v36, %v14539_v55  ;;  %v5073_v36 = vcombine.high %v14590_v58, %v14589_v5 }
 0x3ff   : > { %v12167_v40 = vpop.permute.xlu0 %7152  ;;  %v12226_v2 = vrot.slane %v5804_v25, %v14536_v37  ;;  %v12242_v54 = vrot.slane %v6000_v41, %v14536_v37  ;;  %v14592_v41 = vld [vmem:[#allocation40_spill] sm:$0xff] }
 0x400   : > { %7392 = vrot.lane.b32.xlu0 %v12157_v53, %s8634_s5  ;;  %v12164_v42 = vpop.permute.xlu1 %7130  ;;  %14574 = vst [vmem:[#allocation76_spill] sm:$0xff] %v12167_v40  ;;  %v14610_v40 = vld [vmem:[#allocation50_spill] sm:$0xff] }
 0x401   : > { %7338 = vrot.lane.b32.xlu1 %v6409_v26, %s8633_s2  ;;  %14573 = vst [vmem:[#allocation75_spill] sm:$0xff] %v12164_v42  ;;  %v6882_v26 = vcombine.high %v14545_v9, %v14541_v31  ;;  %v14611_v42 = vld [vmem:[#allocation46_spill] sm:$0xff] }
 0x402   : > { %v5392_v56 = vcombine.low %v14611_v42, %v14610_v40 }
 0x403   : > { %v12180_v33 = vpop.permute.xlu0 %7156  ;;  %v12233_v3 = vrot.slane %v6882_v26, %v14536_v37  ;;  %v12270_v26 = vrot.slane %v6392_v38, %v14536_v37 }
 0x404   : > { %7396 = vrot.lane.b32.xlu0 %v12170_v60, %s8634_s5  ;;  %v12177_v44 = vpop.permute.xlu1 %7134 }
 0x405   : > { %7342 = vrot.lane.b32.xlu1 %v6605_v27, %s8633_s2  ;;  %14576 = vst [vmem:[#allocation77_spill] sm:$0xff] %v12177_v44 }
 0x407   : > { %v12195_v22 = vpop.permute.xlu0 %7192 }
 0x408   : > { %7400 = vrot.lane.b32.xlu0 %v12183_v23, %s8634_s5  ;;  %v12190_v50 = vpop.permute.xlu1 %7138 }
 0x409   : > { %7346 = vrot.lane.b32.xlu1 %v6801_v30, %s8633_s2  ;;  %14578 = vst [vmem:[#allocation78_spill] sm:$0xff] %v12190_v50  ;;  %v6196_v30 = vcombine.high %v12028_v16, %v14541_v31  ;;  %v5724_v16 = vcombine.high %v5720_v32, %v14541_v31  ;;  %v14594_v32 = vld [vmem:[#allocation47_spill] sm:$0xff] }
 0x40b   : > { %v12212_v1 = vpop.permute.xlu0 %7196 }
 0x40c   : > { %7404 = vrot.lane.b32.xlu0 %v12198_v17, %s8634_s5  ;;  %v12205_v61 = vpop.permute.xlu1 %7142  ;;  %14582 = vst [vmem:[#allocation80_spill] sm:$0xff] %v12212_v1 }
 0x40d   : > { %7350 = vrot.lane.b32.xlu1 %v6997_v34, %s8633_s2  ;;  %14581 = vst [vmem:[#allocation79_spill] sm:$0xff] %v12205_v61  ;;  %v12255_v34 = vrot.slane %v6196_v30, %v14536_v37  ;;  %v14593_v30 = vld [vmem:[#allocation36_spill] sm:$0xff]  ;;  %v12291_v61 = vrot.slane %v6588_v18, %v14536_v37  ;;  %s13885_s2 = scalar_lea.hbm %s13942_s1, %s8425_s4 }
 0x40e   : > { %v5089_v59 = vcombine.high %v14593_v30, %v14592_v41 }
 0x40f   : > { %v12230_v27 = vpop.permute.xlu0 %7200 }
 0x410   : > { %7408 = vrot.lane.b32.xlu0 %v12215_v39, %s8634_s5  ;;  %v12223_v13 = vpop.permute.xlu1 %7146  ;;  %14584 = vst [vmem:[#allocation82_spill] sm:$0xff] %v12230_v27 }
 0x411   : > { %7386 = vrot.lane.b32.xlu1 %v12208_v47, %s8634_s5  ;;  %14583 = vst [vmem:[#allocation81_spill] sm:$0xff] %v12223_v13 }
 0x413   : > { %v12246_v62 = vpop.permute.xlu0 %7204 }
 0x414   : > { %7412 = vrot.lane.b32.xlu0 %v12233_v3, %s8634_s5  ;;  %v12239_v9 = vpop.permute.xlu1 %7150  ;;  %14586 = vst [vmem:[#allocation84_spill] sm:$0xff] %v12246_v62 }
 0x415   : > { %7390 = vrot.lane.b32.xlu1 %v12226_v2, %s8634_s5  ;;  %14585 = vst [vmem:[#allocation83_spill] sm:$0xff] %v12239_v9  ;;  %v14596_v9 = vld [vmem:[#allocation48_spill] sm:$0xff] }
 0x416   : > { %v5121_v18 = vcombine.high %v14597_v57, %v14596_v9 }
 0x417   : > { %v12259_v11 = vpop.permute.xlu0 %7208 }
 0x418   : > { %7448 = vrot.lane.b32.xlu0 %v5528_v52, %s8635_s12  ;;  %v12252_v51 = vpop.permute.xlu1 %7154  ;;  %14588 = vst [vmem:[#allocation86_spill] sm:$0xff] %v12259_v11  ;;  %v5088_v52 = vcombine.low %v14593_v30, %v14592_v41  ;;  %v6312_v41 = vcombine.high %v12183_v23, %v14541_v31 }
 0x419   : > { %7394 = vrot.lane.b32.xlu1 %v12242_v54, %s8634_s5  ;;  %14587 = vst [vmem:[#allocation85_spill] sm:$0xff] %v12252_v51  ;;  %v14595_v51 = vld [vmem:[#allocation43_spill] sm:$0xff] }
 0x41a   : > { %v5104_v43 = vcombine.low %v14595_v51, %v14594_v32  ;;  %v5096_v50 = vrot.slane %v5088_v52, %v14539_v55 }
 0x41b   : > { %v12280_v13 = vpop.permute.xlu0 %7212 }
 0x41c   : > { %7452 = vrot.lane.b32.xlu0 %v5724_v16, %s8635_s12  ;;  %v12267_v25 = vpop.permute.xlu1 %7158  ;;  %v5120_v16 = vcombine.low %v14597_v57, %v14596_v9  ;;  %14598 = vst [vmem:[#allocation88_spill] sm:$0xff] %v12280_v13  ;;  %v5112_v46 = vrot.slane %v5104_v43, %v14539_v55  ;;  %v5105_v43 = vcombine.high %v14595_v51, %v14594_v32 }
 0x41d   : > { %7398 = vrot.lane.b32.xlu1 %v12255_v34, %s8634_s5  ;;  %14591 = vst [vmem:[#allocation87_spill] sm:$0xff] %v12267_v25  ;;  %v5136_v5 = vcombine.low %v5080_v8, %v5096_v50  ;;  %v5087_v57 = vrot.slane %v5073_v36, %v14539_v55  ;;  %v5103_v9 = vrot.slane %v5089_v59, %v14539_v55 }
 0x41e   : > { %v5128_v53 = vrot.slane %v5120_v16, %v14539_v55  ;;  %v6980_v16 = vcombine.high %v12091_v20, %v14541_v31  ;;  %v5119_v51 = vrot.slane %v5105_v43, %v14539_v55  ;;  %v5135_v20 = vrot.slane %v5121_v18, %v14539_v55  ;;  %v14603_v43 = vld [vmem:[#allocation41_spill] sm:$0xff] }
 0x41f   : > { %v12298_v13 = vpop.permute.xlu0 %7216  ;;  %v12337_v23 = vrot.slane %v5136_v5, %v14536_v37  ;;  %v14604_v18 = vld [vmem:[#allocation37_spill] sm:$0xff]  ;;  %v5626_v25 = vcombine.high %v12208_v47, %v14541_v31 }
 0x420   : > { %7456 = vrot.lane.b32.xlu0 %v5920_v63, %s8635_s12  ;;  %v12288_v38 = vpop.permute.xlu1 %7194  ;;  %14600 = vst [vmem:[#allocation90_spill] sm:$0xff] %v12298_v13  ;;  %v6116_v63 = vcombine.high %v12170_v60, %v14541_v31  ;;  %v12316_v60 = vrot.slane %v6784_v28, %v14536_v37  ;;  %v5168_v58 = vcombine.low %v5112_v46, %v5128_v53 }
 0x421   : > { %7402 = vrot.lane.b32.xlu1 %v12270_v26, %s8634_s5  ;;  %14599 = vst [vmem:[#allocation89_spill] sm:$0xff] %v12288_v38  ;;  %v5137_v28 = vcombine.high %v5080_v8, %v5096_v50  ;;  %v12334_v32 = vrot.slane %v6980_v16, %v14536_v37  ;;  %v6508_v50 = vcombine.high %v12198_v17, %v14541_v31 }
 0x422   : > { %v12340_v36 = vrot.slane %v5168_v58, %v14536_v37  ;;  %v5152_v8 = vcombine.low %v5087_v57, %v5103_v9  ;;  %v5344_v16 = vcombine.low %v14604_v18, %v14603_v43  ;;  %v14607_v58 = vld [vmem:[#allocation49_spill] sm:$0xff]  ;;  %v5185_v15 = vcombine.high %v5119_v51, %v5135_v20 }
 0x423   : > { %v12320_v13 = vpop.permute.xlu0 %7220 }
 0x424   : > { %7460 = vrot.lane.b32.xlu0 %v6116_v63, %s8635_s12  ;;  %v12313_v52 = vpop.permute.xlu1 %7198  ;;  %v5169_v63 = vcombine.high %v5112_v46, %v5128_v53  ;;  %v12354_v46 = vrot.slane %v5137_v28, %v14536_v37  ;;  %v5184_v53 = vcombine.low %v5119_v51, %v5135_v20  ;;  %v6704_v28 = vcombine.high %v12215_v39, %v14541_v31 }
 0x425   : > { %7406 = vrot.lane.b32.xlu1 %v12291_v61, %s8634_s5  ;;  %14601 = vst [vmem:[#allocation91_spill] sm:$0xff] %v12313_v52  ;;  %v14608_v52 = vld [vmem:[#allocation45_spill] sm:$0xff]  ;;  %v12377_v47 = vrot.slane %v5152_v8, %v14536_v37  ;;  %v6900_v8 = vcombine.high %v12233_v3, %v14541_v31 }
 0x426   : > { %v5376_v38 = vcombine.low %v14608_v52, %v14607_v58  ;;  %v12363_v44 = vrot.slane %v5169_v63, %v14536_v37  ;;  %v5352_v63 = vrot.slane %v5344_v16, %v14539_v55  ;;  %v12383_v21 = vrot.slane %v5184_v53, %v14536_v37 }
 0x427   : > { %v12342_v59 = vpop.permute.xlu0 %7256  ;;  %v12413_v16 = vrot.slane %v5185_v15, %v14536_v37  ;;  %v5393_v53 = vcombine.high %v14611_v42, %v14610_v40 }
 0x428   : > { %7464 = vrot.lane.b32.xlu0 %v6312_v41, %s8635_s12  ;;  %v12331_v30 = vpop.permute.xlu1 %7202  ;;  %v14605_v41 = vld [vmem:[#allocation42_spill] sm:$0xff]  ;;  %v5384_v39 = vrot.slane %v5376_v38, %v14539_v55  ;;  %v12401_v20 = vcombine.low %v12354_v46, %v12363_v44  ;;  %v5205_v62 = vcombine.high %v12377_v47, %v12383_v21 }
 0x429   : > { %7410 = vrot.lane.b32.xlu1 %v12316_v60, %s8634_s5  ;;  %14602 = vst [vmem:[#allocation92_spill] sm:$0xff] %v12331_v30  ;;  %v14606_v30 = vld [vmem:[#allocation38_spill] sm:$0xff] }
 0x42a   : > { %v5360_v5 = vcombine.low %v14606_v30, %v14605_v41  ;;  %v12431_v15 = vrot.slane %v12401_v20, %v14539_v55 }
 0x42b   : > { %v12367_v24 = vpop.permute.xlu0 %7260 }
 0x42c   : > { %7468 = vrot.lane.b32.xlu0 %v6508_v50, %s8635_s12  ;;  %v12358_v17 = vpop.permute.xlu1 %7206  ;;  %14612 = vst [vmem:[#allocation94_spill] sm:$0xff] %v12367_v24  ;;  %v12373_v50 = vcombine.low %v12337_v23, %v12340_v36  ;;  %v5368_v11 = vrot.slane %v5360_v5, %v14539_v55  ;;  %v5377_v5 = vcombine.high %v14608_v52, %v14607_v58 }
 0x42d   : > { %7414 = vrot.lane.b32.xlu1 %v12334_v32, %s8634_s5  ;;  %14609 = vst [vmem:[#allocation93_spill] sm:$0xff] %v12358_v17  ;;  %v5153_v17 = vcombine.high %v5087_v57, %v5103_v9  ;;  %v5400_v57 = vrot.slane %v5392_v56, %v14539_v55  ;;  %v5345_v56 = vcombine.high %v14604_v18, %v14603_v43  ;;  %s8539_s5 = scalar_lea.vmem %s13888_s27, 512 }
 0x42e   : > { %v12397_v51 = vrot.slane %v12373_v50, %v14539_v55  ;;  %v5408_v3 = vcombine.low %v5352_v63, %v5368_v11  ;;  %v6018_v43 = vcombine.high %v12242_v54, %v14541_v31  ;;  %v12435_v52 = vcombine.low %v12377_v47, %v12383_v21  ;;  %p8540_p8 = scmp.ne.s32.totalorder %s13888_s27, %s8539_s5 }
 0x42f   : > { %v12391_v9 = vpop.permute.xlu0 %7264  ;;  %v12405_v38 = vrot.slane %v5153_v17, %v14536_v37  ;;  %v5440_v18 = vcombine.low %v5384_v39, %v5400_v57  ;;  %v5359_v42 = vrot.slane %v5345_v56, %v14539_v55  ;;  %v5409_v54 = vcombine.high %v5352_v63, %v5368_v11 }
 0x430   : > { %7472 = vrot.lane.b32.xlu0 %v6704_v28, %s8635_s12  ;;  %v12386_v49 = vpop.permute.xlu1 %7210  ;;  %14614 = vst [vmem:[#allocation96_spill] sm:$0xff] %v12391_v9  ;;  %v5391_v58 = vrot.slane %v5377_v5, %v14539_v55  ;;  %v12458_v63 = vrot.slane %v12431_v15, %v14536_v37  ;;  %v12604_v47 = vrot.slane %v5205_v62, %v14539_v55  ;;  %p8541_p11 = pnand %p8540_p8, %p14821_p9 }
 0x431   : > { %7450 = vrot.lane.b32.xlu1 %v5626_v25, %s8635_s12  ;;  %14613 = vst [vmem:[#allocation95_spill] sm:$0xff] %v12386_v49  ;;  %v5822_v25 = vcombine.high %v12226_v2, %v14541_v31  ;;  %v5361_v2 = vcombine.high %v14606_v30, %v14605_v41  ;;  %v12427_v30 = vrot.slane %v12397_v51, %v14536_v37 }
 0x432   : > { %v12441_v41 = vrot.slane %v5408_v3, %v14536_v37  ;;  %v12452_v56 = vrot.slane %v5440_v18, %v14536_v37  ;;  %v5207_v9 = vcombine.high %v12405_v38, %v12413_v16  ;;  %p8542_p0 = pneg %p8541_p11 }
 0x433   : > { %v12423_v28 = vpop.permute.xlu0 %7268  ;;  %v5375_v40 = vrot.slane %v5361_v2, %v14539_v55  ;;  %v12462_v2 = vrot.slane %v12435_v52, %v14539_v55 }
 0x434   : > { %7476 = vrot.lane.b32.xlu0 %v6900_v8, %s8635_s12  ;;  %v12419_v17 = vpop.permute.xlu1 %7214  ;;  %14616 = vst [vmem:[#allocation98_spill] sm:$0xff] %v12423_v28  ;;  %v5441_v8 = vcombine.high %v5384_v39, %v5400_v57  ;;  %v12466_v39 = vcombine.low %v12405_v38, %v12413_v16  ;;  %v12493_v49 = vcombine.low %v12441_v41, %v12452_v56 }
 0x435   : > { %7454 = vrot.lane.b32.xlu1 %v5822_v25, %s8635_s12  ;;  %14615 = vst [vmem:[#allocation97_spill] sm:$0xff] %v12419_v17  ;;  %v5407_v25 = vrot.slane %v5393_v53, %v14539_v55  ;;  %v5424_v57 = vcombine.low %v5359_v42, %v5375_v40  ;;  %v6410_v53 = vcombine.high %v12270_v26, %v14541_v31 }
 0x436   : > { %v12479_v18 = vrot.slane %v5441_v8, %v14536_v37  ;;  %v5425_v26 = vcombine.high %v5359_v42, %v5375_v40  ;;  %v12516_v42 = vrot.slane %v12493_v49, %v14539_v55  ;;  %v12619_v62 = vrot.slane %v5207_v9, %v14539_v55 }
 0x437   : > { %v12454_v11 = vpop.permute.xlu0 %7272  ;;  %v5456_v3 = vcombine.low %v5391_v58, %v5407_v25  ;;  %v12499_v8 = vrot.slane %v5424_v57, %v14536_v37  ;;  %v5201_v57 = vcombine.high %v12337_v23, %v12340_v36  ;;  %v6998_v23 = vcombine.high %v12334_v32, %v14541_v31 }
 0x438   : > { %7512 = vrot.lane.b32.xlu0 %v12427_v30, %s8636_s13  ;;  %v12447_v17 = vpop.permute.xlu1 %7218  ;;  %14618 = vst [vmem:[#allocation100_spill] sm:$0xff] %v12454_v11  ;;  %v6606_v11 = vcombine.high %v12291_v61, %v14541_v31  ;;  %v12526_v61 = vrot.slane %v5425_v26, %v14536_v37  ;;  %v5473_v38 = vcombine.high %v12441_v41, %v12452_v56 }
 0x439   : > { %7458 = vrot.lane.b32.xlu1 %v6018_v43, %s8635_s12  ;;  %14617 = vst [vmem:[#allocation99_spill] sm:$0xff] %v12447_v17  ;;  %v6214_v43 = vcombine.high %v12255_v34, %v14541_v31  ;;  %v12472_v34 = vrot.slane %v5409_v54, %v14536_v37  ;;  %v12489_v54 = vrot.slane %v12466_v39, %v14539_v55 }
 0x43a   : > { %v12506_v12 = vrot.slane %v5456_v3, %v14536_v37  ;;  %v12634_v9 = vrot.slane %v5473_v38, %v14539_v55 }
 0x43b   : > { %v12481_v17 = vpop.permute.xlu0 %7276  ;;  %v12520_v40 = vcombine.low %v12472_v34, %v12479_v18  ;;  %v5475_v41 = vcombine.high %v12472_v34, %v12479_v18 }
 0x43c   : > { %7516 = vrot.lane.b32.xlu0 %v12458_v63, %s8636_s13  ;;  %v12474_v5 = vpop.permute.xlu1 %7222  ;;  %14620 = vst [vmem:[#allocation102_spill] sm:$0xff] %v12481_v17  ;;  %v5457_v17 = vcombine.high %v5391_v58, %v5407_v25  ;;  %v6802_v25 = vcombine.high %v12316_v60, %v14541_v31  ;;  %v5477_v34 = vcombine.high %v12499_v8, %v12506_v12 }
 0x43d   : > { %7462 = vrot.lane.b32.xlu1 %v6214_v43, %s8635_s12  ;;  %14619 = vst [vmem:[#allocation101_spill] sm:$0xff] %v12474_v5  ;;  %v12485_v43 = vrot.slane %v12462_v2, %v14536_v37  ;;  %v12545_v26 = vrot.slane %v12520_v40, %v14539_v55  ;;  %v12649_v38 = vrot.slane %v5475_v41, %v14539_v55 }
 0x43e   : > { %v12535_v3 = vrot.slane %v5457_v17, %v14536_v37  ;;  %v12559_v17 = vrot.slane %v5201_v57, %v14539_v55  ;;  %v12664_v41 = vrot.slane %v5477_v34, %v14539_v55 }
 0x43f   : > { %v12508_v7 = vpop.permute.xlu0 %7280  ;;  %v12567_v0 = vrot.slane %v12545_v26, %v14536_v37 }
 0x440   : > { %7520 = vrot.lane.b32.xlu0 %v12485_v43, %s8636_s13  ;;  %14622 = vst [vmem:[#allocation104_spill] sm:$0xff] %v12508_v7 }
 0x441   : > { %7466 = vrot.lane.b32.xlu1 %v6410_v53, %s8635_s12  ;;  %v12512_v53 = vrot.slane %v12489_v54, %v14536_v37 }
 0x442   : > { %v12501_v5 = vpop.permute.xlu1 %7258 }
 0x443   : > { %14621 = vst [vmem:[#allocation103_spill] sm:$0xff] %v12501_v5  ;;  %v5203_v5 = vcombine.high %v12354_v46, %v12363_v44  ;;  %v5649_v46 = vrot.slane %v12559_v17, %v14536_v37 }
 0x444   : > { %7524 = vrot.lane.b32.xlu0 %v12512_v53, %s8636_s13 }
 0x445   : > { %7470 = vrot.lane.b32.xlu1 %v6606_v11, %s8635_s12  ;;  %v12541_v11 = vrot.slane %v12516_v42, %v14536_v37  ;;  %v12585_v57 = vrot.slane %v5203_v5, %v14539_v55 }
 0x446   : > { %v12537_v7 = vpop.permute.xlu0 %7284 }
 0x447   : > { %v12528_v58 = vpop.permute.xlu1 %7262  ;;  %v5845_v5 = vrot.slane %v12585_v57, %v14536_v37 }
 0x448   : > { %14623 = vst [vmem:[#allocation105_spill] sm:$0xff] %v12528_v58  ;;  %v12549_v58 = vcombine.low %v12499_v8, %v12506_v12  ;;  %7528 = vrot.lane.b32.xlu0 %v12541_v11, %s8636_s13  ;;  %v5479_v8 = vcombine.high %v12526_v61, %v12535_v3 }
 0x449   : > { %7474 = vrot.lane.b32.xlu1 %v6802_v25, %s8635_s12 }
 0x44a   : > { %v12563_v28 = vpop.permute.xlu0 %7320  ;;  %v12571_v25 = vrot.slane %v12549_v58, %v14539_v55  ;;  %v12679_v34 = vrot.slane %v5479_v8, %v14539_v55  ;;  %v6554_v8 = vcombine.high %v12567_v0, %v14541_v31 }
 0x44b   : > { %v12554_v60 = vpop.permute.xlu1 %7266 }
 0x44c   : > { %14624 = vst [vmem:[#allocation106_spill] sm:$0xff] %v12554_v60  ;;  %v12575_v60 = vcombine.low %v12526_v61, %v12535_v3  ;;  %7532 = vrot.lane.b32.xlu0 %v12567_v0, %s8636_s13  ;;  %v6727_v4 = vrot.slane %v12571_v25, %v14536_v37  ;;  %v6358_v61 = vcombine.high %v12541_v11, %v14541_v31 }
 0x44d   : > { %7478 = vrot.lane.b32.xlu1 %v6998_v23, %s8635_s12  ;;  %v5672_v11 = vcombine.high %v5649_v46, %v14541_v31  ;;  %v5868_v0 = vcombine.high %v5845_v5, %v14541_v31  ;;  %s8644_s12 = smov [#allocation5]  }
 0x44e   : > { %v12589_v29 = vpop.permute.xlu0 %7324  ;;  %v12595_v23 = vrot.slane %v12575_v60, %v14539_v55 }
 0x44f   : > { %v12580_v32 = vpop.permute.xlu1 %7270  ;;  %14626 = vst [vmem:[#allocation108_spill] sm:$0xff] %v12589_v29 }
 0x450   : > { %14625 = vst [vmem:[#allocation107_spill] sm:$0xff] %v12580_v32  ;;  %7536 = vrot.lane.b32.xlu0 %v6727_v4, %s8636_s13  ;;  %v6923_v10 = vrot.slane %v12595_v23, %v14536_v37 }
 0x451   : > { %7514 = vrot.lane.b32.xlu1 %v5649_v46, %s8636_s13 }
 0x452   : > { %v12608_v27 = vpop.permute.xlu0 %7328 }
 0x453   : > { %v12599_v32 = vpop.permute.xlu1 %7274  ;;  %14628 = vst [vmem:[#allocation110_spill] sm:$0xff] %v12608_v27  ;;  %v5574_v27 = vcombine.high %v12427_v30, %v14541_v31  ;;  %v5770_v30 = vcombine.high %v12458_v63, %v14541_v31  ;;  %v5966_v63 = vcombine.high %v12485_v43, %v14541_v31  ;;  %v6162_v43 = vcombine.high %v12512_v53, %v14541_v31 }
 0x454   : > { %14627 = vst [vmem:[#allocation109_spill] sm:$0xff] %v12599_v32  ;;  %7540 = vrot.lane.b32.xlu0 %v6923_v10, %s8636_s13  ;;  %v6041_v32 = vrot.slane %v12604_v47, %v14536_v37 }
 0x455   : > { %7518 = vrot.lane.b32.xlu1 %v5845_v5, %s8636_s13  ;;  %v5740_v5 = vcombine.high %v12431_v15, %v14541_v31 }
 0x456   : > { %v12623_v48 = vpop.permute.xlu0 %7332  ;;  %v6064_v46 = vcombine.high %v6041_v32, %v14541_v31 }
 0x457   : > { %v12614_v29 = vpop.permute.xlu1 %7278  ;;  %14630 = vst [vmem:[#allocation112_spill] sm:$0xff] %v12623_v48 }
 0x458   : > { %14629 = vst [vmem:[#allocation111_spill] sm:$0xff] %v12614_v29  ;;  %7576 = vrot.lane.b32.xlu0 %v5574_v27, %s8637_s15  ;;  %v6237_v29 = vrot.slane %v12619_v62, %v14536_v37 }
 0x459   : > { %7522 = vrot.lane.b32.xlu1 %v6041_v32, %s8636_s13  ;;  %v5936_v32 = vcombine.high %v12462_v2, %v14541_v31 }
 0x45a   : > { %v12638_v1 = vpop.permute.xlu0 %7336 }
 0x45b   : > { %v12629_v24 = vpop.permute.xlu1 %7282  ;;  %14632 = vst [vmem:[#allocation114_spill] sm:$0xff] %v12638_v1 }
 0x45c   : > { %14631 = vst [vmem:[#allocation113_spill] sm:$0xff] %v12629_v24  ;;  %7580 = vrot.lane.b32.xlu0 %v5770_v30, %s8637_s15  ;;  %v6433_v24 = vrot.slane %v12634_v9, %v14536_v37 }
 0x45d   : > { %7526 = vrot.lane.b32.xlu1 %v6237_v29, %s8636_s13 }
 0x45e   : > { %v12653_v48 = vpop.permute.xlu0 %7340  ;;  %v6456_v15 = vcombine.high %v6433_v24, %v14541_v31 }
 0x45f   : > { %v12644_v27 = vpop.permute.xlu1 %7286  ;;  %14634 = vst [vmem:[#allocation116_spill] sm:$0xff] %v12653_v48 }
 0x460   : > { %14633 = vst [vmem:[#allocation115_spill] sm:$0xff] %v12644_v27  ;;  %7584 = vrot.lane.b32.xlu0 %v5966_v63, %s8637_s15  ;;  %v6629_v27 = vrot.slane %v12649_v38, %v14536_v37 }
 0x461   : > { %7530 = vrot.lane.b32.xlu1 %v6433_v24, %s8636_s13  ;;  %v6328_v24 = vcombine.high %v12516_v42, %v14541_v31 }
 0x462   : > { %v12668_v1 = vpop.permute.xlu0 %7344 }
 0x463   : > { %v12659_v30 = vpop.permute.xlu1 %7322  ;;  %14636 = vst [vmem:[#allocation118_spill] sm:$0xff] %v12668_v1 }
 0x464   : > { %14635 = vst [vmem:[#allocation117_spill] sm:$0xff] %v12659_v30  ;;  %7588 = vrot.lane.b32.xlu0 %v6162_v43, %s8637_s15  ;;  %v6825_v30 = vrot.slane %v12664_v41, %v14536_v37  ;;  %v7021_v43 = vrot.slane %v12679_v34, %v14536_v37 }
 0x465   : > { %7534 = vrot.lane.b32.xlu1 %v6629_v27, %s8636_s13 }
 0x466   : > { %v12681_v48 = vpop.permute.xlu0 %7348 }
 0x467   : > { %v12674_v63 = vpop.permute.xlu1 %7326 }
 0x468   : > { %14637 = vst [vmem:[#allocation119_spill] sm:$0xff] %v12674_v63  ;;  %7592 = vrot.lane.b32.xlu0 %v6358_v61, %s8637_s15  ;;  %v6750_v61 = vcombine.high %v6727_v4, %v14541_v31 }
 0x469   : > { %7538 = vrot.lane.b32.xlu1 %v6825_v30, %s8636_s13 }
 0x46a   : > { %v12691_v63 = vpop.permute.xlu0 %7384 }
 0x46b   : > { %v12687_v53 = vpop.permute.xlu1 %7330  ;;  %14639 = vst [vmem:[#allocation121_spill] sm:$0xff] %v12691_v63 }
 0x46c   : > { %14638 = vst [vmem:[#allocation120_spill] sm:$0xff] %v12687_v53  ;;  %7596 = vrot.lane.b32.xlu0 %v6554_v8, %s8637_s15  ;;  %v6946_v8 = vcombine.high %v6923_v10, %v14541_v31 }
 0x46d   : > { %7542 = vrot.lane.b32.xlu1 %v7021_v43, %s8636_s13  ;;  %s8543_s13 = sshll.u32 %s8644_s12, 4  ;;  %s8544_s13 = int_to_ptr.vmem [resolvable:$false] %s8543_s13 }
 0x46e   : > { %v12700_v14 = vpop.permute.xlu0 %7388  ;;  %p8546_p6 = scmp.lt.s32.totalorder %s13888_s27, %s8544_s13 }
 0x46f   : > { %v12697_v1 = vpop.permute.xlu1 %7334 }
 0x470   : > { %14640 = vst [vmem:[#allocation122_spill] sm:$0xff] %v12697_v1  ;;  %7600 = vrot.lane.b32.xlu0 %v6750_v61, %s8637_s15  ;;  %v5544_v1 = vcombine.high %v12397_v51, %v14541_v31  ;;  %v6260_v51 = vcombine.high %v6237_v29, %v14541_v31  ;;  %v6132_v29 = vcombine.high %v12489_v54, %v14541_v31 }
 0x471   : > { %7578 = vrot.lane.b32.xlu1 %v5672_v11, %s8637_s15 }
 0x472   : > { %v12708_v63 = vpop.permute.xlu0 %7392  ;;  %v5558_v61 = vrot.slane %v5544_v1, %v14536_v37 }
 0x473   : > { %v12705_v53 = vpop.permute.xlu1 %7338 }
 0x474   : > { %14641 = vst [vmem:[#allocation123_spill] sm:$0xff] %v12705_v53  ;;  %7604 = vrot.lane.b32.xlu0 %v6946_v8, %s8637_s15  ;;  %v5754_v8 = vrot.slane %v5740_v5, %v14536_v37  ;;  %v6652_v5 = vcombine.high %v6629_v27, %v14541_v31  ;;  %v6342_v53 = vrot.slane %v6328_v24, %v14536_v37 }
 0x475   : > { %7582 = vrot.lane.b32.xlu1 %v5868_v0, %s8637_s15  ;;  %v6524_v27 = vcombine.high %v12545_v26, %v14541_v31  ;;  %v6720_v24 = vcombine.high %v12571_v25, %v14541_v31 }
 0x476   : > { %v12718_v11 = vpop.permute.xlu0 %7396 }
 0x477   : > { %v12715_v4 = vpop.permute.xlu1 %7342 }
 0x478   : > { %14642 = vst [vmem:[#allocation124_spill] sm:$0xff] %v12715_v4  ;;  %7640 = vrot.lane.b32.xlu0 %v5558_v61, %s8638_s16  ;;  %v6146_v4 = vrot.slane %v6132_v29, %v14536_v37  ;;  %v7044_v29 = vcombine.high %v7021_v43, %v14541_v31  ;;  %v5838_v43 = vcombine.high %v12585_v57, %v14541_v31 }
 0x479   : > { %7586 = vrot.lane.b32.xlu1 %v6064_v46, %s8637_s15 }
 0x47a   : > { %v12728_v0 = vpop.permute.xlu0 %7400 }
 0x47b   : > { %v12725_v10 = vpop.permute.xlu1 %7346  ;;  %14644 = vst [vmem:[#allocation127_spill] sm:$0xff] %v12728_v0 }
 0x47c   : > { %14643 = vst [vmem:[#allocation125_spill] sm:$0xff] %v12725_v10  ;;  %7644 = vrot.lane.b32.xlu0 %v5754_v8, %s8638_s16  ;;  %v5950_v10 = vrot.slane %v5936_v32, %v14536_v37  ;;  %v6848_v32 = vcombine.high %v6825_v30, %v14541_v31  ;;  %v6538_v30 = vrot.slane %v6524_v27, %v14536_v37 }
 0x47d   : > { %7590 = vrot.lane.b32.xlu1 %v6260_v51, %s8637_s15  ;;  %v6916_v27 = vcombine.high %v12595_v23, %v14541_v31 }
 0x47e   : > { %v12738_v46 = vpop.permute.xlu0 %7404 }
 0x47f   : > { %v12735_v1 = vpop.permute.xlu1 %7350  ;;  %14646 = vst [vmem:[#allocation129_spill] sm:$0xff] %v12738_v46  ;;  %v6930_v57 = vrot.slane %v6916_v27, %v14536_v37 }
 0x480   : > { %14645 = vst [vmem:[#allocation128_spill] sm:$0xff] %v12735_v1  ;;  %7648 = vrot.lane.b32.xlu0 %v5950_v10, %s8638_s16 }
 0x481   : > { %7594 = vrot.lane.b32.xlu1 %v6456_v15, %s8637_s15 }
 0x482   : > { %v12748_v51 = vpop.permute.xlu0 %7408 }
 0x483   : > { %v12745_v2 = vpop.permute.xlu1 %7386  ;;  %14648 = vst [vmem:[#allocation131_spill] sm:$0xff] %v12748_v51 }
 0x484   : > { %14647 = vst [vmem:[#allocation130_spill] sm:$0xff] %v12745_v2  ;;  %7652 = vrot.lane.b32.xlu0 %v6146_v4, %s8638_s16 }
 0x485   : > { %7598 = vrot.lane.b32.xlu1 %v6652_v5, %s8637_s15  ;;  %v5642_v5 = vcombine.high %v12559_v17, %v14541_v31  ;;  %v6734_v17 = vrot.slane %v6720_v24, %v14536_v37 }
 0x486   : > { %v12758_v15 = vpop.permute.xlu0 %7412 }
 0x487   : > { %v12755_v54 = vpop.permute.xlu1 %7390 }
 0x488   : > { %14649 = vst [vmem:[#allocation132_spill] sm:$0xff] %v12755_v54  ;;  %7656 = vrot.lane.b32.xlu0 %v6342_v53, %s8638_s16 }
 0x489   : > { %7602 = vrot.lane.b32.xlu1 %v6848_v32, %s8637_s15  ;;  %v5656_v32 = vrot.slane %v5642_v5, %v14536_v37  ;;  %v6034_v5 = vcombine.high %v12604_v47, %v14541_v31 }
 0x48a   : > { %v12770_v54 = vpop.permute.xlu0 %7448 }
 0x48b   : > { %v12765_v42 = vpop.permute.xlu1 %7394  ;;  %v6048_v24 = vrot.slane %v6034_v5, %v14536_v37  ;;  %v5771_v5 = vcombine.high %v5754_v8, %v14541_v31 }
 0x48c   : > { %14650 = vst [vmem:[#allocation133_spill] sm:$0xff] %v12765_v42  ;;  %7660 = vrot.lane.b32.xlu0 %v6538_v30, %s8638_s16 }
 0x48d   : > { %7606 = vrot.lane.b32.xlu1 %v7044_v29, %s8637_s15  ;;  %v5852_v29 = vrot.slane %v5838_v43, %v14536_v37  ;;  %v5575_v43 = vcombine.high %v5558_v61, %v14541_v31  ;;  %s8545_s15 = scalar_lea.vmem %s8544_s13, 1024 }
 0x48e   : > { %v12782_v42 = vpop.permute.xlu0 %7452  ;;  %p8547_p13 = scmp.lt.s32.totalorder %s8545_s15, %s8539_s5 }
 0x48f   : > { %v12777_v26 = vpop.permute.xlu1 %7398 }
 0x490   : > { %14651 = vst [vmem:[#allocation134_spill] sm:$0xff] %v12777_v26  ;;  %7664 = vrot.lane.b32.xlu0 %v6734_v17, %s8638_s16  ;;  %p8548_p2 = por %p8547_p13, %p8546_p6 }
 0x491   : > { %7642 = vrot.lane.b32.xlu1 %v5656_v32, %s8638_s16 }
 0x492   : > { %v12794_v26 = vpop.permute.xlu0 %7456  ;;  %p8549_p5 = pnand %p8548_p2, %p8542_p0 }
 0x493   : > { %v12789_v25 = vpop.permute.xlu1 %7402 }
 0x494   : > { %14652 = vst [vmem:[#allocation135_spill] sm:$0xff] %v12789_v25  ;;  %7668 = vrot.lane.b32.xlu0 %v6930_v57, %s8638_s16  ;;  %v6230_v25 = vcombine.high %v12619_v62, %v14541_v31 }
 0x495   : > { %7646 = vrot.lane.b32.xlu1 %v5852_v29, %s8638_s16 }
 0x496   : > { %v12804_v51 = vpop.permute.xlu0 %7460  ;;  %v6244_v27 = vrot.slane %v6230_v25, %v14536_v37  ;;  %v5967_v25 = vcombine.high %v5950_v10, %v14541_v31 }
 0x497   : > { %v12799_v23 = vpop.permute.xlu1 %7406 }
 0x498   : > { %14653 = vst [vmem:[#allocation136_spill] sm:$0xff] %v12799_v23  ;;  %7704 = vrot.lane.b32.xlu0 %v5575_v43, %s8639_s17  ;;  %v6426_v23 = vcombine.high %v12634_v9, %v14541_v31  ;;  %v6622_v43 = vcombine.high %v12649_v38, %v14541_v31 }
 0x499   : > { %7650 = vrot.lane.b32.xlu1 %v6048_v24, %s8638_s16 }
 0x49a   : > { %v12814_v2 = vpop.permute.xlu0 %7464  ;;  %v6440_v61 = vrot.slane %v6426_v23, %v14536_v37  ;;  %v6636_v8 = vrot.slane %v6622_v43, %v14536_v37  ;;  %v6163_v23 = vcombine.high %v6146_v4, %v14541_v31  ;;  %v6359_v43 = vcombine.high %v6342_v53, %v14541_v31 }
 0x49b   : > { %v12809_v47 = vpop.permute.xlu1 %7410  ;;  %14655 = vst [vmem:[#allocation138_spill] sm:$0xff] %v12814_v2  ;;  %v5673_v53 = vcombine.high %v5656_v32, %v14541_v31 }
 0x49c   : > { %14654 = vst [vmem:[#allocation137_spill] sm:$0xff] %v12809_v47  ;;  %7708 = vrot.lane.b32.xlu0 %v5771_v5, %s8639_s17  ;;  %v6818_v5 = vcombine.high %v12664_v41, %v14541_v31 }
 0x49d   : > { %7654 = vrot.lane.b32.xlu1 %v6244_v27, %s8638_s16 }
 0x49e   : > { %v12824_v47 = vpop.permute.xlu0 %7468  ;;  %v6832_v10 = vrot.slane %v6818_v5, %v14536_v37 }
 0x49f   : > { %v12819_v62 = vpop.permute.xlu1 %7414  ;;  %14657 = vst [vmem:[#allocation139_spill] sm:$0xff] %v12824_v47 }
 0x4a0   : > { %14656 = vst [vmem:[#allocation141_spill] sm:$0xff] %v12819_v62  ;;  %7712 = vrot.lane.b32.xlu0 %v5967_v25, %s8639_s17  ;;  %v7014_v25 = vcombine.high %v12679_v34, %v14541_v31 }
 0x4a1   : > { %7658 = vrot.lane.b32.xlu1 %v6440_v61, %s8638_s16 }
 0x4a2   : > { %v12834_v62 = vpop.permute.xlu0 %7472  ;;  %v7028_v4 = vrot.slane %v7014_v25, %v14536_v37  ;;  %v5869_v25 = vcombine.high %v5852_v29, %v14541_v31 }
 0x4a3   : > { %v12829_v9 = vpop.permute.xlu1 %7450  ;;  %14659 = vst [vmem:[#allocation157_spill] sm:$0xff] %v12834_v62 }
 0x4a4   : > { %14658 = vst [vmem:[#allocation140_spill] sm:$0xff] %v12829_v9  ;;  %7716 = vrot.lane.b32.xlu0 %v6163_v23, %s8639_s17 }
 0x4a5   : > { %7662 = vrot.lane.b32.xlu1 %v6636_v8, %s8638_s16 }
 0x4a6   : > { %v12844_v9 = vpop.permute.xlu0 %7476 }
 0x4a7   : > { %v12839_v38 = vpop.permute.xlu1 %7454 }
 0x4a8   : > { %14660 = vst [vmem:[#allocation143_spill] sm:$0xff] %v12839_v38  ;;  %7720 = vrot.lane.b32.xlu0 %v6359_v43, %s8639_s17  ;;  %v6555_v38 = vcombine.high %v6538_v30, %v14541_v31  ;;  %v6751_v43 = vcombine.high %v6734_v17, %v14541_v31  ;;  %v5725_v17 = vcombine.high %v12401_v20, %v14541_v31 }
 0x4a9   : > { %7666 = vrot.lane.b32.xlu1 %v6832_v10, %s8638_s16  ;;  %v5921_v20 = vcombine.high %v12435_v52, %v14541_v31  ;;  %v6117_v52 = vcombine.high %v12466_v39, %v14541_v31  ;;  %v6313_v39 = vcombine.high %v12493_v49, %v14541_v31  ;;  %v6509_v49 = vcombine.high %v12520_v40, %v14541_v31 }
 0x4aa   : > { %v12852_v23 = vpop.permute.xlu0 %7512 }
 0x4ab   : > { %v12849_v41 = vpop.permute.xlu1 %7458  ;;  %v12960_v40 = vrot.slane %v6509_v49, %v14539_v55 }
 0x4ac   : > { %14661 = vst [vmem:[#allocation144_spill] sm:$0xff] %v12849_v41  ;;  %7724 = vrot.lane.b32.xlu0 %v6555_v38, %s8639_s17  ;;  %v5529_v41 = vcombine.high %v12373_v50, %v14541_v31 }
 0x4ad   : > { %7670 = vrot.lane.b32.xlu1 %v7028_v4, %s8638_s16 }
 0x4ae   : > { %v12860_v5 = vpop.permute.xlu0 %7516  ;;  %v12874_v32 = vrot.slane %v5529_v41, %v14539_v55 }
 0x4af   : > { %v12857_v34 = vpop.permute.xlu1 %7462 }
 0x4b0   : > { %14662 = vst [vmem:[#allocation173_spill] sm:$0xff] %v12857_v34  ;;  %7728 = vrot.lane.b32.xlu0 %v6751_v43, %s8639_s17  ;;  %v6947_v34 = vcombine.high %v6930_v57, %v14541_v31  ;;  %v12887_v29 = vrot.slane %v12874_v32, %v14536_v37  ;;  %v12890_v57 = vrot.slane %v5725_v17, %v14539_v55 }
 0x4b1   : > { %7706 = vrot.lane.b32.xlu1 %v5673_v53, %s8639_s17  ;;  %v6065_v53 = vcombine.high %v6048_v24, %v14541_v31  ;;  %v6261_v24 = vcombine.high %v6244_v27, %v14541_v31  ;;  %v12907_v17 = vrot.slane %v5921_v20, %v14539_v55  ;;  %v6457_v27 = vcombine.high %v6440_v61, %v14541_v31 }
 0x4b2   : > { %v12870_v38 = vpop.permute.xlu0 %7520  ;;  %v12924_v20 = vrot.slane %v6117_v52, %v14539_v55  ;;  %v6653_v61 = vcombine.high %v6636_v8, %v14541_v31  ;;  %v12941_v52 = vrot.slane %v6313_v39, %v14539_v55  ;;  %v6849_v8 = vcombine.high %v6832_v10, %v14541_v31 }
 0x4b3   : > { %v12867_v30 = vpop.permute.xlu1 %7466  ;;  %v5576_v2 = vcombine.high %v12887_v29, %v14541_v31 }
 0x4b4   : > { %14663 = vst [vmem:[#allocation145_spill] sm:$0xff] %v12867_v30  ;;  %7732 = vrot.lane.b32.xlu0 %v6947_v34, %s8639_s17  ;;  %v12938_v62 = vrot.slane %v12924_v20, %v14536_v37  ;;  %v12957_v39 = vrot.slane %v12941_v52, %v14536_v37 }
 0x4b5   : > { %7710 = vrot.lane.b32.xlu1 %v5869_v25, %s8639_s17  ;;  %v12904_v25 = vrot.slane %v12890_v57, %v14536_v37 }
 0x4b6   : > { %v12883_v43 = vpop.permute.xlu0 %7524 }
 0x4b7   : > { %v12880_v50 = vpop.permute.xlu1 %7470  ;;  %14665 = vst [vmem:[#allocation189_spill] sm:$0xff] %v12883_v43 }
 0x4b8   : > { %14664 = vst [vmem:[#allocation146_spill] sm:$0xff] %v12880_v50  ;;  %7768 = vrot.lane.b32.xlu0 %v12887_v29, %s8640_s22  ;;  %v12921_v50 = vrot.slane %v12907_v17, %v14536_v37  ;;  %v5772_v29 = vcombine.high %v12904_v25, %v14541_v31 }
 0x4b9   : > { %7714 = vrot.lane.b32.xlu1 %v6065_v53, %s8639_s17 }
 0x4ba   : > { %v12900_v34 = vpop.permute.xlu0 %7528 }
 0x4bb   : > { %v12897_v41 = vpop.permute.xlu1 %7474  ;;  %14667 = vst [vmem:[#allocation148_spill] sm:$0xff] %v12900_v34 }
 0x4bc   : > { %14666 = vst [vmem:[#allocation147_spill] sm:$0xff] %v12897_v41  ;;  %7772 = vrot.lane.b32.xlu0 %v12904_v25, %s8640_s22  ;;  %v5968_v25 = vcombine.high %v12921_v50, %v14541_v31 }
 0x4bd   : > { %7718 = vrot.lane.b32.xlu1 %v6261_v24, %s8639_s17 }
 0x4be   : > { %v12917_v41 = vpop.permute.xlu0 %7532 }
 0x4bf   : > { %v12914_v53 = vpop.permute.xlu1 %7478  ;;  %14669 = vst [vmem:[#allocation149_spill] sm:$0xff] %v12917_v41  ;;  %v8406_v41 = vcombine.high %v12363_v44, %v14541_v31 }
 0x4c0   : > { %14668 = vst [vmem:[#allocation205_spill] sm:$0xff] %v12914_v53  ;;  %7776 = vrot.lane.b32.xlu0 %v12921_v50, %s8640_s22  ;;  %v6164_v50 = vcombine.high %v12938_v62, %v14541_v31 }
 0x4c1   : > { %7722 = vrot.lane.b32.xlu1 %v6457_v27, %s8639_s17 }
 0x4c2   : > { %v12934_v30 = vpop.permute.xlu0 %7536 }
 0x4c3   : > { %v12931_v24 = vpop.permute.xlu1 %7514  ;;  %14671 = vst [vmem:[#allocation13_spill] sm:$0xff] %v12934_v30  ;;  %v8404_v30 = vcombine.high %v12340_v36, %v14541_v31  ;;  %v7045_v36 = vcombine.high %v7028_v4, %v14541_v31 }
 0x4c4   : > { %14670 = vst [vmem:[#allocation159_spill] sm:$0xff] %v12931_v24  ;;  %7780 = vrot.lane.b32.xlu0 %v12938_v62, %s8640_s22 }
 0x4c5   : > { %7726 = vrot.lane.b32.xlu1 %v6653_v61, %s8639_s17  ;;  %v6705_v61 = vcombine.high %v12549_v58, %v14541_v31  ;;  %v12979_v58 = vrot.slane %v12960_v40, %v14536_v37 }
 0x4c6   : > { %v12953_v24 = vpop.permute.xlu0 %7540 }
 0x4c7   : > { %v12948_v27 = vpop.permute.xlu1 %7518 }
 0x4c8   : > { %14672 = vst [vmem:[#allocation150_spill] sm:$0xff] %v12948_v27  ;;  %7784 = vrot.lane.b32.xlu0 %v12957_v39, %s8640_s22  ;;  %v12971_v27 = vrot.slane %v8404_v30, %v14539_v55  ;;  %v12994_v30 = vrot.slane %v8406_v41, %v14539_v55 }
 0x4c9   : > { %7730 = vrot.lane.b32.xlu1 %v6849_v8, %s8639_s17  ;;  %v12982_v8 = vrot.slane %v6705_v61, %v14539_v55  ;;  %v8408_v61 = vcombine.high %v12383_v21, %v14541_v31  ;;  %v8410_v21 = vcombine.high %v12413_v16, %v14541_v31  ;;  %v8412_v16 = vcombine.high %v12452_v56, %v14541_v31 }
 0x4ca   : > { %v12975_v49 = vpop.permute.xlu0 %7576  ;;  %v5664_v44 = vrot.slane %v12971_v27, %v14536_v37  ;;  %v5860_v41 = vrot.slane %v12994_v30, %v14536_v37  ;;  %v8414_v56 = vcombine.high %v12479_v18, %v14541_v31  ;;  %v8416_v18 = vcombine.high %v12506_v12, %v14541_v31 }
 0x4cb   : > { %v12967_v10 = vpop.permute.xlu1 %7522  ;;  %v13012_v47 = vrot.slane %v8408_v61, %v14539_v55  ;;  %v13027_v61 = vrot.slane %v8410_v21, %v14539_v55  ;;  %v13042_v21 = vrot.slane %v8412_v16, %v14539_v55  ;;  %v8418_v12 = vcombine.high %v12535_v3, %v14541_v31 }
 0x4cc   : > { %14673 = vst [vmem:[#allocation175_spill] sm:$0xff] %v12967_v10  ;;  %v6901_v10 = vcombine.high %v12575_v60, %v14541_v31  ;;  %7788 = vrot.lane.b32.xlu0 %v12979_v58, %s8640_s22  ;;  %v6742_v60 = vrot.slane %v12982_v8, %v14536_v37  ;;  %v13057_v16 = vrot.slane %v8414_v56, %v14539_v55 }
 0x4cd   : > { %7734 = vrot.lane.b32.xlu1 %v7045_v36, %s8639_s17  ;;  %v13072_v56 = vrot.slane %v8416_v18, %v14539_v55  ;;  %v13087_v18 = vrot.slane %v8418_v12, %v14539_v55  ;;  %v6360_v3 = vcombine.high %v12957_v39, %v14541_v31  ;;  %v5674_v39 = vcombine.high %v5664_v44, %v14541_v31 }
 0x4ce   : > { %v12998_v53 = vpop.permute.xlu0 %7580  ;;  %v13003_v36 = vrot.slane %v6901_v10, %v14539_v55  ;;  %v6556_v55 = vcombine.high %v12979_v58, %v14541_v31  ;;  %v5870_v58 = vcombine.high %v5860_v41, %v14541_v31 }
 0x4cf   : > { %v12989_v4 = vpop.permute.xlu1 %7526  ;;  %14685 = vst [vmem:[#allocation155_spill] sm:$0xff] %v13087_v18 }
 0x4d0   : > { %14674 = vst [vmem:[#allocation244_spill] sm:$0xff] %v12989_v4  ;;  %7792 = vrot.lane.b32.xlu0 %v6742_v60, %s8640_s22  ;;  %v6938_v10 = vrot.slane %v13003_v36, %v14536_v37 }
 0x4d1   : > { %7770 = vrot.lane.b32.xlu1 %v5664_v44, %s8640_s22 }
 0x4d2   : > { %v13016_v46 = vpop.permute.xlu0 %7584 }
 0x4d3   : > { %v13007_v4 = vpop.permute.xlu1 %7530 }
 0x4d4   : > { %14675 = vst [vmem:[#allocation151_spill] sm:$0xff] %v13007_v4  ;;  %7796 = vrot.lane.b32.xlu0 %v6938_v10, %s8640_s22  ;;  %v6056_v4 = vrot.slane %v13012_v47, %v14536_v37 }
 0x4d5   : > { %7774 = vrot.lane.b32.xlu1 %v5860_v41, %s8640_s22  ;;  %v5755_v41 = vcombine.high %v12890_v57, %v14541_v31 }
 0x4d6   : > { %v13031_v34 = vpop.permute.xlu0 %7588 }
 0x4d7   : > { %v13022_v1 = vpop.permute.xlu1 %7534  ;;  %14677 = vst [vmem:[#allocation191_spill] sm:$0xff] %v13031_v34 }
 0x4d8   : > { %14676 = vst [vmem:[#allocation152_spill] sm:$0xff] %v13022_v1  ;;  %7832 = vrot.lane.b32.xlu0 %v5576_v2, %s8641_s23  ;;  %v6252_v1 = vrot.slane %v13027_v61, %v14536_v37 }
 0x4d9   : > { %7778 = vrot.lane.b32.xlu1 %v6056_v4, %s8640_s22 }
 0x4da   : > { %v13046_v43 = vpop.permute.xlu0 %7592 }
 0x4db   : > { %v13037_v0 = vpop.permute.xlu1 %7538  ;;  %14679 = vst [vmem:[#allocation160_spill] sm:$0xff] %v13046_v43 }
 0x4dc   : > { %14678 = vst [vmem:[#allocation153_spill] sm:$0xff] %v13037_v0  ;;  %7836 = vrot.lane.b32.xlu0 %v5772_v29, %s8641_s23  ;;  %v6448_v0 = vrot.slane %v13042_v21, %v14536_v37 }
 0x4dd   : > { %7782 = vrot.lane.b32.xlu1 %v6252_v1, %s8640_s22 }
 0x4de   : > { %v13061_v34 = vpop.permute.xlu0 %7596 }
 0x4df   : > { %v13052_v2 = vpop.permute.xlu1 %7542  ;;  %14681 = vst [vmem:[#allocation154_spill] sm:$0xff] %v13061_v34 }
 0x4e0   : > { %14680 = vst [vmem:[#allocation207_spill] sm:$0xff] %v13052_v2  ;;  %7840 = vrot.lane.b32.xlu0 %v5968_v25, %s8641_s23  ;;  %v6644_v2 = vrot.slane %v13057_v16, %v14536_v37 }
 0x4e1   : > { %7786 = vrot.lane.b32.xlu1 %v6448_v0, %s8640_s22 }
 0x4e2   : > { %v13076_v43 = vpop.permute.xlu0 %7600 }
 0x4e3   : > { %v13067_v29 = vpop.permute.xlu1 %7578  ;;  %14683 = vst [vmem:[#allocation176_spill] sm:$0xff] %v13076_v43 }
 0x4e4   : > { %14682 = vst [vmem:[#allocation161_spill] sm:$0xff] %v13067_v29  ;;  %7844 = vrot.lane.b32.xlu0 %v6164_v50, %s8641_s23  ;;  %v6840_v29 = vrot.slane %v13072_v56, %v14536_v37  ;;  %v7036_v50 = vrot.slane %v13087_v18, %v14536_v37 }
 0x4e5   : > { %7790 = vrot.lane.b32.xlu1 %v6644_v2, %s8640_s22 }
 0x4e6   : > { %v13089_v34 = vpop.permute.xlu0 %7604 }
 0x4e7   : > { %v13082_v25 = vpop.permute.xlu1 %7582 }
 0x4e8   : > { %14684 = vst [vmem:[#allocation216_spill] sm:$0xff] %v13082_v25  ;;  %7848 = vrot.lane.b32.xlu0 %v6360_v3, %s8641_s23  ;;  %v6752_v3 = vcombine.high %v6742_v60, %v14541_v31  ;;  %v6066_v60 = vcombine.high %v6056_v4, %v14541_v31  ;;  %v5951_v4 = vcombine.high %v12907_v17, %v14541_v31 }
 0x4e9   : > { %7794 = vrot.lane.b32.xlu1 %v6840_v29, %s8640_s22 }
 0x4ea   : > { %v13099_v25 = vpop.permute.xlu0 %7640  ;;  %v13156_v17 = vrot.slane %v5951_v4, %v14536_v37  ;;  %v14691_v4 = vld [vmem:[#allocation227_spill] sm:$0xff] }
 0x4eb   : > { %v13095_v62 = vpop.permute.xlu1 %7586 }
 0x4ec   : > { %14686 = vst [vmem:[#allocation177_spill] sm:$0xff] %v13095_v62  ;;  %7852 = vrot.lane.b32.xlu0 %v6556_v55, %s8641_s23  ;;  %v6948_v55 = vcombine.high %v6938_v10, %v14541_v31  ;;  %v6262_v10 = vcombine.high %v6252_v1, %v14541_v31  ;;  %v6343_v1 = vcombine.high %v12941_v52, %v14541_v31 }
 0x4ed   : > { %7798 = vrot.lane.b32.xlu1 %v7036_v50, %s8640_s22  ;;  %v6654_v52 = vcombine.high %v6644_v2, %v14541_v31 }
 0x4ee   : > { %v13108_v43 = vpop.permute.xlu0 %7644 }
 0x4ef   : > { %v13105_v12 = vpop.permute.xlu1 %7590 }
 0x4f0   : > { %14687 = vst [vmem:[#allocation192_spill] sm:$0xff] %v13105_v12  ;;  %7856 = vrot.lane.b32.xlu0 %v6752_v3, %s8641_s23  ;;  %v5559_v12 = vcombine.high %v12874_v32, %v14541_v31 }
 0x4f1   : > { %7834 = vrot.lane.b32.xlu1 %v5674_v39, %s8641_s23 }
 0x4f2   : > { %v13116_v18 = vpop.permute.xlu0 %7648  ;;  %v5573_v3 = vrot.slane %v5559_v12, %v14536_v37  ;;  %v6458_v12 = vcombine.high %v6448_v0, %v14541_v31  ;;  %v5657_v0 = vcombine.high %v12971_v27, %v14541_v31  ;;  %v6735_v27 = vcombine.high %v12982_v8, %v14541_v31 }
 0x4f3   : > { %v13113_v62 = vpop.permute.xlu1 %7594 }
 0x4f4   : > { %7860 = vrot.lane.b32.xlu0 %v6948_v55, %s8641_s23  ;;  %v5769_v55 = vrot.slane %v5755_v41, %v14536_v37 }
 0x4f5   : > { %7838 = vrot.lane.b32.xlu1 %v5870_v58, %s8641_s23 }
 0x4f6   : > { %v13126_v39 = vpop.permute.xlu0 %7652 }
 0x4f7   : > { %v13123_v44 = vpop.permute.xlu1 %7598 }
 0x4f8   : > { %14688 = vst [vmem:[#allocation247_spill] sm:$0xff] %v13123_v44  ;;  %7896 = vrot.lane.b32.xlu0 %v5573_v3, %s8642_s24 }
 0x4f9   : > { %7842 = vrot.lane.b32.xlu1 %v6066_v60, %s8641_s23  ;;  %v6147_v60 = vcombine.high %v12924_v20, %v14541_v31 }
 0x4fa   : > { %v13136_v58 = vpop.permute.xlu0 %7656 }
 0x4fb   : > { %v13133_v32 = vpop.permute.xlu1 %7602 }
 0x4fc   : > { %14689 = vst [vmem:[#allocation156_spill] sm:$0xff] %v13133_v32  ;;  %7900 = vrot.lane.b32.xlu0 %v5769_v55, %s8642_s24  ;;  %v14690_v32 = vld [vmem:[#allocation241_spill] sm:$0xff] }
 0x4fd   : > { %7846 = vrot.lane.b32.xlu1 %v6262_v10, %s8641_s23  ;;  %v8022_v41 = vsel %vm3951_vm0, %v14690_v32, %v12093_v35  ;;  %v6539_v10 = vcombine.high %v12960_v40, %v14541_v31  ;;  %v6850_v32 = vcombine.high %v6840_v29, %v14541_v31  ;;  %v7046_v40 = vcombine.high %v7036_v50, %v14541_v31 }
 0x4fe   : > { %v13153_v44 = vpop.permute.xlu0 %7660  ;;  %v8038_v20 = vsel %vm3968_vm1, %v8022_v41, %v12180_v33  ;;  %v8008_v33 = vsel %vm3951_vm0, %v14691_v4, %v12041_v45  ;;  %v13183_v41 = vrot.slane %v6343_v1, %v14536_v37  ;;  %v14694_v4 = vld [vmem:[#allocation121_spill] sm:$0xff] }
 0x4ff   : > { %v13143_v57 = vpop.permute.xlu1 %7606  ;;  %v8054_v35 = vsel %vm3985_vm2, %v8038_v20, %v12320_v13  ;;  %v6161_v13 = vrot.slane %v6147_v60, %v14536_v37  ;;  %v8024_v29 = vsel %vm3968_vm1, %v8008_v33, %v12103_v19  ;;  %v13192_v45 = vrot.slane %v6539_v10, %v14536_v37  ;;  %v14692_v20 = vld [vmem:[#allocation231_spill] sm:$0xff] }
 0x500   : > { %7904 = vrot.lane.b32.xlu0 %v13156_v17, %s8642_s24  ;;  %v8070_v2 = vsel %vm4002_vm3, %v8054_v35, %v12537_v7  ;;  %v13195_v7 = vrot.slane %v5657_v0, %v14536_v37  ;;  %v8040_v60 = vsel %vm3985_vm2, %v8024_v29, %v12195_v22  ;;  %v5853_v19 = vcombine.high %v12994_v30, %v14541_v31  ;;  %v14693_v35 = vld [vmem:[#allocation32_spill] sm:$0xff] }
 0x501   : > { %7850 = vrot.lane.b32.xlu1 %v6458_v12, %s8641_s23  ;;  %v8086_v8 = vsel %vm4019_vm4, %v8070_v2, %v12681_v48  ;;  %v6931_v48 = vcombine.high %v13003_v36, %v14541_v31  ;;  %v8056_v10 = vsel %vm4002_vm3, %v8040_v60, %v12342_v59  ;;  %v13212_v22 = vrot.slane %v6735_v27, %v14536_v37  ;;  %v14695_v2 = vld [vmem:[#allocation80_spill] sm:$0xff]  ;;  %v14696_v60 = vld [vmem:[#allocation94_spill] sm:$0xff] }
 0x502   : > { %v13189_v50 = vpop.permute.xlu0 %7664  ;;  %v8102_v1 = vsel %vm4036_vm5, %v8086_v8, %v12758_v15  ;;  %v6049_v15 = vcombine.high %v13012_v47, %v14541_v31  ;;  %v8010_v30 = vsel %vm3951_vm0, %v14692_v20, %v12056_v6  ;;  %v8072_v36 = vsel %vm4019_vm4, %v8056_v10, %v12563_v28  ;;  %v14697_v10 = vld [vmem:[#allocation31_spill] sm:$0xff] }
 0x503   : > { %v13179_v12 = vpop.permute.xlu1 %7642  ;;  %v8118_v0 = vsel %vm4053_vm6, %v8102_v1, %v12844_v9  ;;  %v13226_v9 = vcombine.high %v5573_v3, %v14541_v31  ;;  %v8026_v27 = vsel %vm3968_vm1, %v8010_v30, %v14693_v35  ;;  %v8088_v47 = vsel %vm4036_vm5, %v8072_v36, %v14694_v4 }
 0x504   : > { %7908 = vrot.lane.b32.xlu0 %v6161_v13, %s8642_s24  ;;  %v8134_v59 = vsel %vm4070_vm7, %v8118_v0, %v12953_v24  ;;  %v6245_v28 = vcombine.high %v13027_v61, %v14541_v31  ;;  %v8042_v24 = vsel %vm3985_vm2, %v8026_v27, %v14695_v2  ;;  %v8104_v3 = vsel %vm4053_vm6, %v8088_v47, %v12770_v54  ;;  %v14699_v0 = vld [vmem:[#allocation108_spill] sm:$0xff]  ;;  %v14701_v47 = vld [vmem:[#allocation82_spill] sm:$0xff] }
 0x505   : > { %7854 = vrot.lane.b32.xlu1 %v6654_v52, %s8641_s23  ;;  %v8150_v6 = vsel %vm4087_vm8, %v8134_v59, %v13089_v34  ;;  %v13245_v8 = vcombine.high %v5769_v55, %v14541_v31  ;;  %v8058_v34 = vsel %vm4002_vm3, %v8042_v24, %v14696_v60  ;;  %v8120_v61 = vsel %vm4070_vm7, %v8104_v3, %v12852_v23  ;;  %v14704_v24 = vld [vmem:[#allocation224_spill] sm:$0xff]  ;;  %v14705_v3 = vld [vmem:[#allocation110_spill] sm:$0xff] }
 0x506   : > { %v7669_v33 = vpop.permute.xlu0 %7668  ;;  %v13254_v1 = vrot.slane %v5853_v19, %v14536_v37  ;;  %v13257_v54 = vrot.slane %v6931_v48, %v14536_v37  ;;  %v8074_v20 = vsel %vm4019_vm4, %v8058_v34, %v14699_v0  ;;  %v8136_v30 = vsel %vm4087_vm8, %v8120_v61, %v12975_v49  ;;  %v14700_v19 = vld [vmem:[#allocation68_spill] sm:$0xff] }
 0x507   : > { %v13223_v52 = vpop.permute.xlu1 %7646  ;;  %v13241_v29 = vsel %vm4104_vm9, %v8150_v6, %v7669_v33  ;;  %v13269_v36 = vrot.slane %v6049_v15, %v14536_v37  ;;  %v8090_v48 = vsel %vm4036_vm5, %v8074_v20, %v12700_v14  ;;  %v8152_v35 = vsel %vm4104_vm9, %v8136_v30, %v13099_v25  ;;  %v14702_v33 = vld [vmem:[#allocation96_spill] sm:$0xff] }
 0x508   : > { %7912 = vrot.lane.b32.xlu0 %v13183_v41, %s8642_s24  ;;  %v13278_v4 = vrot.slane %v6245_v28, %v14536_v37  ;;  %v8106_v15 = vsel %vm4053_vm6, %v8090_v48, %v12782_v42  ;;  %v6441_v14 = vcombine.high %v13042_v21, %v14541_v31  ;;  %v13298_v42 = vcombine.high %v13156_v17, %v14541_v31  ;;  %v14706_v17 = vld [vmem:[#allocation70_spill] sm:$0xff] }
 0x509   : > { %7858 = vrot.lane.b32.xlu1 %v6850_v32, %s8641_s23  ;;  %v14698_v32 = vld [vmem:[#allocation239_spill] sm:$0xff]  ;;  %v8122_v28 = vsel %vm4070_vm7, %v8106_v15, %v12860_v5  ;;  %v6637_v2 = vcombine.high %v13057_v16, %v14541_v31  ;;  %v13312_v61 = vcombine.high %v6161_v13, %v14541_v31  ;;  %v13322_v0 = vcombine.high %v13072_v56, %v14541_v31 }
 0x50a   : > { %v8012_v55 = vsel %vm3951_vm0, %v14698_v32, %v14697_v10  ;;  %v7705_v27 = vpop.permute.xlu0 %7704  ;;  %v8138_v5 = vsel %vm4087_vm8, %v8122_v28, %v12998_v53  ;;  %v14707_v53 = vld [vmem:[#allocation84_spill] sm:$0xff]  ;;  %v14713_v15 = vld [vmem:[#allocation63_spill] sm:$0xff] }
 0x50b   : > { %v13266_v23 = vpop.permute.xlu1 %7650  ;;  %v8028_v59 = vsel %vm3968_vm1, %v8012_v55, %v14700_v19  ;;  %v13285_v6 = vsel %vm4121_vm10, %v8152_v35, %v7705_v27  ;;  %v8154_v32 = vsel %vm4104_vm9, %v8138_v5, %v13108_v43  ;;  %v14708_v43 = vld [vmem:[#allocation27_spill] sm:$0xff]  ;;  %v14709_v19 = vld [vmem:[#allocation220_spill] sm:$0xff]  ;;  %v14711_v27 = vld [vmem:[#allocation29_spill] sm:$0xff] }
 0x50c   : > { %v8044_v49 = vsel %vm3985_vm2, %v8028_v59, %v14701_v47  ;;  %7916 = vrot.lane.b32.xlu0 %v13192_v45, %s8642_s24  ;;  %v8009_v56 = vsel %vm3951_vm0, %v14709_v19, %v14708_v43  ;;  %v14710_v59 = vld [vmem:[#allocation98_spill] sm:$0xff]  ;;  %v14712_v47 = vld [vmem:[#allocation229_spill] sm:$0xff] }
 0x50d   : > { %7862 = vrot.lane.b32.xlu1 %v7046_v40, %s8641_s23  ;;  %v8060_v25 = vsel %vm4002_vm3, %v8044_v49, %v14702_v33  ;;  %v14703_v40 = vld [vmem:[#allocation62_spill] sm:$0xff]  ;;  %v8016_v49 = vsel %vm3951_vm0, %v14712_v47, %v14711_v27  ;;  %v14726_v27 = vld [vmem:[#allocation189_spill] sm:$0xff] }
 0x50e   : > { %v8014_v21 = vsel %vm3951_vm0, %v14704_v24, %v14703_v40  ;;  %v8076_v60 = vsel %vm4019_vm4, %v8060_v25, %v14705_v3  ;;  %v7709_v55 = vpop.permute.xlu0 %7708  ;;  %v14715_v25 = vld [vmem:[#allocation112_spill] sm:$0xff]  ;;  %v14716_v24 = vld [vmem:[#allocation30_spill] sm:$0xff] }
 0x50f   : > { %v13309_v34 = vpop.permute.xlu1 %7654  ;;  %v8030_v10 = vsel %vm3968_vm1, %v8014_v21, %v14706_v17  ;;  %v8092_v16 = vsel %vm4036_vm5, %v8076_v60, %v12708_v63  ;;  %v13329_v30 = vsel %vm4121_vm10, %v8154_v32, %v7709_v55  ;;  %v13334_v63 = vrot.slane %v6441_v14, %v14536_v37  ;;  %v14714_v14 = vld [vmem:[#allocation233_spill] sm:$0xff]  ;;  %v14717_v21 = vld [vmem:[#allocation235_spill] sm:$0xff]  ;;  %v14718_v3 = vld [vmem:[#allocation72_spill] sm:$0xff] }
 0x510   : > { %v8046_v20 = vsel %vm3985_vm2, %v8030_v10, %v14707_v53  ;;  %v8108_v13 = vsel %vm4053_vm6, %v8092_v16, %v12794_v26  ;;  %7920 = vrot.lane.b32.xlu0 %v13212_v22, %s8642_s24  ;;  %v13346_v26 = vrot.slane %v6637_v2, %v14536_v37  ;;  %v8018_v33 = vsel %vm3951_vm0, %v14714_v14, %v14713_v15  ;;  %v14719_v16 = vld [vmem:[#allocation64_spill] sm:$0xff]  ;;  %v14720_v32 = vld [vmem:[#allocation237_spill] sm:$0xff]  ;;  %v14721_v55 = vld [vmem:[#allocation86_spill] sm:$0xff] }
 0x511   : > { %7898 = vrot.lane.b32.xlu1 %v13195_v7, %s8642_s24  ;;  %v8062_v48 = vsel %vm4002_vm3, %v8046_v20, %v14710_v59  ;;  %v8124_v35 = vsel %vm4070_vm7, %v8108_v13, %v12870_v38  ;;  %v8011_v2 = vsel %vm3951_vm0, %v14717_v21, %v14716_v24  ;;  %v8032_v60 = vsel %vm3968_vm1, %v8016_v49, %v14718_v3  ;;  %v14723_v43 = vld [vmem:[#allocation18_spill] sm:$0xff]  ;;  %v14728_v15 = vld [vmem:[#allocation76_spill] sm:$0xff]  ;;  %v14731_v21 = vld [vmem:[#allocation77_spill] sm:$0xff] }
 0x512   : > { %v8078_v28 = vsel %vm4019_vm4, %v8062_v48, %v14715_v25  ;;  %v8140_v38 = vsel %vm4087_vm8, %v8124_v35, %v13016_v46  ;;  %v7713_v10 = vpop.permute.xlu0 %7712  ;;  %v8020_v46 = vsel %vm3951_vm0, %v14720_v32, %v14719_v16  ;;  %v8048_v53 = vsel %vm3985_vm2, %v8032_v60, %v14721_v55  ;;  %v14724_v19 = vld [vmem:[#allocation74_spill] sm:$0xff]  ;;  %v14725_v48 = vld [vmem:[#allocation100_spill] sm:$0xff]  ;;  %v14732_v60 = vld [vmem:[#allocation87_spill] sm:$0xff] }
 0x513   : > { %v13358_v40 = vpop.permute.xlu1 %7658  ;;  %v8094_v5 = vsel %vm4036_vm5, %v8078_v28, %v12718_v11  ;;  %v8156_v17 = vsel %vm4104_vm9, %v8140_v38, %v13116_v18  ;;  %v14722_v11 = vld [vmem:[#allocation73_spill] sm:$0xff]  ;;  %v8034_v59 = vsel %vm3968_vm1, %v8018_v33, %v14724_v19  ;;  %v8064_v35 = vsel %vm4002_vm3, %v8048_v53, %v14725_v48  ;;  %v14729_v25 = vld [vmem:[#allocation114_spill] sm:$0xff]  ;;  %v14730_v38 = vld [vmem:[#allocation191_spill] sm:$0xff] }
 0x514   : > { %v8110_v20 = vsel %vm4053_vm6, %v8094_v5, %v12804_v51  ;;  %v13377_v13 = vsel %vm4121_vm10, %v8156_v17, %v7713_v10  ;;  %v8023_v18 = vsel %vm3951_vm0, %v14723_v43, %v14722_v11  ;;  %7924 = vrot.lane.b32.xlu0 %v13257_v54, %s8642_s24  ;;  %v14727_v51 = vld [vmem:[#allocation75_spill] sm:$0xff]  ;;  %v8036_v14 = vsel %vm3968_vm1, %v8020_v46, %v14728_v15  ;;  %v14734_v32 = vld [vmem:[#allocation88_spill] sm:$0xff]  ;;  %v14735_v55 = vld [vmem:[#allocation101_spill] sm:$0xff] }
 0x515   : > { %7902 = vrot.lane.b32.xlu1 %v13254_v1, %s8642_s24  ;;  %v8126_v47 = vsel %vm4070_vm7, %v8110_v20, %v14726_v27  ;;  %v8025_v49 = vsel %vm3968_vm1, %v8009_v56, %v14727_v51  ;;  %v8080_v28 = vsel %vm4019_vm4, %v8064_v35, %v14729_v25  ;;  %v8027_v3 = vsel %vm3968_vm1, %v8011_v2, %v14731_v21  ;;  %v14733_v17 = vld [vmem:[#allocation127_spill] sm:$0xff]  ;;  %v14736_v20 = vld [vmem:[#allocation138_spill] sm:$0xff]  ;;  %v14737_v43 = vld [vmem:[#allocation89_spill] sm:$0xff] }
 0x516   : > { %v8142_v33 = vsel %vm4087_vm8, %v8126_v47, %v14730_v38  ;;  %v8039_v5 = vsel %vm3968_vm1, %v8023_v18, %v14732_v60  ;;  %v8096_v56 = vsel %vm4036_vm5, %v8080_v28, %v14733_v17  ;;  %v7717_v16 = vpop.permute.xlu0 %7716  ;;  %v8050_v46 = vsel %vm3985_vm2, %v8034_v59, %v14734_v32  ;;  %v14739_v48 = vld [vmem:[#allocation115_spill] sm:$0xff]  ;;  %v14740_v35 = vld [vmem:[#allocation148_spill] sm:$0xff]  ;;  %v14741_v47 = vld [vmem:[#allocation90_spill] sm:$0xff] }
 0x517   : > { %v13400_v24 = vpop.permute.xlu1 %7662  ;;  %v8158_v10 = vsel %vm4104_vm9, %v8142_v33, %v13126_v39  ;;  %v8055_v53 = vsel %vm3985_vm2, %v8039_v5, %v14735_v55  ;;  %v8112_v11 = vsel %vm4053_vm6, %v8096_v56, %v14736_v20  ;;  %v8041_v18 = vsel %vm3985_vm2, %v8025_v49, %v14737_v43  ;;  %v14738_v39 = vld [vmem:[#allocation102_spill] sm:$0xff]  ;;  %v14742_v15 = vld [vmem:[#allocation116_spill] sm:$0xff]  ;;  %v14745_v60 = vld [vmem:[#allocation91_spill] sm:$0xff] }
 0x518   : > { %v13417_v2 = vsel %vm4121_vm10, %v8158_v10, %v7717_v16  ;;  %v8066_v19 = vsel %vm4002_vm3, %v8050_v46, %v14738_v39  ;;  %v8071_v59 = vsel %vm4002_vm3, %v8055_v53, %v14739_v48  ;;  %v8128_v27 = vsel %vm4070_vm7, %v8112_v11, %v14740_v35  ;;  %7960 = vrot.lane.b32.xlu0 %v13226_v9, %s8643_s25  ;;  %v14743_v28 = vld [vmem:[#allocation128_spill] sm:$0xff]  ;;  %v14746_v17 = vld [vmem:[#allocation129_spill] sm:$0xff]  ;;  %v14748_v32 = vld [vmem:[#allocation103_spill] sm:$0xff] }
 0x519   : > { %7906 = vrot.lane.b32.xlu1 %v13269_v36, %s8642_s24  ;;  %v8052_v51 = vsel %vm3985_vm2, %v8036_v14, %v14741_v47  ;;  %v8082_v25 = vsel %vm4019_vm4, %v8066_v19, %v14742_v15  ;;  %v8087_v49 = vsel %vm4019_vm4, %v8071_v59, %v14743_v28  ;;  %v14744_v38 = vld [vmem:[#allocation160_spill] sm:$0xff]  ;;  %v8043_v5 = vsel %vm3985_vm2, %v8027_v3, %v14745_v60  ;;  %v14747_v56 = vld [vmem:[#allocation141_spill] sm:$0xff]  ;;  %v14749_v55 = vld [vmem:[#allocation139_spill] sm:$0xff] }
 0x51a   : > { %v8144_v33 = vsel %vm4087_vm8, %v8128_v27, %v14744_v38  ;;  %v8098_v9 = vsel %vm4036_vm5, %v8082_v25, %v14746_v17  ;;  %v8103_v14 = vsel %vm4036_vm5, %v8087_v49, %v14747_v56  ;;  %v7721_v16 = vpop.permute.xlu0 %7720  ;;  %v8057_v46 = vsel %vm4002_vm3, %v8041_v18, %v14748_v32  ;;  %v14750_v20 = vld [vmem:[#allocation205_spill] sm:$0xff]  ;;  %v14751_v43 = vld [vmem:[#allocation104_spill] sm:$0xff]  ;;  %v14754_v59 = vld [vmem:[#allocation207_spill] sm:$0xff] }
 0x51b   : > { %v13439_v21 = vpop.permute.xlu1 %7666  ;;  %v8160_v10 = vsel %vm4104_vm9, %v8144_v33, %v13136_v58  ;;  %v8114_v53 = vsel %vm4053_vm6, %v8098_v9, %v14749_v55  ;;  %v8119_v11 = vsel %vm4053_vm6, %v8103_v14, %v14750_v20  ;;  %v8068_v39 = vsel %vm4002_vm3, %v8052_v51, %v14751_v43  ;;  %v14752_v58 = vld [vmem:[#allocation117_spill] sm:$0xff]  ;;  %v14755_v27 = vld [vmem:[#allocation118_spill] sm:$0xff]  ;;  %v14758_v33 = vld [vmem:[#allocation131_spill] sm:$0xff] }
 0x51c   : > { %v13456_v3 = vsel %vm4121_vm10, %v8160_v10, %v7721_v16  ;;  %v8073_v19 = vsel %vm4019_vm4, %v8057_v46, %v14752_v58  ;;  %v14753_v48 = vld [vmem:[#allocation149_spill] sm:$0xff]  ;;  %v8135_v35 = vsel %vm4070_vm7, %v8119_v11, %v14754_v59  ;;  %7964 = vrot.lane.b32.xlu0 %v13245_v8, %s8643_s25  ;;  %v8084_v47 = vsel %vm4019_vm4, %v8068_v39, %v14755_v27  ;;  %v14756_v15 = vld [vmem:[#allocation130_spill] sm:$0xff]  ;;  %v14759_v17 = vld [vmem:[#allocation140_spill] sm:$0xff] }
 0x51d   : > { %7910 = vrot.lane.b32.xlu1 %v13278_v4, %s8642_s24  ;;  %v8130_v18 = vsel %vm4070_vm7, %v8114_v53, %v14753_v48  ;;  %v8089_v25 = vsel %vm4036_vm5, %v8073_v19, %v14756_v15  ;;  %v14757_v28 = vld [vmem:[#allocation154_spill] sm:$0xff]  ;;  %v8151_v49 = vsel %vm4087_vm8, %v8135_v35, %v13143_v57  ;;  %v8100_v60 = vsel %vm4036_vm5, %v8084_v47, %v14758_v33  ;;  %v14760_v10 = vld [vmem:[#allocation105_spill] sm:$0xff]  ;;  %v14762_v46 = vld [vmem:[#allocation159_spill] sm:$0xff] }
 0x51e   : > { %v8146_v51 = vsel %vm4087_vm8, %v8130_v18, %v14757_v28  ;;  %v8105_v9 = vsel %vm4053_vm6, %v8089_v25, %v14759_v17  ;;  %v7725_v14 = vpop.permute.xlu0 %7724  ;;  %v8059_v16 = vsel %vm4002_vm3, %v8043_v5, %v14760_v10  ;;  %v14761_v32 = vld [vmem:[#allocation157_spill] sm:$0xff]  ;;  %v14764_v20 = vld [vmem:[#allocation243_spill] sm:$0xff]  ;;  %v14768_v18 = vld [vmem:[#allocation78_spill] sm:$0xff] }
 0x51f   : > { %v7671_v38 = vpop.permute.xlu1 %7670  ;;  %v8162_v8 = vsel %vm4104_vm9, %v8146_v51, %v13153_v44  ;;  %v8116_v57 = vsel %vm4053_vm6, %v8100_v60, %v14761_v32  ;;  %v8121_v55 = vsel %vm4070_vm7, %v8105_v9, %v14762_v46  ;;  %v14763_v44 = vld [vmem:[#allocation65_spill] sm:$0xff]  ;;  %v14765_v43 = vld [vmem:[#allocation119_spill] sm:$0xff]  ;;  %v14769_v35 = vld [vmem:[#allocation132_spill] sm:$0xff] }
 0x520   : > { %v13485_v56 = vsel %vm4104_vm9, %v8151_v49, %v7671_v38  ;;  %v13494_v53 = vsel %vm4121_vm10, %v8162_v8, %v7725_v14  ;;  %v8013_v11 = vsel %vm3951_vm0, %v14764_v20, %v14763_v44  ;;  %v8075_v39 = vsel %vm4019_vm4, %v8059_v16, %v14765_v43  ;;  %v14766_v5 = vld [vmem:[#allocation13_spill] sm:$0xff]  ;;  %7968 = vrot.lane.b32.xlu0 %v13298_v42, %s8643_s25  ;;  %v14770_v47 = vld [vmem:[#allocation176_spill] sm:$0xff]  ;;  %v14772_v38 = vld [vmem:[#allocation143_spill] sm:$0xff] }
 0x521   : > { %7914 = vrot.lane.b32.xlu1 %v13334_v63, %s8642_s24  ;;  %v8132_v58 = vsel %vm4070_vm7, %v8116_v57, %v14766_v5  ;;  %v14767_v19 = vld [vmem:[#allocation161_spill] sm:$0xff]  ;;  %v8029_v59 = vsel %vm3968_vm1, %v8013_v11, %v14768_v18  ;;  %v8091_v27 = vsel %vm4036_vm5, %v8075_v39, %v14769_v35  ;;  %v14771_v51 = vld [vmem:[#allocation92_spill] sm:$0xff]  ;;  %v14773_v9 = vld [vmem:[#allocation106_spill] sm:$0xff]  ;;  %v13554_v18 = vrot.slane %v13322_v0, %v14536_v37 }
 0x522   : > { %v8137_v48 = vsel %vm4087_vm8, %v8121_v55, %v14767_v19  ;;  %v8148_v15 = vsel %vm4087_vm8, %v8132_v58, %v14770_v47  ;;  %v8045_v49 = vsel %vm3985_vm2, %v8029_v59, %v14771_v51  ;;  %v8107_v33 = vsel %vm4053_vm6, %v8091_v27, %v14772_v38  ;;  %v7729_v17 = vpop.permute.xlu0 %7728  ;;  %v14774_v14 = vld [vmem:[#allocation150_spill] sm:$0xff]  ;;  %v14777_v57 = vld [vmem:[#allocation120_spill] sm:$0xff]  ;;  %v14779_v20 = vld [vmem:[#allocation155_spill] sm:$0xff] }
 0x523   : > { %v8153_v25 = vsel %vm4104_vm9, %v8137_v48, %v13179_v12  ;;  %v7707_v28 = vpop.permute.xlu1 %7706  ;;  %v8164_v42 = vsel %vm4104_vm9, %v8148_v15, %v13189_v50  ;;  %v8061_v8 = vsel %vm4002_vm3, %v8045_v49, %v14773_v9  ;;  %v8123_v12 = vsel %vm4070_vm7, %v8107_v33, %v14774_v14  ;;  %v14775_v16 = vld [vmem:[#allocation66_spill] sm:$0xff]  ;;  %v14778_v55 = vld [vmem:[#allocation216_spill] sm:$0xff]  ;;  %v14780_v43 = vld [vmem:[#allocation79_spill] sm:$0xff] }
 0x524   : > { %v13524_v60 = vsel %vm4121_vm10, %v8153_v25, %v7707_v28  ;;  %v13531_v10 = vsel %vm4121_vm10, %v8164_v42, %v7729_v17  ;;  %v14776_v32 = vld [vmem:[#allocation246_spill] sm:$0xff]  ;;  %v8077_v46 = vsel %vm4019_vm4, %v8061_v8, %v14777_v57  ;;  %v8139_v44 = vsel %vm4087_vm8, %v8123_v12, %v14778_v55  ;;  %7972 = vrot.lane.b32.xlu0 %v13312_v61, %s8643_s25  ;;  %v14781_v5 = vld [vmem:[#allocation133_spill] sm:$0xff]  ;;  %v14783_v35 = vld [vmem:[#allocation144_spill] sm:$0xff] }
 0x525   : > { %7918 = vrot.lane.b32.xlu1 %v13346_v26, %s8642_s24  ;;  %v8015_v50 = vsel %vm3951_vm0, %v14776_v32, %v14775_v16  ;;  %v7029_v11 = vcombine.high %v14779_v20, %v14541_v31  ;;  %v8093_v58 = vsel %vm4036_vm5, %v8077_v46, %v14781_v5  ;;  %v8155_v19 = vsel %vm4104_vm9, %v8139_v44, %v13223_v52  ;;  %v14782_v59 = vld [vmem:[#allocation93_spill] sm:$0xff]  ;;  %v14784_v28 = vld [vmem:[#allocation107_spill] sm:$0xff]  ;;  %v14788_v17 = vld [vmem:[#allocation122_spill] sm:$0xff] }
 0x526   : > { %v8031_v39 = vsel %vm3968_vm1, %v8015_v50, %v14780_v43  ;;  %v8109_v27 = vsel %vm4053_vm6, %v8093_v58, %v14783_v35  ;;  %v7733_v15 = vpop.permute.xlu0 %7732  ;;  %v6361_v25 = vcombine.high %v13183_v41, %v14541_v31  ;;  %v14785_v51 = vld [vmem:[#allocation175_spill] sm:$0xff]  ;;  %v14787_v33 = vld [vmem:[#allocation249_spill] sm:$0xff]  ;;  %v6557_v5 = vcombine.high %v13192_v45, %v14541_v31 }
 0x527   : > { %v7711_v48 = vpop.permute.xlu1 %7710  ;;  %v8047_v61 = vsel %vm3985_vm2, %v8031_v39, %v14782_v59  ;;  %v8125_v0 = vsel %vm4070_vm7, %v8109_v27, %v14785_v51  ;;  %v13571_v49 = vsel %vm4121_vm10, %v13241_v29, %v7733_v15  ;;  %v14786_v38 = vld [vmem:[#allocation67_spill] sm:$0xff]  ;;  %v14789_v9 = vld [vmem:[#allocation177_spill] sm:$0xff]  ;;  %v14791_v29 = vld [vmem:[#allocation134_spill] sm:$0xff]  ;;  %v13590_v57 = vrot.slane %v7029_v11, %v14536_v37 }
 0x528   : > { %v13561_v47 = vsel %vm4121_vm10, %v8155_v19, %v7711_v48  ;;  %v8063_v52 = vsel %vm4002_vm3, %v8047_v61, %v14784_v28  ;;  %v8017_v42 = vsel %vm3951_vm0, %v14787_v33, %v14786_v38  ;;  %v8141_v8 = vsel %vm4087_vm8, %v8125_v0, %v14789_v9  ;;  %7976 = vrot.lane.b32.xlu0 %v6361_v25, %s8643_s25  ;;  %v14790_v14 = vld [vmem:[#allocation81_spill] sm:$0xff]  ;;  %v14792_v46 = vld [vmem:[#allocation95_spill] sm:$0xff]  ;;  %v14795_v19 = vld [vmem:[#allocation244_spill] sm:$0xff] }
 0x529   : > { %7922 = vrot.lane.b32.xlu1 %v13554_v18, %s8642_s24  ;;  %v8079_v41 = vsel %vm4019_vm4, %v8063_v52, %v14788_v17  ;;  %v8033_v12 = vsel %vm3968_vm1, %v8017_v42, %v14790_v14  ;;  %v8157_v32 = vsel %vm4104_vm9, %v8141_v8, %v13266_v23  ;;  %v14793_v44 = vld [vmem:[#allocation173_spill] sm:$0xff]  ;;  %v14797_v59 = vld [vmem:[#allocation252_spill] sm:$0xff]  ;;  %v14798_v35 = vld [vmem:[#allocation123_spill] sm:$0xff]  ;;  %v5675_v38 = vcombine.high %v13195_v7, %v14541_v31 }
 0x52a   : > { %v8095_v16 = vsel %vm4036_vm5, %v8079_v41, %v14791_v29  ;;  %v8049_v55 = vsel %vm3985_vm2, %v8033_v12, %v14792_v46  ;;  %v7769_v39 = vpop.permute.xlu0 %7768  ;;  %v14794_v58 = vld [vmem:[#allocation109_spill] sm:$0xff]  ;;  %v14799_v27 = vld [vmem:[#allocation192_spill] sm:$0xff]  ;;  %v14800_v25 = vld [vmem:[#allocation83_spill] sm:$0xff]  ;;  %v6753_v14 = vcombine.high %v13212_v22, %v14541_v31 }
 0x52b   : > { %v7715_v50 = vpop.permute.xlu1 %7714  ;;  %v8111_v20 = vsel %vm4053_vm6, %v8095_v16, %v14793_v44  ;;  %v8065_v23 = vsel %vm4002_vm3, %v8049_v55, %v14794_v58  ;;  %v13607_v11 = vsel %vm4138_vm11, %v13285_v6, %v7769_v39  ;;  %v14796_v48 = vld [vmem:[#allocation69_spill] sm:$0xff]  ;;  %v14801_v6 = vld [vmem:[#allocation135_spill] sm:$0xff]  ;;  %v14808_v55 = vld [vmem:[#allocation124_spill] sm:$0xff] }
 0x52c   : > { %v13597_v43 = vsel %vm4121_vm10, %v8157_v32, %v7715_v50  ;;  %v8127_v37 = vsel %vm4070_vm7, %v8111_v20, %v14795_v19  ;;  %v8019_v61 = vsel %vm3951_vm0, %v14797_v59, %v14796_v48  ;;  %v8081_v45 = vsel %vm4019_vm4, %v8065_v23, %v14798_v35  ;;  %7980 = vrot.lane.b32.xlu0 %v6557_v5, %s8643_s25  ;;  %v14802_v33 = vld [vmem:[#allocation97_spill] sm:$0xff]  ;;  %v14804_v12 = vld [vmem:[#allocation111_spill] sm:$0xff]  ;;  %v14810_v5 = vld [vmem:[#allocation136_spill] sm:$0xff] }
 0x52d   : > { %7926 = vrot.lane.b32.xlu1 %v13590_v57, %s8642_s24  ;;  %v8143_v15 = vsel %vm4087_vm8, %v8127_v37, %v14799_v27  ;;  %v8035_v28 = vsel %vm3968_vm1, %v8019_v61, %v14800_v25  ;;  %v8097_v52 = vsel %vm4036_vm5, %v8081_v45, %v14801_v6  ;;  %v14803_v17 = vld [vmem:[#allocation145_spill] sm:$0xff]  ;;  %v14805_v29 = vld [vmem:[#allocation151_spill] sm:$0xff]  ;;  %v5871_v19 = vcombine.high %v13254_v1, %v14541_v31  ;;  %v14812_v59 = vld [vmem:[#allocation146_spill] sm:$0xff] }
 0x52e   : > { %v8159_v51 = vsel %vm4104_vm9, %v8143_v15, %v13309_v34  ;;  %v8051_v42 = vsel %vm3985_vm2, %v8035_v28, %v14802_v33  ;;  %v8113_v41 = vsel %vm4053_vm6, %v8097_v52, %v14803_v17  ;;  %v7773_v8 = vpop.permute.xlu0 %7772  ;;  %v14806_v32 = vld [vmem:[#allocation71_spill] sm:$0xff]  ;;  %v14809_v20 = vld [vmem:[#allocation85_spill] sm:$0xff]  ;;  %v6949_v45 = vcombine.high %v13257_v54, %v14541_v31 }
 0x52f   : > { %v7719_v0 = vpop.permute.xlu1 %7718  ;;  %v8067_v34 = vsel %vm4002_vm3, %v8051_v42, %v14804_v12  ;;  %v8129_v16 = vsel %vm4070_vm7, %v8113_v41, %v14805_v29  ;;  %v13642_v7 = vsel %vm4138_vm11, %v13329_v30, %v7773_v8  ;;  %v14807_v50 = vld [vmem:[#allocation255_spill] sm:$0xff]  ;;  %v14813_v27 = vld [vmem:[#allocation113_spill] sm:$0xff] }
 0x530   : > { %v13632_v9 = vsel %vm4121_vm10, %v8159_v51, %v7719_v0  ;;  %v8021_v46 = vsel %vm3951_vm0, %v14807_v50, %v14806_v32  ;;  %v8083_v44 = vsel %vm4019_vm4, %v8067_v34, %v14808_v55  ;;  %v8145_v22 = vsel %vm4087_vm8, %v8129_v16, %v13113_v62  ;;  %7984 = vrot.lane.b32.xlu0 %v6753_v14, %s8643_s25  ;;  %v14811_v37 = vld [vmem:[#allocation99_spill] sm:$0xff]  ;;  %v14815_v28 = vld [vmem:[#allocation125_spill] sm:$0xff] }
 0x531   : > { %7962 = vrot.lane.b32.xlu1 %v5675_v38, %s8643_s25  ;;  %v8037_v39 = vsel %vm3968_vm1, %v8021_v46, %v14809_v20  ;;  %v8099_v30 = vsel %vm4036_vm5, %v8083_v44, %v14810_v5  ;;  %v8161_v58 = vsel %vm4104_vm9, %v8145_v22, %v13358_v40  ;;  %v14814_v40 = vld [vmem:[#allocation152_spill] sm:$0xff]  ;;  %v14816_v52 = vld [vmem:[#allocation247_spill] sm:$0xff]  ;;  %v14817_v54 = vld [vmem:[#allocation137_spill] sm:$0xff]  ;;  %v6263_v32 = vcombine.high %v13278_v4, %v14541_v31 }
 0x532   : > { %v8053_v48 = vsel %vm3985_vm2, %v8037_v39, %v14811_v37  ;;  %v8115_v62 = vsel %vm4053_vm6, %v8099_v30, %v14812_v59  ;;  %v7777_v35 = vpop.permute.xlu0 %7776  ;;  %v14818_v42 = vld [vmem:[#allocation147_spill] sm:$0xff]  ;;  %v14819_v14 = vld [vmem:[#allocation153_spill] sm:$0xff]  ;;  %v6459_v44 = vcombine.high %v13334_v63, %v14541_v31 }
 0x533   : > { %v7723_v23 = vpop.permute.xlu1 %7722  ;;  %v8069_v15 = vsel %vm4002_vm3, %v8053_v48, %v14813_v27  ;;  %v8131_v25 = vsel %vm4070_vm7, %v8115_v62, %v14814_v40  ;;  %v13674_v1 = vsel %vm4138_vm11, %v13377_v13, %v7777_v35  ;;  %v6067_v13 = vcombine.high %v13269_v36, %v14541_v31 }
 0x534   : > { %v8177_v61 = vsel %vm4121_vm10, %v8161_v58, %v7723_v23  ;;  %v8085_v6 = vsel %vm4019_vm4, %v8069_v15, %v14815_v28  ;;  %v8147_v51 = vsel %vm4087_vm8, %v8131_v25, %v14816_v52  ;;  %7988 = vrot.lane.b32.xlu0 %v6949_v45, %s8643_s25 }
 0x535   : > { %7966 = vrot.lane.b32.xlu1 %v5871_v19, %s8643_s25  ;;  %v8101_v0 = vsel %vm4036_vm5, %v8085_v6, %v14817_v54  ;;  %v8163_v38 = vsel %vm4104_vm9, %v8147_v51, %v13400_v24  ;;  %v14820_v24 = vld [vmem:[#allocation156_spill] sm:$0xff] }
 0x536   : > { %v8117_v17 = vsel %vm4053_vm6, %v8101_v0, %v14818_v42  ;;  %v7781_v8 = vpop.permute.xlu0 %7780 }
 0x537   : > { %v7727_v33 = vpop.permute.xlu1 %7726  ;;  %v8133_v12 = vsel %vm4070_vm7, %v8117_v17, %v14819_v14  ;;  %v13695_v34 = vsel %vm4138_vm11, %v13417_v2, %v7781_v8 }
 0x538   : > { %v8179_v41 = vsel %vm4121_vm10, %v8163_v38, %v7727_v33  ;;  %v8149_v29 = vsel %vm4087_vm8, %v8133_v12, %v14820_v24 }
 0x539   : > { %7970 = vrot.lane.b32.xlu1 %v6067_v13, %s8643_s25  ;;  %v8165_v36 = vsel %vm4104_vm9, %v8149_v29, %v13439_v21 }
 0x53a   : > { %v7785_v46 = vpop.permute.xlu0 %7784 }
 0x53b   : > { %v7731_v16 = vpop.permute.xlu1 %7730  ;;  %v13707_v55 = vsel %vm4138_vm11, %v13456_v3, %v7785_v46  ;;  %v6655_v3 = vcombine.high %v13346_v26, %v14541_v31 }
 0x53c   : > { %v8181_v50 = vsel %vm4121_vm10, %v8165_v36, %v7731_v16 }
 0x53d   : > { %7974 = vrot.lane.b32.xlu1 %v6263_v32, %s8643_s25 }
 0x53e   : > { %v7789_v22 = vpop.permute.xlu0 %7788 }
 0x53f   : > { %v7735_v2 = vpop.permute.xlu1 %7734  ;;  %v13716_v4 = vsel %vm4138_vm11, %v13494_v53, %v7789_v22  ;;  %v6851_v53 = vcombine.high %v13554_v18, %v14541_v31 }
 0x540   : > { %v8183_v21 = vsel %vm4121_vm10, %v13485_v56, %v7735_v2 }
 0x541   : > { %7978 = vrot.lane.b32.xlu1 %v6459_v44, %s8643_s25 }
 0x542   : > { %v7793_v5 = vpop.permute.xlu0 %7792 }
 0x543   : > { %v7771_v20 = vpop.permute.xlu1 %7770  ;;  %v13727_v63 = vsel %vm4138_vm11, %v13531_v10, %v7793_v5  ;;  %v7047_v10 = vcombine.high %v13590_v57, %v14541_v31 }
 0x544   : > { %v13723_v39 = vsel %vm4138_vm11, %v13524_v60, %v7771_v20 }
 0x545   : > { %7982 = vrot.lane.b32.xlu1 %v6655_v3, %s8643_s25 }
 0x546   : > { %v7797_v26 = vpop.permute.xlu0 %7796 }
 0x547   : > { %v7775_v56 = vpop.permute.xlu1 %7774  ;;  %v13738_v60 = vsel %vm4138_vm11, %v13571_v49, %v7797_v26 }
 0x548   : > { %v13734_v30 = vsel %vm4138_vm11, %v13561_v47, %v7775_v56 }
 0x549   : > { %7986 = vrot.lane.b32.xlu1 %v6851_v53, %s8643_s25 }
 0x54a   : > { %v7833_v18 = vpop.permute.xlu0 %7832 }
 0x54b   : > { %v7779_v58 = vpop.permute.xlu1 %7778  ;;  %v8200_v36 = vsel %vm4155_vm12, %v13607_v11, %v7833_v18 }
 0x54c   : > { %v13745_v23 = vsel %vm4138_vm11, %v13597_v43, %v7779_v58 }
 0x54d   : > { %7990 = vrot.lane.b32.xlu1 %v7047_v10, %s8643_s25 }
 0x54e   : > { %v7837_v49 = vpop.permute.xlu0 %7836 }
 0x54f   : > { %v7783_v47 = vpop.permute.xlu1 %7782  ;;  %v8202_v2 = vsel %vm4155_vm12, %v13642_v7, %v7837_v49 }
 0x550   : > { %v13750_v19 = vsel %vm4138_vm11, %v13632_v9, %v7783_v47 }
 0x552   : > { %v7841_v59 = vpop.permute.xlu0 %7840 }
 0x553   : > { %v7787_v37 = vpop.permute.xlu1 %7786  ;;  %v8204_v11 = vsel %vm4155_vm12, %v13674_v1, %v7841_v59 }
 0x554   : > { %v13753_v48 = vsel %vm4138_vm11, %v8177_v61, %v7787_v37 }
 0x556   : > { %v7845_v57 = vpop.permute.xlu0 %7844 }
 0x557   : > { %v7791_v62 = vpop.permute.xlu1 %7790  ;;  %v8206_v7 = vsel %vm4155_vm12, %v13695_v34, %v7845_v57 }
 0x558   : > { %v13756_v31 = vsel %vm4138_vm11, %v8179_v41, %v7791_v62 }
 0x55a   : > { %v7849_v45 = vpop.permute.xlu0 %7848 }
 0x55b   : > { %v7795_v43 = vpop.permute.xlu1 %7794  ;;  %v8208_v1 = vsel %vm4155_vm12, %v13707_v55, %v7849_v45 }
 0x55c   : > { %v13759_v35 = vsel %vm4138_vm11, %v8181_v50, %v7795_v43 }
 0x55e   : > { %v7853_v15 = vpop.permute.xlu0 %7852 }
 0x55f   : > { %v7799_v27 = vpop.permute.xlu1 %7798  ;;  %v8210_v34 = vsel %vm4155_vm12, %v13716_v4, %v7853_v15 }
 0x560   : > { %v13762_v9 = vsel %vm4138_vm11, %v8183_v21, %v7799_v27 }
 0x562   : > { %v7857_v25 = vpop.permute.xlu0 %7856 }
 0x563   : > { %v7835_v40 = vpop.permute.xlu1 %7834  ;;  %v8212_v45 = vsel %vm4155_vm12, %v13727_v63, %v7857_v25 }
 0x564   : > { %v8201_v55 = vsel %vm4155_vm12, %v13723_v39, %v7835_v40 }
 0x566   : > { %v13766_v28 = vpop.permute.xlu0 %7860 }
 0x567   : > { %v13764_v61 = vpop.permute.xlu1 %7838  ;;  %v8214_v63 = vsel %vm4155_vm12, %v13738_v60, %v13766_v28 }
 0x568   : > { %v8203_v39 = vsel %vm4155_vm12, %v13734_v30, %v13764_v61 }
 0x56a   : > { %v7897_v52 = vpop.permute.xlu0 %7896 }
 0x56b   : > { %v13768_v6 = vpop.permute.xlu1 %7842  ;;  %v8216_v32 = vsel %vm4172_vm13, %v8200_v36, %v7897_v52 }
 0x56c   : > { %v8205_v30 = vsel %vm4155_vm12, %v13745_v23, %v13768_v6 }
 0x56e   : > { %v7901_v54 = vpop.permute.xlu0 %7900 }
 0x56f   : > { %v13770_v51 = vpop.permute.xlu1 %7846  ;;  %v8218_v21 = vsel %vm4172_vm13, %v8202_v2, %v7901_v54 }
 0x572   : > { %v7905_v38 = vpop.permute.xlu0 %7904 }
 0x573   : > { %v13772_v0 = vpop.permute.xlu1 %7850  ;;  %v8220_v5 = vsel %vm4172_vm13, %v8204_v11, %v7905_v38 }
 0x574   : > { %v8209_v6 = vsel %vm4155_vm12, %v13753_v48, %v13772_v0 }
 0x576   : > { %v7909_v13 = vpop.permute.xlu0 %7908 }
 0x577   : > { %v13774_v33 = vpop.permute.xlu1 %7854  ;;  %v8222_v58 = vsel %vm4172_vm13, %v8206_v7, %v7909_v13 }
 0x57a   : > { %v7913_v17 = vpop.permute.xlu0 %7912 }
 0x57b   : > { %v13776_v42 = vpop.permute.xlu1 %7858  ;;  %v8224_v49 = vsel %vm4172_vm13, %v8208_v1, %v7913_v17 }
 0x57c   : > { %v8213_v48 = vsel %vm4155_vm12, %v13759_v35, %v13776_v42 }
 0x57e   : > { %v7917_v8 = vpop.permute.xlu0 %7916 }
 0x57f   : > { %v13778_v41 = vpop.permute.xlu1 %7862  ;;  %v8226_v57 = vsel %vm4172_vm13, %v8210_v34, %v7917_v8 }
 0x582   : > { %v7921_v12 = vpop.permute.xlu0 %7920 }
 0x583   : > { %v7899_v14 = vpop.permute.xlu1 %7898  ;;  %v8228_v4 = vsel %vm4172_vm13, %v8212_v45, %v7921_v12 }
 0x584   : > { %v8217_v52 = vsel %vm4172_vm13, %v8201_v55, %v7899_v14 }
 0x586   : > { %v7925_v29 = vpop.permute.xlu0 %7924 }
 0x587   : > { %v7903_v24 = vpop.permute.xlu1 %7902  ;;  %v8230_v17 = vsel %vm4172_vm13, %v8214_v63, %v7925_v29 }
 0x588   : > { %v8219_v40 = vsel %vm4172_vm13, %v8203_v39, %v7903_v24  ;;  %v8207_v24 = vsel %vm4155_vm12, %v13750_v19, %v13770_v51  ;;  %v8211_v19 = vsel %vm4155_vm12, %v13756_v31, %v13774_v33  ;;  %v8215_v33 = vsel %vm4155_vm12, %v13762_v9, %v13778_v41 }
 0x58a   : > { %v7961_v50 = vpop.permute.xlu0 %7960 }
 0x58b   : > { %v7907_v16 = vpop.permute.xlu1 %7906  ;;  %v8232_v46 = vsel %vm4189_vm14, %v8216_v32, %v7961_v50 }
 0x58c   : > { %8248 = vst.msk [vmem:[%s11709_s3 + $0x1] sm:$0x1] %vm4206_vm15, %v8232_v46  ;;  %v8221_v60 = vsel %vm4172_vm13, %v8205_v30, %v7907_v16 }
 0x58e   : > { %v7965_v22 = vpop.permute.xlu0 %7964 }
 0x58f   : > { %v7911_v44 = vpop.permute.xlu1 %7910  ;;  %v8234_v20 = vsel %vm4189_vm14, %v8218_v21, %v7965_v22 }
 0x590   : > { %8250 = vst.msk [vmem:[%s11709_s3 + $0x5] sm:$0x1] %vm4206_vm15, %v8234_v20  ;;  %v8223_v29 = vsel %vm4172_vm13, %v8207_v24, %v7911_v44 }
 0x592   : > { %v7969_v56 = vpop.permute.xlu0 %7968 }
 0x593   : > { %v7915_v3 = vpop.permute.xlu1 %7914  ;;  %v8236_v53 = vsel %vm4189_vm14, %v8220_v5, %v7969_v56 }
 0x594   : > { %8252 = vst.msk [vmem:[%s11709_s3 + $0x9] sm:$0x1] %vm4206_vm15, %v8236_v53  ;;  %v8225_v16 = vsel %vm4172_vm13, %v8209_v6, %v7915_v3 }
 0x596   : > { %v7973_v10 = vpop.permute.xlu0 %7972 }
 0x597   : > { %v7919_v26 = vpop.permute.xlu1 %7918  ;;  %v8238_v18 = vsel %vm4189_vm14, %v8222_v58, %v7973_v10 }
 0x598   : > { %8254 = vst.msk [vmem:[%s11709_s3 + $0xd] sm:$0x1] %vm4206_vm15, %v8238_v18  ;;  %v8227_v51 = vsel %vm4172_vm13, %v8211_v19, %v7919_v26 }
 0x59a   : > { %v7977_v37 = vpop.permute.xlu0 %7976 }
 0x59b   : > { %v7923_v47 = vpop.permute.xlu1 %7922  ;;  %v8240_v59 = vsel %vm4189_vm14, %v8224_v49, %v7977_v37 }
 0x59c   : > { %8256 = vst.msk [vmem:[%s11709_s3 + $0x11] sm:$0x1] %vm4206_vm15, %v8240_v59  ;;  %v8229_v0 = vsel %vm4172_vm13, %v8213_v48, %v7923_v47 }
 0x59e   : > { %v7981_v43 = vpop.permute.xlu0 %7980 }
 0x59f   : > { %v7927_v62 = vpop.permute.xlu1 %7926  ;;  %v8242_v27 = vsel %vm4189_vm14, %v8226_v57, %v7981_v43 }
 0x5a0   : > { %8258 = vst.msk [vmem:[%s11709_s3 + $0x15] sm:$0x1] %vm4206_vm15, %v8242_v27  ;;  %v8231_v35 = vsel %vm4172_vm13, %v8215_v33, %v7927_v62 }
 0x5a2   : > { %v7985_v38 = vpop.permute.xlu0 %7984 }
 0x5a3   : > { %v7963_v54 = vpop.permute.xlu1 %7962  ;;  %v8244_v13 = vsel %vm4189_vm14, %v8228_v4, %v7985_v38 }
 0x5a4   : > { %v8233_v15 = vsel %vm4189_vm14, %v8217_v52, %v7963_v54  ;;  %8260 = vst.msk [vmem:[%s11709_s3 + $0x19] sm:$0x1] %vm4206_vm15, %v8244_v13 }
 0x5a5   : > { %8249 = vst.msk [vmem:[%s11709_s3 + $0x3] sm:$0x1] %vm4206_vm15, %v8233_v15 }
 0x5a6   : > { %v7989_v14 = vpop.permute.xlu0 %7988 }
 0x5a7   : > { %v7967_v25 = vpop.permute.xlu1 %7966  ;;  %v8246_v12 = vsel %vm4189_vm14, %v8230_v17, %v7989_v14 }
 0x5a8   : > { %v8235_v8 = vsel %vm4189_vm14, %v8219_v40, %v7967_v25  ;;  %8262 = vst.msk [vmem:[%s11709_s3 + $0x1d] sm:$0x1] %vm4206_vm15, %v8246_v12 }
 0x5a9   : > { %8251 = vst.msk [vmem:[%s11709_s3 + $0x7] sm:$0x1] %vm4206_vm15, %v8235_v8 }
 0x5ab   : > { %v7971_v61 = vpop.permute.xlu1 %7970 }
 0x5ac   : > { %v8237_v28 = vsel %vm4189_vm14, %v8221_v60, %v7971_v61 }
 0x5ad   : > { %8253 = vst.msk [vmem:[%s11709_s3 + $0xb] sm:$0x1] %vm4206_vm15, %v8237_v28 }
 0x5af   : > { %v7975_v36 = vpop.permute.xlu1 %7974 }
 0x5b0   : > { %v8239_v23 = vsel %vm4189_vm14, %v8223_v29, %v7975_v36 }
 0x5b1   : > { %8255 = vst.msk [vmem:[%s11709_s3 + $0xf] sm:$0x1] %vm4206_vm15, %v8239_v23 }
 0x5b3   : > { %v7979_v32 = vpop.permute.xlu1 %7978 }
 0x5b4   : > { %v8241_v50 = vsel %vm4189_vm14, %v8225_v16, %v7979_v32 }
 0x5b5   : > { %8257 = vst.msk [vmem:[%s11709_s3 + $0x13] sm:$0x1] %vm4206_vm15, %v8241_v50 }
 0x5b7   : > { %v7983_v46 = vpop.permute.xlu1 %7982 }
 0x5b8   : > { %v8243_v2 = vsel %vm4189_vm14, %v8227_v51, %v7983_v46 }
 0x5b9   : > { %8259 = vst.msk [vmem:[%s11709_s3 + $0x17] sm:$0x1] %vm4206_vm15, %v8243_v2 }
 0x5bb   : > { %v7987_v44 = vpop.permute.xlu1 %7986 }
 0x5bc   : > { %v8245_v31 = vsel %vm4189_vm14, %v8229_v0, %v7987_v44 }
 0x5bd   : > { %8261 = vst.msk [vmem:[%s11709_s3 + $0x1b] sm:$0x1] %vm4206_vm15, %v8245_v31 }
 0x5bf   : > { %v7991_v42 = vpop.permute.xlu1 %7990 }
 0x5c0   : > { %v8247_v21 = vsel %vm4189_vm14, %v8231_v35, %v7991_v42 }
 0x5c1   : > { %8263 = vst.msk [vmem:[%s11709_s3 + $0x1f] sm:$0x1] %vm4206_vm15, %v8247_v21 }
 0x5c2   : > { %8552 = shalt.err (!%p8549_p5)
}
 0x5c3   : > { %s8553_s16 = scalar_lea.hbm %s13885_s2, 512  ;;  %s8557_s23 = scalar_lea.hbm %s13942_s1, 1024 }
 0x5c4   : > { %p8554_p4 = scmp.ne.s32.totalorder %s13885_s2, %s8553_s16  ;;  %p8558_p12 = scmp.lt.u32.totalorder %s13885_s2, %s13942_s1 }
 0x5c5   : > { %p8559_p1 = scmp.lt.u32.totalorder %s8557_s23, %s8553_s16  ;;  %p8561_p8 = scmp.lt.u32.totalorder %s8553_s16, %s13885_s2 }
 0x5c6   : > { %p8555_p7 = pnand %p8554_p4, %p14821_p9 }
 0x5c7   : > { %p8560_p3 = por %p8559_p1, %p8558_p12 }
 0x5c8   : > { %p8556_p10 = pneg %p8555_p7 }
 0x5c9   : > { %p8562_p11 = por %p8561_p8, %p8560_p3 }
 0x5cb   : > { %p8563_p0 = pnand %p8562_p11, %p8556_p10 }
 0x5cd   : > { %8566 = shalt.err (!%p8563_p0)
}
 0x5ce   : > { %s8645_s28 = smov 32  }
 0x5cf   : > { %8428 = dma.vmem_to_hbm [thread:$0]  (%p14821_p9), %s13888_s27, 512, %s13885_s2, %s8265_s9, %s8645_s28, %s8645_s28, %s8629_s18  }
 0x5d0 PF: > { %s8296_s3 = sand.u32 1, %s8601_s6   ;;  %p14822_p6 = scmp.ne.s32.totalorder %s14028_s21, 0 }
 0x5d1   : > { %p14823_p13 = scmp.ge.s32.totalorder %s8621_s11, 2  ;;  %s8297_s4 = scalar_lea.sflag [#allocation4], %s8296_s3 }
 0x5d3   : > { %p8435_p2 = pnand %p14823_p13, %p14822_p6 }
 0x5d5   : > { %8596 = dma.done.wait (!%p8435_p2), %s8297_s4, 512  }
 0x5d6   : > { %8598 = vsyncadd (!%p8435_p2), %s8297_s4, 4294966784  ;;  %s17_s11 = sadd.s32 1, %s8621_s11   ;;  %s14824_s6 = smov %s8605_s7 }
 0x5d7   : > { %p14_p5 = scmp.ge.s32.totalorder %s17_s11, 4   ;;  %s14825_s7 = smov %s8609_s8 }
 0x5d8   : > { %s14826_s8 = smov %s8712_s20  ;;  %s14827_s9 = smov %s8617_s10 }
 0x5d9   : > { %s14828_s10 = smov %s14830_s14  ;;  %16 = sbr.rel (!%p14_p5) target bundleno = 6 (0x6), region = 70 }
 0x5e0   :  { %8302 = vsyncpa [#allocation3], 1 }
 0x5e1   :  { %8304 = vsyncpa [#allocation3 + $0x1], 1 }
 0x5e2   :  { %8305 = vsyncpa [#allocation4], 1 }
 0x5e3   :  { %8307 = vsyncpa [#allocation4 + $0x1], 1 }

</bundles_post_ra>
